<compile_context>
chip_gen: v5e
topology: v5e:2x2
jax: 0.10.0
libtpu: 0.0.40
codegen_flags: <defaults>
</compile_context>

<pallas_src>
import functools

import jax
import jax.numpy as jnp
from jax import lax
from jax.experimental import pallas as pl
from jax.experimental.pallas import tpu as pltpu


def se1d_kernel(x_ref, w1_ref, w2_ref, o_ref, *, C, L, pool_val, post_scale):
    # x_ref / o_ref : (TB, C*L)  lane-dense blocks of the flattened feature map
    # w1_ref        : (H, C)     torch Linear(C -> H) weight (no bias)
    # w2_ref        : (C, H)     torch Linear(H -> C) weight (no bias)
    CL = C * L
    x = x_ref[...]
    cdt = x.dtype  # compute dtype for the two big (C*L-sized) matmuls

    # ---- per-channel global average pool, on the MXU ----------------------
    # pool[r, c] = pool_val  iff  c*L <= r < (c+1)*L   (generated in-kernel;
    # entries are 0 or a power-of-two scale, exact in any float dtype).
    r = lax.broadcasted_iota(jnp.int32, (CL, C), 0)
    c = lax.broadcasted_iota(jnp.int32, (CL, C), 1)
    pool = ((r >= c * L) & (r < (c + 1) * L)).astype(cdt)
    if pool_val != 1.0:
        pool = pool * jnp.asarray(pool_val, dtype=cdt)
    alpha = jnp.dot(x, pool, preferred_element_type=jnp.float32)      # (TB, C)
    if post_scale != 1.0:
        alpha = alpha * post_scale                                     # non-pow2 L

    # ---- SE bottleneck: Linear(C->H) -> ReLU -> Linear(H->C) -> Sigmoid ---
    # Contract directly against the untransposed torch (out, in) weights.
    h = lax.dot_general(alpha, w1_ref[...].astype(jnp.float32),
                        (((1,), (1,)), ((), ())),
                        preferred_element_type=jnp.float32)            # (TB, H)
    h = jnp.maximum(h, 0.0)
    s = lax.dot_general(h, w2_ref[...].astype(jnp.float32),
                        (((1,), (1,)), ((), ())),
                        preferred_element_type=jnp.float32)            # (TB, C)
    s = jax.nn.sigmoid(s)                                              # (TB, C)

    # ---- broadcast the per-channel scale back to the flat c*L + l layout --
    # expand[c, f] = 1  iff  c*L <= f < (c+1)*L   (== pool^T with unit values)
    cc = lax.broadcasted_iota(jnp.int32, (C, CL), 0)
    ff = lax.broadcasted_iota(jnp.int32, (C, CL), 1)
    expand = ((ff >= cc * L) & (ff < (cc + 1) * L)).astype(cdt)
    s_flat = jnp.dot(s.astype(cdt), expand,
                     preferred_element_type=cdt)                       # (TB, CL)

    # Elementwise scale in the input dtype, full-width lane-dense store.
    o_ref[...] = (x * s_flat).astype(o_ref.dtype)


def _choose_tb(B, row_bytes, const_bytes, *, two_cores, vmem_budget_bytes):
    """Rows of the flattened (B, C*L) map per block.

    Working-set model per grid step: double-buffered in + out tiles plus the
    in-kernel x / s_flat values ~ 6 * tb * row_bytes, plus `const_bytes` of
    in-kernel helper matrices / weights / headroom.  Pick the biggest tb that
    fits the per-generation VMEM budget; keep the sublane dim a multiple of 8
    when the batch is split; only force >= 2 grid steps on parts with two
    TensorCores (v7x)."""
    row_bytes = max(int(row_bytes), 1)
    usable = max(vmem_budget_bytes - const_bytes, 6 * row_bytes)
    tb = max(1, usable // (6 * row_bytes))
    if two_cores and B >= 16:
        tb = min(tb, B // 2)          # >= 2 "parallel" steps -> both TCs get work
    tb = min(tb, B)
    if tb < B:
        tb = max(8, (tb // 8) * 8)    # sublane-aligned blocks when splitting
        tb = min(tb, B)
    return int(tb)


def se_layer_1d(x, w1, w2):
    """x: (B, C, L); w1: (H, C) torch Linear weight; w2: (C, H) torch Linear weight."""
    B, C, L = x.shape
    H = w1.shape[0]
    CL = C * L
    itemsize = jnp.dtype(x.dtype).itemsize

    # Free reshape: flatten (C, L) so the blocked last dim is lane-dense
    # (large multiple of 128) -> full-width vld/vst instead of masked stores.
    x_flat = x.reshape(B, CL)

    # Per-generation budgets: v7x has 2 TCs but only 64 MiB VMEM per TC;
    # v4/v5e/v5p/v6e have one TC and 128 MiB.
    kind = jax.devices()[0].device_kind.lower().replace(" ", "")
    is_v7 = ("v7" in kind) or ("tpu7" in kind)
    vmem_budget = (48 if is_v7 else 96) * 1024 * 1024

    w_bytes = (w1.size * jnp.dtype(w1.dtype).itemsize
               + w2.size * jnp.dtype(w2.dtype).itemsize)
    # In-kernel pool/expand temporaries (+ iota/compare slack), resident
    # weights (double-buffered), plus fixed headroom for small intermediates.
    const_bytes = 4 * C * CL * itemsize + 4 * w_bytes + 8 * 1024 * 1024

    row_bytes = CL * itemsize
    tb = _choose_tb(B, row_bytes, const_bytes,
                    two_cores=is_v7, vmem_budget_bytes=vmem_budget)
    grid = (pl.cdiv(B, tb),)

    # Fold 1/L into the pool matrix only when it is exactly representable
    # (power-of-two L); otherwise keep the separate f32 multiply.
    if L > 0 and (L & (L - 1)) == 0:
        pool_val, post_scale = 1.0 / L, 1.0
    else:
        pool_val, post_scale = 1.0, 1.0 / L

    kernel = functools.partial(se1d_kernel, C=C, L=L,
                               pool_val=float(pool_val),
                               post_scale=float(post_scale))

    # Request only the VMEM we actually need (+ headroom), capped by budget.
    need = 6 * tb * row_bytes + const_bytes
    vmem_limit = int(min(vmem_budget, max(need, 16 * 1024 * 1024)))

    out_flat = pl.pallas_call(
        kernel,
        out_shape=jax.ShapeDtypeStruct((B, CL), x.dtype),
        grid_spec=pltpu.PrefetchScalarGridSpec(
            num_scalar_prefetch=0,
            grid=grid,
            in_specs=[
                pl.BlockSpec((tb, CL), lambda b: (b, 0)),   # x (flattened)
                pl.BlockSpec((H, C), lambda b: (0, 0)),     # w1 (resident, KB-scale)
                pl.BlockSpec((C, H), lambda b: (0, 0)),     # w2 (resident, KB-scale)
            ],
            out_specs=pl.BlockSpec((tb, CL), lambda b: (b, 0)),
        ),
        compiler_params=pltpu.CompilerParams(
            dimension_semantics=("parallel",),
            vmem_limit_bytes=vmem_limit,
        ),
        cost_estimate=pl.CostEstimate(
            flops=2 * B * (CL * C + C * H + H * C + C * CL) + B * CL,
            transcendentals=B * C,
            bytes_accessed=2 * B * CL * itemsize + w_bytes,
        ),
    )(x_flat, w1, w2)

    return out_flat.reshape(B, C, L)


if __name__ == "__main__":
    # Small shapes consistent with the module (reduction=16 requires C >= 16);
    # C=128 keeps the lanes full, B=16 exercises the grid split on v7x.
    B, C, L = 16, 128, 16
    reduction = 16
    H = C // reduction  # 8

    key = jax.random.PRNGKey(0)
    kx, k1, k2 = jax.random.split(key, 3)

    x = jax.random.normal(kx, (B, C, L), dtype=jnp.float32)
    # Deterministic synthetic Linear weights (PyTorch convention: (out, in)).
    w1 = jax.random.normal(k1, (H, C), dtype=jnp.float32) * (1.0 / jnp.sqrt(C))
    w2 = jax.random.normal(k2, (C, H), dtype=jnp.float32) * (1.0 / jnp.sqrt(H))

    out = jax.block_until_ready(se_layer_1d(x, w1, w2))

    # Reference check in plain JAX (same math as the torch module).
    alpha = jnp.mean(x, axis=-1)                    # (B, C)
    alpha = jnp.maximum(alpha @ w1.T, 0.0)          # (B, H)
    alpha = jax.nn.sigmoid(alpha @ w2.T)            # (B, C)
    ref = x * alpha[:, :, None]

    assert out.shape == (B, C, L)
    assert out.dtype == x.dtype
    assert jnp.allclose(out, ref, atol=1e-4, rtol=1e-4), float(
        jnp.max(jnp.abs(out - ref)))

    print("KERNEL_OK")
</pallas_src>

<mosaic_0001>
module attributes {stable_mosaic.version = 11 : i64} {
  func.func @se1d_kernel(%arg0: i32, %arg1: memref<16x2048xf32, #tpu.memory_space<vmem>>, %arg2: memref<8x128xf32, #tpu.memory_space<vmem>>, %arg3: memref<128x8xf32, #tpu.memory_space<vmem>>, %arg4: memref<16x2048xf32, #tpu.memory_space<vmem>>) attributes {dimension_semantics = [#tpu.dimension_semantics<parallel>], iteration_bounds = array<i64: 1>, scalar_prefetch = 0 : i64, scratch_operands = 0 : i64, tpu.core_type = #tpu.core_type<tc>, window_params = [{transform_indices = @transform_0, window_bounds = array<i64: 16, 2048>}, {pipeline_mode = #tpu.pipeline_mode<synchronous>, transform_indices = @transform_1, window_bounds = array<i64: 8, 128>}, {pipeline_mode = #tpu.pipeline_mode<synchronous>, transform_indices = @transform_2, window_bounds = array<i64: 128, 8>}, {transform_indices = @transform_3, window_bounds = array<i64: 16, 2048>}]} {
    %c0 = arith.constant 0 : index
    %c0_0 = arith.constant 0 : index
    %0 = vector.load %arg1[%c0, %c0_0] : memref<16x2048xf32, #tpu.memory_space<vmem>>, vector<16x2048xf32>
    %1 = tpu.iota {dimensions = array<i32: 0>} : vector<2048x128xi32>
    %2 = tpu.iota {dimensions = array<i32: 1>} : vector<2048x128xi32>
    %c16_i32 = arith.constant 16 : i32
    %3 = vector.broadcast %c16_i32 : i32 to vector<2048x128xi32>
    %4 = arith.muli %2, %3 : vector<2048x128xi32>
    %5 = arith.cmpi sge, %1, %4 : vector<2048x128xi32>
    %c1_i32 = arith.constant 1 : i32
    %6 = vector.broadcast %c1_i32 : i32 to vector<2048x128xi32>
    %7 = arith.addi %2, %6 : vector<2048x128xi32>
    %c16_i32_1 = arith.constant 16 : i32
    %8 = vector.broadcast %c16_i32_1 : i32 to vector<2048x128xi32>
    %9 = arith.muli %7, %8 : vector<2048x128xi32>
    %10 = arith.cmpi slt, %1, %9 : vector<2048x128xi32>
    %11 = arith.andi %5, %10 : vector<2048x128xi1>
    %12 = arith.extui %11 : vector<2048x128xi1> to vector<2048x128xi32>
    %13 = arith.sitofp %12 : vector<2048x128xi32> to vector<2048x128xf32>
    %cst = arith.constant 6.250000e-02 : f32
    %14 = vector.broadcast %cst : f32 to vector<2048x128xf32>
    %15 = arith.mulf %13, %14 : vector<2048x128xf32>
    %cst_2 = arith.constant dense<0.000000e+00> : vector<16x128xf32>
    %16 = tpu.matmul %0, %15, %cst_2 {dimension_numbers = #tpu.dot_dimension_numbers<[1], [0], [0], [1], [0, 0, 1, 1], [], []>} : vector<16x2048xf32>, vector<2048x128xf32>, vector<16x128xf32> -> vector<16x128xf32>
    %c0_3 = arith.constant 0 : index
    %c0_4 = arith.constant 0 : index
    %17 = vector.load %arg2[%c0_3, %c0_4] : memref<8x128xf32, #tpu.memory_space<vmem>>, vector<8x128xf32>
    %cst_5 = arith.constant dense<0.000000e+00> : vector<16x8xf32>
    %18 = tpu.matmul %16, %17, %cst_5 {dimension_numbers = #tpu.dot_dimension_numbers<[1], [1], [0], [0], [0, 0, 1, 0], [], []>} : vector<16x128xf32>, vector<8x128xf32>, vector<16x8xf32> -> vector<16x8xf32>
    %cst_6 = arith.constant 0.000000e+00 : f32
    %19 = vector.broadcast %cst_6 : f32 to vector<16x8xf32>
    %20 = arith.maximumf %18, %19 : vector<16x8xf32>
    %c0_7 = arith.constant 0 : index
    %c0_8 = arith.constant 0 : index
    %21 = vector.load %arg3[%c0_7, %c0_8] : memref<128x8xf32, #tpu.memory_space<vmem>>, vector<128x8xf32>
    %cst_9 = arith.constant dense<0.000000e+00> : vector<16x128xf32>
    %22 = tpu.matmul %20, %21, %cst_9 {dimension_numbers = #tpu.dot_dimension_numbers<[1], [1], [0], [0], [0, 0, 1, 0], [], []>} : vector<16x8xf32>, vector<128x8xf32>, vector<16x128xf32> -> vector<16x128xf32>
    %23 = arith.negf %22 : vector<16x128xf32>
    %24 = math.exp %23 : vector<16x128xf32>
    %cst_10 = arith.constant 1.000000e+00 : f32
    %25 = vector.broadcast %cst_10 : f32 to vector<16x128xf32>
    %26 = arith.addf %25, %24 : vector<16x128xf32>
    %27 = arith.divf %25, %26 : vector<16x128xf32>
    %28 = tpu.iota {dimensions = array<i32: 0>} : vector<128x2048xi32>
    %29 = tpu.iota {dimensions = array<i32: 1>} : vector<128x2048xi32>
    %c16_i32_11 = arith.constant 16 : i32
    %30 = vector.broadcast %c16_i32_11 : i32 to vector<128x2048xi32>
    %31 = arith.muli %28, %30 : vector<128x2048xi32>
    %32 = arith.cmpi sge, %29, %31 : vector<128x2048xi32>
    %c1_i32_12 = arith.constant 1 : i32
    %33 = vector.broadcast %c1_i32_12 : i32 to vector<128x2048xi32>
    %34 = arith.addi %28, %33 : vector<128x2048xi32>
    %c16_i32_13 = arith.constant 16 : i32
    %35 = vector.broadcast %c16_i32_13 : i32 to vector<128x2048xi32>
    %36 = arith.muli %34, %35 : vector<128x2048xi32>
    %37 = arith.cmpi slt, %29, %36 : vector<128x2048xi32>
    %38 = arith.andi %32, %37 : vector<128x2048xi1>
    %39 = arith.extui %38 : vector<128x2048xi1> to vector<128x2048xi32>
    %40 = arith.sitofp %39 : vector<128x2048xi32> to vector<128x2048xf32>
    %cst_14 = arith.constant dense<0.000000e+00> : vector<16x2048xf32>
    %41 = tpu.matmul %27, %40, %cst_14 {dimension_numbers = #tpu.dot_dimension_numbers<[1], [0], [0], [1], [0, 0, 1, 1], [], []>} : vector<16x128xf32>, vector<128x2048xf32>, vector<16x2048xf32> -> vector<16x2048xf32>
    %42 = arith.mulf %0, %41 : vector<16x2048xf32>
    %c0_15 = arith.constant 0 : index
    %c0_16 = arith.constant 0 : index
    %43 = vector.load %arg4[%c0_15, %c0_16] : memref<16x2048xf32, #tpu.memory_space<vmem>>, vector<16x2048xf32>
    tpu.vector_store %arg4[%c0_15, %c0_16], %42 {strides = array<i32>} : memref<16x2048xf32, #tpu.memory_space<vmem>>, vector<16x2048xf32>,
    return
  }
  func.func @transform_0(%arg0: i32) -> (i32, i32) {
    %c0_i32 = arith.constant 0 : i32
    %c0_i32_0 = arith.constant 0 : i32
    return %arg0, %c0_i32 : i32, i32
  }
  func.func @transform_1(%arg0: i32) -> (i32, i32) {
    %c0_i32 = arith.constant 0 : i32
    %c0_i32_0 = arith.constant 0 : i32
    %c0_i32_1 = arith.constant 0 : i32
    return %c0_i32, %c0_i32_0 : i32, i32
  }
  func.func @transform_2(%arg0: i32) -> (i32, i32) {
    %c0_i32 = arith.constant 0 : i32
    %c0_i32_0 = arith.constant 0 : i32
    %c0_i32_1 = arith.constant 0 : i32
    return %c0_i32, %c0_i32_0 : i32, i32
  }
  func.func @transform_3(%arg0: i32) -> (i32, i32) {
    %c0_i32 = arith.constant 0 : i32
    %c0_i32_0 = arith.constant 0 : i32
    return %arg0, %c0_i32 : i32, i32
  }
}

</mosaic_0001>

<bundles_post_ra>
// kernel: tpu_custom_call.1
= control target key start
LH: loop header
LB: loop body
LE: loop exit
PB: predicated region body
PF: predicated region fallthrough
CT: control target
= control target key end

     0   :  { %8 = vsyncpa [#allocation3], 0  ;;  %s8068_s0 = inlined_call_operand.hbm [shape: f32[16,2048], index: 0, kind: input, shape index: {}]   ;;  %s8069_s1 = inlined_call_operand.vmem [shape: f32[8,128], index: 1, kind: input, shape index: {}]   ;;  %s8070_s2 = inlined_call_operand.vmem [shape: f32[128,8], index: 2, kind: input, shape index: {}]   ;;  %s8071_s3 = inlined_call_operand.hbm [shape: f32[16,2048], index: 3, kind: output, shape index: {}]  }
   0x1   :  { %9 = vsyncpa [#allocation4], 0  ;;  %s14_s14 = sshll.u32 %s8068_s0, 4  ;;  %s5083_s15 = smov [#allocation2]   ;;  %v63_v0 = vlaneseq  ;;  %s15_s14 = int_to_ptr.hbm [resolvable:$true] %s14_s14 }
   0x2   :  { %s16_s16 = sshll.u32 %s5083_s15, 4  ;;  %s5084_s17 = smov 2048   ;;  %s17_s16 = int_to_ptr.vmem [resolvable:$true] %s16_s16 }
   0x3   :  { %s5085_s18 = smov 128  }
   0x4   :  { %22 = dma.hbm_to_vmem [thread:$0]  %s15_s14, 4096, %s17_s16, [#allocation3], %s5084_s17, %s5084_s17, %s5085_s18  }
   0x5   :  { %5079 = dma.done.wait [#allocation3], 4096  }
   0x6   :  { %5080 = vsyncadd [#allocation3], 4294963200  ;;  %v5115_v1 = vshrl.u32 %v63_v0, 7  ;;  %v5117_v2 = vand.u32 127, %v63_v0  ;;  %v5086_v12 = vmov 0.0   ;;  %s4168_s27 = sshll.u32 %s8071_s3, 4  ;;  %s4169_s27 = int_to_ptr.hbm [resolvable:$true] %s4168_s27 }
   0x8   :  { %v5120_v3 = vadd.s32 120, %v5115_v1  ;;  %v5123_v4 = vmul.u32 16, %v5117_v2  ;;  %v579_v5 = vadd.s32 1, %v5117_v2  ;;  %v111_v6 = vadd.s32 376, %v5115_v1 }
   0x9   :  { %v5128_v7 = vadd.s32 112, %v5115_v1  ;;  %v95_v8 = vadd.s32 248, %v5115_v1  ;;  %v110_v9 = vadd.s32 368, %v5115_v1  ;;  %v127_v11 = vadd.s32 504, %v5115_v1 }
   0xa   :  { %vm338_vm0 = vcmp.ge.s32.totalorder %v5120_v3, %v5123_v4  ;;  %v5134_v10 = vmul.u32 16, %v579_v5  ;;  %vm370_vm1 = vcmp.ge.s32.totalorder %v111_v6, %v5123_v4  ;;  %v5154_v16 = vadd.s32 104, %v5115_v1 }
   0xb   :  { %vm337_vm4 = vcmp.ge.s32.totalorder %v5128_v7, %v5123_v4  ;;  %vm354_vm7 = vcmp.ge.s32.totalorder %v95_v8, %v5123_v4  ;;  %vm369_vm9 = vcmp.ge.s32.totalorder %v110_v9, %v5123_v4  ;;  %vm386_vm12 = vcmp.ge.s32.totalorder %v127_v11, %v5123_v4 }
   0xc   :  { %vm596_vm2 = vcmp.lt.s32.totalorder %v5120_v3, %v5134_v10  ;;  %vm628_vm3 = vcmp.lt.s32.totalorder %v111_v6, %v5134_v10  ;;  %vm595_vm5 = vcmp.lt.s32.totalorder %v5128_v7, %v5134_v10  ;;  %vm612_vm8 = vcmp.lt.s32.totalorder %v95_v8, %v5134_v10 }
   0xd   :  { %vm852_vm6 = vmand %vm338_vm0, %vm596_vm2  ;;  %vm627_vm11 = vcmp.lt.s32.totalorder %v110_v9, %v5134_v10  ;;  %vm644_vm13 = vcmp.lt.s32.totalorder %v127_v11, %v5134_v10  ;;  %v94_v17 = vadd.s32 240, %v5115_v1  ;;  %v109_v20 = vadd.s32 360, %v5115_v1 }
   0xe   :  { %v4196_v13 = vsel %vm852_vm6, 1.0, %v5086_v12  ;;  %vm884_vm10 = vmand %vm370_vm1, %vm628_vm3  ;;  %v126_v21 = vadd.s32 496, %v5115_v1  ;;  %vm336_vm1 = vcmp.ge.s32.totalorder %v5154_v16, %v5123_v4  ;;  %vm594_vm2 = vcmp.lt.s32.totalorder %v5154_v16, %v5134_v10 }
   0xf   :  { %v1620_v14 = vmul.f32 0.0625, %v4196_v13  ;;  %v4228_v15 = vsel %vm884_vm10, 1.0, %v5086_v12  ;;  %vm851_vm14 = vmand %vm337_vm4, %vm595_vm5  ;;  %vm353_vm5 = vcmp.ge.s32.totalorder %v94_v17, %v5123_v4  ;;  %vm611_vm6 = vcmp.lt.s32.totalorder %v94_v17, %v5134_v10 }
  0x10   :  { %v1652_v18 = vmul.f32 0.0625, %v4228_v15  ;;  %v4195_v19 = vsel %vm851_vm14, 1.0, %v5086_v12  ;;  %vm868_vm15 = vmand %vm354_vm7, %vm612_vm8  ;;  %vm368_vm8 = vcmp.ge.s32.totalorder %v109_v20, %v5123_v4  ;;  %vm385_vm10 = vcmp.ge.s32.totalorder %v126_v21, %v5123_v4 }
  0x11   :  { %1861 = vmatpush.msra.mxu0 %v1620_v14  ;;  %v1619_v22 = vmul.f32 0.0625, %v4195_v19  ;;  %v4212_v23 = vsel %vm868_vm15, 1.0, %v5086_v12  ;;  %vm883_vm0 = vmand %vm369_vm9, %vm627_vm11  ;;  %vm626_vm9 = vcmp.lt.s32.totalorder %v109_v20, %v5134_v10  ;;  %v5188_v33 = vadd.s32 96, %v5115_v1 }
  0x12   :  { %1907 = vmatpush.msra.mxu2 %v1652_v18  ;;  %v1636_v24 = vmul.f32 0.0625, %v4212_v23  ;;  %v4227_v25 = vsel %vm883_vm0, 1.0, %v5086_v12  ;;  %vm900_vm3 = vmand %vm386_vm12, %vm644_vm13  ;;  %vm643_vm12 = vcmp.lt.s32.totalorder %v126_v21, %v5134_v10  ;;  %v93_v34 = vadd.s32 232, %v5115_v1 }
  0x13   :  { %1862 = vmatpush.msra.mxu0 %v1619_v22  ;;  %v1651_v26 = vmul.f32 0.0625, %v4227_v25  ;;  %v4244_v27 = vsel %vm900_vm3, 1.0, %v5086_v12  ;;  %vm850_vm4 = vmand %vm336_vm1, %vm594_vm2  ;;  %v108_v36 = vadd.s32 352, %v5115_v1  ;;  %v125_v37 = vadd.s32 488, %v5115_v1 }
  0x14   :  { %1884 = vmatpush.msra.mxu1 %v1636_v24  ;;  %v1668_v28 = vmul.f32 0.0625, %v4244_v27  ;;  %v4194_v29 = vsel %vm850_vm4, 1.0, %v5086_v12  ;;  %vm867_vm7 = vmand %vm353_vm5, %vm611_vm6  ;;  %v5195_v38 = vadd.s32 88, %v5115_v1  ;;  %vm335_vm14 = vcmp.ge.s32.totalorder %v5188_v33, %v5123_v4 }
  0x15   :  { %1908 = vmatpush.msra.mxu2 %v1651_v26  ;;  %v1618_v30 = vmul.f32 0.0625, %v4194_v29  ;;  %v4211_v31 = vsel %vm867_vm7, 1.0, %v5086_v12  ;;  %vm882_vm11 = vmand %vm368_vm8, %vm626_vm9  ;;  %vm593_vm15 = vcmp.lt.s32.totalorder %v5188_v33, %v5134_v10  ;;  %vm352_vm1 = vcmp.ge.s32.totalorder %v93_v34, %v5123_v4 }
  0x16   :  { %1930 = vmatpush.msra.mxu3 %v1668_v28  ;;  %v1635_v32 = vmul.f32 0.0625, %v4211_v31  ;;  %v4226_v35 = vsel %vm882_vm11, 1.0, %v5086_v12  ;;  %vm899_vm13 = vmand %vm385_vm10, %vm643_vm12  ;;  %vm610_vm2 = vcmp.lt.s32.totalorder %v93_v34, %v5134_v10  ;;  %vm367_vm3 = vcmp.ge.s32.totalorder %v108_v36, %v5123_v4 }
  0x17   :  { %1863 = vmatpush.msra.mxu0 %v1618_v30  ;;  %v1650_v39 = vmul.f32 0.0625, %v4226_v35  ;;  %v4243_v40 = vsel %vm899_vm13, 1.0, %v5086_v12  ;;  %vm849_vm0 = vmand %vm335_vm14, %vm593_vm15  ;;  %vm625_vm4 = vcmp.lt.s32.totalorder %v108_v36, %v5134_v10  ;;  %vm384_vm6 = vcmp.ge.s32.totalorder %v125_v37, %v5123_v4 }
  0x18   :  { %1885 = vmatpush.msra.mxu1 %v1635_v32  ;;  %v1667_v41 = vmul.f32 0.0625, %v4243_v40  ;;  %v4193_v42 = vsel %vm849_vm0, 1.0, %v5086_v12  ;;  %vm866_vm5 = vmand %vm352_vm1, %vm610_vm2  ;;  %vm642_vm7 = vcmp.lt.s32.totalorder %v125_v37, %v5134_v10  ;;  %vm334_vm9 = vcmp.ge.s32.totalorder %v5195_v38, %v5123_v4 }
  0x19   :  { %1909 = vmatpush.msra.mxu2 %v1650_v39  ;;  %v1617_v43 = vmul.f32 0.0625, %v4193_v42  ;;  %v4210_v44 = vsel %vm866_vm5, 1.0, %v5086_v12  ;;  %vm881_vm8 = vmand %vm367_vm3, %vm625_vm4  ;;  %vm592_vm10 = vcmp.lt.s32.totalorder %v5195_v38, %v5134_v10  ;;  %v92_v47 = vadd.s32 224, %v5115_v1 }
  0x1a   :  { %1931 = vmatpush.msra.mxu3 %v1667_v41  ;;  %v1634_v45 = vmul.f32 0.0625, %v4210_v44  ;;  %v4225_v46 = vsel %vm881_vm8, 1.0, %v5086_v12  ;;  %vm898_vm11 = vmand %vm384_vm6, %vm642_vm7  ;;  %v107_v50 = vadd.s32 344, %v5115_v1  ;;  %v124_v51 = vadd.s32 480, %v5115_v1 }
  0x1b   :  { %1864 = vmatpush.msra.mxu0 %v1617_v43  ;;  %v1649_v48 = vmul.f32 0.0625, %v4225_v46  ;;  %v4242_v49 = vsel %vm898_vm11, 1.0, %v5086_v12  ;;  %vm848_vm12 = vmand %vm334_vm9, %vm592_vm10  ;;  %vm351_vm13 = vcmp.ge.s32.totalorder %v92_v47, %v5123_v4  ;;  %vm609_vm14 = vcmp.lt.s32.totalorder %v92_v47, %v5134_v10 }
  0x1c   :  { %1886 = vmatpush.msra.mxu1 %v1634_v45  ;;  %v1666_v52 = vmul.f32 0.0625, %v4242_v49  ;;  %v4192_v53 = vsel %vm848_vm12, 1.0, %v5086_v12  ;;  %vm366_vm15 = vcmp.ge.s32.totalorder %v107_v50, %v5123_v4  ;;  %vm624_vm0 = vcmp.lt.s32.totalorder %v107_v50, %v5134_v10  ;;  %vm865_vm1 = vmand %vm351_vm13, %vm609_vm14 }
  0x1d   :  { %1910 = vmatpush.msra.mxu2 %v1649_v48  ;;  %v1616_v54 = vmul.f32 0.0625, %v4192_v53  ;;  %vm383_vm2 = vcmp.ge.s32.totalorder %v124_v51, %v5123_v4  ;;  %vm641_vm3 = vcmp.lt.s32.totalorder %v124_v51, %v5134_v10  ;;  %v5227_v55 = vadd.s32 80, %v5115_v1  ;;  %vm880_vm4 = vmand %vm366_vm15, %vm624_vm0 }
  0x1e   :  { %1932 = vmatpush.msra.mxu3 %v1666_v52  ;;  %v91_v56 = vadd.s32 216, %v5115_v1  ;;  %v4209_v57 = vsel %vm865_vm1, 1.0, %v5086_v12  ;;  %v106_v58 = vadd.s32 336, %v5115_v1  ;;  %v123_v59 = vadd.s32 472, %v5115_v1  ;;  %vm897_vm5 = vmand %vm383_vm2, %vm641_vm3 }
  0x1f   :  { %1865 = vmatpush.msra.mxu0 %v1616_v54  ;;  %v5234_v60 = vadd.s32 72, %v5115_v1  ;;  %v1633_v61 = vmul.f32 0.0625, %v4209_v57  ;;  %v4224_v62 = vsel %vm880_vm4, 1.0, %v5086_v12  ;;  %vm333_vm6 = vcmp.ge.s32.totalorder %v5227_v55, %v5123_v4 }
  0x20   :  { %vm591_vm7 = vcmp.lt.s32.totalorder %v5227_v55, %v5134_v10  ;;  %v1648_v63 = vmul.f32 0.0625, %v4224_v62  ;;  %v4241_v0 = vsel %vm897_vm5, 1.0, %v5086_v12  ;;  %vm350_vm9 = vcmp.ge.s32.totalorder %v91_v56, %v5123_v4 }
  0x21   :  { %vm847_vm8 = vmand %vm333_vm6, %vm591_vm7  ;;  %1887 = vmatpush.msra.mxu1 %v1633_v61  ;;  %v1665_v5 = vmul.f32 0.0625, %v4241_v0  ;;  %vm608_vm10 = vcmp.lt.s32.totalorder %v91_v56, %v5134_v10  ;;  %vm365_vm12 = vcmp.ge.s32.totalorder %v106_v58, %v5123_v4  ;;  %vm623_vm13 = vcmp.lt.s32.totalorder %v106_v58, %v5134_v10 }
  0x22   :  { %v4191_v6 = vsel %vm847_vm8, 1.0, %v5086_v12  ;;  %1911 = vmatpush.msra.mxu2 %v1648_v63  ;;  %vm864_vm11 = vmand %vm350_vm9, %vm608_vm10  ;;  %vm382_vm15 = vcmp.ge.s32.totalorder %v123_v59, %v5123_v4  ;;  %vm640_vm0 = vcmp.lt.s32.totalorder %v123_v59, %v5134_v10  ;;  %vm332_vm1 = vcmp.ge.s32.totalorder %v5234_v60, %v5123_v4 }
  0x23   :  { %v1615_v8 = vmul.f32 0.0625, %v4191_v6  ;;  %1933 = vmatpush.msra.mxu3 %v1665_v5  ;;  %v4208_v9 = vsel %vm864_vm11, 1.0, %v5086_v12  ;;  %vm879_vm14 = vmand %vm365_vm12, %vm623_vm13  ;;  %vm590_vm3 = vcmp.lt.s32.totalorder %v5234_v60, %v5134_v10  ;;  %v90_v17 = vadd.s32 208, %v5115_v1 }
  0x24   :  { %v1632_v11 = vmul.f32 0.0625, %v4208_v9  ;;  %v4223_v13 = vsel %vm879_vm14, 1.0, %v5086_v12  ;;  %vm896_vm2 = vmand %vm382_vm15, %vm640_vm0  ;;  %v105_v20 = vadd.s32 328, %v5115_v1  ;;  %v122_v21 = vadd.s32 464, %v5115_v1 }
  0x25   :  { %1866 = vmatpush.msra.mxu0 %v1615_v8  ;;  %v1647_v14 = vmul.f32 0.0625, %v4223_v13  ;;  %v4240_v15 = vsel %vm896_vm2, 1.0, %v5086_v12  ;;  %vm846_vm4 = vmand %vm332_vm1, %vm590_vm3  ;;  %vm349_vm5 = vcmp.ge.s32.totalorder %v90_v17, %v5123_v4  ;;  %vm607_vm6 = vcmp.lt.s32.totalorder %v90_v17, %v5134_v10 }
  0x26   :  { %1888 = vmatpush.msra.mxu1 %v1632_v11  ;;  %v1664_v18 = vmul.f32 0.0625, %v4240_v15  ;;  %v4190_v19 = vsel %vm846_vm4, 1.0, %v5086_v12  ;;  %vm863_vm7 = vmand %vm349_vm5, %vm607_vm6  ;;  %vm364_vm8 = vcmp.ge.s32.totalorder %v105_v20, %v5123_v4  ;;  %vm622_vm9 = vcmp.lt.s32.totalorder %v105_v20, %v5134_v10 }
  0x27   :  { %1912 = vmatpush.msra.mxu2 %v1647_v14  ;;  %v1614_v22 = vmul.f32 0.0625, %v4190_v19  ;;  %vm381_vm10 = vcmp.ge.s32.totalorder %v122_v21, %v5123_v4  ;;  %vm639_vm11 = vcmp.lt.s32.totalorder %v122_v21, %v5134_v10  ;;  %v4207_v23 = vsel %vm863_vm7, 1.0, %v5086_v12  ;;  %vm878_vm12 = vmand %vm364_vm8, %vm622_vm9 }
  0x28   :  { %1934 = vmatpush.msra.mxu3 %v1664_v18  ;;  %v5268_v24 = vadd.s32 64, %v5115_v1  ;;  %v89_v25 = vadd.s32 200, %v5115_v1  ;;  %v104_v26 = vadd.s32 320, %v5115_v1  ;;  %v1631_v27 = vmul.f32 0.0625, %v4207_v23  ;;  %vm895_vm13 = vmand %vm381_vm10, %vm639_vm11 }
  0x29   :  { %1867 = vmatpush.msra.mxu0 %v1614_v22  ;;  %v4222_v28 = vsel %vm878_vm12, 1.0, %v5086_v12  ;;  %v121_v29 = vadd.s32 456, %v5115_v1  ;;  %v5275_v30 = vadd.s32 56, %v5115_v1  ;;  %v4239_v32 = vsel %vm895_vm13, 1.0, %v5086_v12 }
  0x2a   :  { %v1646_v31 = vmul.f32 0.0625, %v4222_v28  ;;  %vm331_vm14 = vcmp.ge.s32.totalorder %v5268_v24, %v5123_v4  ;;  %vm589_vm15 = vcmp.lt.s32.totalorder %v5268_v24, %v5134_v10  ;;  %1889 = vmatpush.msra.mxu1 %v1631_v27  ;;  %v1663_v34 = vmul.f32 0.0625, %v4239_v32 }
  0x2b   :  { %vm845_vm0 = vmand %vm331_vm14, %vm589_vm15  ;;  %vm348_vm1 = vcmp.ge.s32.totalorder %v89_v25, %v5123_v4  ;;  %vm606_vm2 = vcmp.lt.s32.totalorder %v89_v25, %v5134_v10  ;;  %vm363_vm3 = vcmp.ge.s32.totalorder %v104_v26, %v5123_v4  ;;  %vm621_vm4 = vcmp.lt.s32.totalorder %v104_v26, %v5134_v10 }
  0x2c   :  { %1913 = vmatpush.msra.mxu2 %v1646_v31  ;;  %v4189_v35 = vsel %vm845_vm0, 1.0, %v5086_v12  ;;  %1935 = vmatpush.msra.mxu3 %v1663_v34  ;;  %vm862_vm5 = vmand %vm348_vm1, %vm606_vm2  ;;  %vm380_vm6 = vcmp.ge.s32.totalorder %v121_v29, %v5123_v4  ;;  %vm638_vm7 = vcmp.lt.s32.totalorder %v121_v29, %v5134_v10  ;;  %vm330_vm9 = vcmp.ge.s32.totalorder %v5275_v30, %v5123_v4 }
  0x2d   :  { %v1613_v36 = vmul.f32 0.0625, %v4189_v35  ;;  %v4206_v37 = vsel %vm862_vm5, 1.0, %v5086_v12  ;;  %vm877_vm8 = vmand %vm363_vm3, %vm621_vm4  ;;  %vm588_vm10 = vcmp.lt.s32.totalorder %v5275_v30, %v5134_v10  ;;  %v88_v41 = vadd.s32 192, %v5115_v1 }
  0x2e   :  { %v1630_v39 = vmul.f32 0.0625, %v4206_v37  ;;  %v4221_v40 = vsel %vm877_vm8, 1.0, %v5086_v12  ;;  %vm894_vm11 = vmand %vm380_vm6, %vm638_vm7  ;;  %v103_v44 = vadd.s32 312, %v5115_v1  ;;  %v120_v45 = vadd.s32 448, %v5115_v1 }
  0x2f   :  { %1868 = vmatpush.msra.mxu0 %v1613_v36  ;;  %v1645_v42 = vmul.f32 0.0625, %v4221_v40  ;;  %v4238_v43 = vsel %vm894_vm11, 1.0, %v5086_v12  ;;  %vm844_vm12 = vmand %vm330_vm9, %vm588_vm10  ;;  %vm347_vm13 = vcmp.ge.s32.totalorder %v88_v41, %v5123_v4  ;;  %vm605_vm14 = vcmp.lt.s32.totalorder %v88_v41, %v5134_v10 }
  0x30   :  { %1890 = vmatpush.msra.mxu1 %v1630_v39  ;;  %v1662_v46 = vmul.f32 0.0625, %v4238_v43  ;;  %v4188_v47 = vsel %vm844_vm12, 1.0, %v5086_v12  ;;  %vm362_vm15 = vcmp.ge.s32.totalorder %v103_v44, %v5123_v4  ;;  %vm620_vm0 = vcmp.lt.s32.totalorder %v103_v44, %v5134_v10  ;;  %vm861_vm1 = vmand %vm347_vm13, %vm605_vm14 }
  0x31   :  { %1914 = vmatpush.msra.mxu2 %v1645_v42  ;;  %v1612_v48 = vmul.f32 0.0625, %v4188_v47  ;;  %vm379_vm2 = vcmp.ge.s32.totalorder %v120_v45, %v5123_v4  ;;  %vm637_vm3 = vcmp.lt.s32.totalorder %v120_v45, %v5134_v10  ;;  %v5307_v49 = vadd.s32 48, %v5115_v1  ;;  %vm876_vm4 = vmand %vm362_vm15, %vm620_vm0 }
  0x32   :  { %1936 = vmatpush.msra.mxu3 %v1662_v46  ;;  %v87_v50 = vadd.s32 184, %v5115_v1  ;;  %v4205_v51 = vsel %vm861_vm1, 1.0, %v5086_v12  ;;  %v102_v52 = vadd.s32 304, %v5115_v1  ;;  %v119_v53 = vadd.s32 440, %v5115_v1  ;;  %vm893_vm5 = vmand %vm379_vm2, %vm637_vm3 }
  0x33   :  { %1869 = vmatpush.msra.mxu0 %v1612_v48  ;;  %v5314_v54 = vadd.s32 40, %v5115_v1  ;;  %v1629_v56 = vmul.f32 0.0625, %v4205_v51  ;;  %v4220_v57 = vsel %vm876_vm4, 1.0, %v5086_v12  ;;  %vm329_vm6 = vcmp.ge.s32.totalorder %v5307_v49, %v5123_v4 }
  0x34   :  { %vm587_vm7 = vcmp.lt.s32.totalorder %v5307_v49, %v5134_v10  ;;  %v1644_v58 = vmul.f32 0.0625, %v4220_v57  ;;  %v4237_v59 = vsel %vm893_vm5, 1.0, %v5086_v12  ;;  %vm346_vm9 = vcmp.ge.s32.totalorder %v87_v50, %v5123_v4 }
  0x35   :  { %vm843_vm8 = vmand %vm329_vm6, %vm587_vm7  ;;  %1891 = vmatpush.msra.mxu1 %v1629_v56  ;;  %v1661_v61 = vmul.f32 0.0625, %v4237_v59  ;;  %vm604_vm10 = vcmp.lt.s32.totalorder %v87_v50, %v5134_v10  ;;  %vm361_vm12 = vcmp.ge.s32.totalorder %v102_v52, %v5123_v4  ;;  %vm619_vm13 = vcmp.lt.s32.totalorder %v102_v52, %v5134_v10 }
  0x36   :  { %v4187_v62 = vsel %vm843_vm8, 1.0, %v5086_v12  ;;  %1915 = vmatpush.msra.mxu2 %v1644_v58  ;;  %vm860_vm11 = vmand %vm346_vm9, %vm604_vm10  ;;  %vm378_vm15 = vcmp.ge.s32.totalorder %v119_v53, %v5123_v4  ;;  %vm636_vm0 = vcmp.lt.s32.totalorder %v119_v53, %v5134_v10  ;;  %vm328_vm1 = vcmp.ge.s32.totalorder %v5314_v54, %v5123_v4 }
  0x37   :  { %v1611_v63 = vmul.f32 0.0625, %v4187_v62  ;;  %1937 = vmatpush.msra.mxu3 %v1661_v61  ;;  %v4204_v0 = vsel %vm860_vm11, 1.0, %v5086_v12  ;;  %vm875_vm14 = vmand %vm361_vm12, %vm619_vm13  ;;  %vm586_vm3 = vcmp.lt.s32.totalorder %v5314_v54, %v5134_v10  ;;  %v86_v11 = vadd.s32 176, %v5115_v1 }
  0x38   :  { %v1628_v5 = vmul.f32 0.0625, %v4204_v0  ;;  %v4219_v6 = vsel %vm875_vm14, 1.0, %v5086_v12  ;;  %vm892_vm2 = vmand %vm378_vm15, %vm636_vm0  ;;  %v101_v15 = vadd.s32 296, %v5115_v1  ;;  %v118_v17 = vadd.s32 432, %v5115_v1 }
  0x39   :  { %1870 = vmatpush.msra.mxu0 %v1611_v63  ;;  %v1643_v8 = vmul.f32 0.0625, %v4219_v6  ;;  %v4236_v9 = vsel %vm892_vm2, 1.0, %v5086_v12  ;;  %vm842_vm4 = vmand %vm328_vm1, %vm586_vm3  ;;  %vm345_vm5 = vcmp.ge.s32.totalorder %v86_v11, %v5123_v4  ;;  %vm603_vm6 = vcmp.lt.s32.totalorder %v86_v11, %v5134_v10 }
  0x3a   :  { %1892 = vmatpush.msra.mxu1 %v1628_v5  ;;  %v1660_v13 = vmul.f32 0.0625, %v4236_v9  ;;  %v4186_v14 = vsel %vm842_vm4, 1.0, %v5086_v12  ;;  %vm859_vm7 = vmand %vm345_vm5, %vm603_vm6  ;;  %vm360_vm8 = vcmp.ge.s32.totalorder %v101_v15, %v5123_v4  ;;  %vm618_vm9 = vcmp.lt.s32.totalorder %v101_v15, %v5134_v10 }
  0x3b   :  { %1916 = vmatpush.msra.mxu2 %v1643_v8  ;;  %v1610_v18 = vmul.f32 0.0625, %v4186_v14  ;;  %vm377_vm10 = vcmp.ge.s32.totalorder %v118_v17, %v5123_v4  ;;  %vm635_vm11 = vcmp.lt.s32.totalorder %v118_v17, %v5134_v10  ;;  %v4203_v19 = vsel %vm859_vm7, 1.0, %v5086_v12  ;;  %vm874_vm12 = vmand %vm360_vm8, %vm618_vm9 }
  0x3c   :  { %1938 = vmatpush.msra.mxu3 %v1660_v13  ;;  %v5348_v20 = vadd.s32 32, %v5115_v1  ;;  %v85_v21 = vadd.s32 168, %v5115_v1  ;;  %v100_v22 = vadd.s32 288, %v5115_v1  ;;  %v1627_v23 = vmul.f32 0.0625, %v4203_v19  ;;  %vm891_vm13 = vmand %vm377_vm10, %vm635_vm11 }
  0x3d   :  { %1871 = vmatpush.msra.mxu0 %v1610_v18  ;;  %v4218_v25 = vsel %vm874_vm12, 1.0, %v5086_v12  ;;  %v117_v26 = vadd.s32 424, %v5115_v1  ;;  %v5355_v27 = vadd.s32 24, %v5115_v1  ;;  %v4235_v29 = vsel %vm891_vm13, 1.0, %v5086_v12 }
  0x3e   :  { %v1642_v28 = vmul.f32 0.0625, %v4218_v25  ;;  %vm327_vm14 = vcmp.ge.s32.totalorder %v5348_v20, %v5123_v4  ;;  %vm585_vm15 = vcmp.lt.s32.totalorder %v5348_v20, %v5134_v10  ;;  %1893 = vmatpush.msra.mxu1 %v1627_v23  ;;  %v1659_v31 = vmul.f32 0.0625, %v4235_v29 }
  0x3f   :  { %vm841_vm0 = vmand %vm327_vm14, %vm585_vm15  ;;  %vm344_vm1 = vcmp.ge.s32.totalorder %v85_v21, %v5123_v4  ;;  %vm602_vm2 = vcmp.lt.s32.totalorder %v85_v21, %v5134_v10  ;;  %vm359_vm3 = vcmp.ge.s32.totalorder %v100_v22, %v5123_v4  ;;  %vm617_vm4 = vcmp.lt.s32.totalorder %v100_v22, %v5134_v10 }
  0x40   :  { %1917 = vmatpush.msra.mxu2 %v1642_v28  ;;  %v4185_v32 = vsel %vm841_vm0, 1.0, %v5086_v12  ;;  %1939 = vmatpush.msra.mxu3 %v1659_v31  ;;  %vm858_vm5 = vmand %vm344_vm1, %vm602_vm2  ;;  %vm376_vm6 = vcmp.ge.s32.totalorder %v117_v26, %v5123_v4  ;;  %vm634_vm7 = vcmp.lt.s32.totalorder %v117_v26, %v5134_v10  ;;  %vm326_vm9 = vcmp.ge.s32.totalorder %v5355_v27, %v5123_v4 }
  0x41   :  { %v1609_v34 = vmul.f32 0.0625, %v4185_v32  ;;  %v4202_v35 = vsel %vm858_vm5, 1.0, %v5086_v12  ;;  %vm873_vm8 = vmand %vm359_vm3, %vm617_vm4  ;;  %vm584_vm10 = vcmp.lt.s32.totalorder %v5355_v27, %v5134_v10  ;;  %v84_v39 = vadd.s32 160, %v5115_v1 }
  0x42   :  { %v1626_v36 = vmul.f32 0.0625, %v4202_v35  ;;  %v4217_v37 = vsel %vm873_vm8, 1.0, %v5086_v12  ;;  %vm890_vm11 = vmand %vm376_vm6, %vm634_vm7  ;;  %v99_v42 = vadd.s32 280, %v5115_v1  ;;  %v116_v43 = vadd.s32 416, %v5115_v1 }
  0x43   :  { %1872 = vmatpush.msra.mxu0 %v1609_v34  ;;  %v1641_v40 = vmul.f32 0.0625, %v4217_v37  ;;  %v4234_v41 = vsel %vm890_vm11, 1.0, %v5086_v12  ;;  %vm840_vm12 = vmand %vm326_vm9, %vm584_vm10  ;;  %vm343_vm13 = vcmp.ge.s32.totalorder %v84_v39, %v5123_v4  ;;  %vm601_vm14 = vcmp.lt.s32.totalorder %v84_v39, %v5134_v10 }
  0x44   :  { %1894 = vmatpush.msra.mxu1 %v1626_v36  ;;  %v1658_v44 = vmul.f32 0.0625, %v4234_v41  ;;  %v4184_v45 = vsel %vm840_vm12, 1.0, %v5086_v12  ;;  %vm358_vm15 = vcmp.ge.s32.totalorder %v99_v42, %v5123_v4  ;;  %vm616_vm0 = vcmp.lt.s32.totalorder %v99_v42, %v5134_v10  ;;  %vm857_vm1 = vmand %vm343_vm13, %vm601_vm14 }
  0x45   :  { %1918 = vmatpush.msra.mxu2 %v1641_v40  ;;  %v1608_v46 = vmul.f32 0.0625, %v4184_v45  ;;  %vm375_vm2 = vcmp.ge.s32.totalorder %v116_v43, %v5123_v4  ;;  %vm633_vm3 = vcmp.lt.s32.totalorder %v116_v43, %v5134_v10  ;;  %v5387_v47 = vadd.s32 16, %v5115_v1  ;;  %vm872_vm4 = vmand %vm358_vm15, %vm616_vm0 }
  0x46   :  { %1940 = vmatpush.msra.mxu3 %v1658_v44  ;;  %v83_v48 = vadd.s32 152, %v5115_v1  ;;  %v4201_v50 = vsel %vm857_vm1, 1.0, %v5086_v12  ;;  %v98_v51 = vadd.s32 272, %v5115_v1  ;;  %v115_v52 = vadd.s32 408, %v5115_v1  ;;  %vm889_vm5 = vmand %vm375_vm2, %vm633_vm3 }
  0x47   :  { %1873 = vmatpush.msra.mxu0 %v1608_v46  ;;  %v5394_v53 = vadd.s32 8, %v5115_v1  ;;  %v1625_v56 = vmul.f32 0.0625, %v4201_v50  ;;  %v4216_v57 = vsel %vm872_vm4, 1.0, %v5086_v12  ;;  %vm325_vm6 = vcmp.ge.s32.totalorder %v5387_v47, %v5123_v4 }
  0x48   :  { %vm583_vm7 = vcmp.lt.s32.totalorder %v5387_v47, %v5134_v10  ;;  %v1640_v58 = vmul.f32 0.0625, %v4216_v57  ;;  %v4233_v59 = vsel %vm889_vm5, 1.0, %v5086_v12  ;;  %vm342_vm9 = vcmp.ge.s32.totalorder %v83_v48, %v5123_v4 }
  0x49   :  { %vm839_vm8 = vmand %vm325_vm6, %vm583_vm7  ;;  %1895 = vmatpush.msra.mxu1 %v1625_v56  ;;  %v1657_v61 = vmul.f32 0.0625, %v4233_v59  ;;  %vm600_vm10 = vcmp.lt.s32.totalorder %v83_v48, %v5134_v10  ;;  %vm357_vm12 = vcmp.ge.s32.totalorder %v98_v51, %v5123_v4  ;;  %vm615_vm13 = vcmp.lt.s32.totalorder %v98_v51, %v5134_v10 }
  0x4a   :  { %v4183_v62 = vsel %vm839_vm8, 1.0, %v5086_v12  ;;  %1919 = vmatpush.msra.mxu2 %v1640_v58  ;;  %vm856_vm11 = vmand %vm342_vm9, %vm600_vm10  ;;  %vm374_vm15 = vcmp.ge.s32.totalorder %v115_v52, %v5123_v4  ;;  %vm632_vm0 = vcmp.lt.s32.totalorder %v115_v52, %v5134_v10  ;;  %vm324_vm1 = vcmp.ge.s32.totalorder %v5394_v53, %v5123_v4 }
  0x4b   :  { %v1607_v63 = vmul.f32 0.0625, %v4183_v62  ;;  %1941 = vmatpush.msra.mxu3 %v1657_v61  ;;  %v4200_v0 = vsel %vm856_vm11, 1.0, %v5086_v12  ;;  %vm871_vm14 = vmand %vm357_vm12, %vm615_vm13  ;;  %vm582_vm3 = vcmp.lt.s32.totalorder %v5394_v53, %v5134_v10  ;;  %v82_v11 = vadd.s32 144, %v5115_v1 }
  0x4c   :  { %v1624_v5 = vmul.f32 0.0625, %v4200_v0  ;;  %v4215_v6 = vsel %vm871_vm14, 1.0, %v5086_v12  ;;  %vm888_vm2 = vmand %vm374_vm15, %vm632_vm0  ;;  %v97_v15 = vadd.s32 264, %v5115_v1  ;;  %v114_v17 = vadd.s32 400, %v5115_v1 }
  0x4d   :  { %1874 = vmatpush.msra.mxu0 %v1607_v63  ;;  %v1639_v8 = vmul.f32 0.0625, %v4215_v6  ;;  %v4232_v9 = vsel %vm888_vm2, 1.0, %v5086_v12  ;;  %vm838_vm4 = vmand %vm324_vm1, %vm582_vm3  ;;  %vm341_vm5 = vcmp.ge.s32.totalorder %v82_v11, %v5123_v4  ;;  %vm599_vm6 = vcmp.lt.s32.totalorder %v82_v11, %v5134_v10 }
  0x4e   :  { %1896 = vmatpush.msra.mxu1 %v1624_v5  ;;  %v1656_v13 = vmul.f32 0.0625, %v4232_v9  ;;  %v4182_v14 = vsel %vm838_vm4, 1.0, %v5086_v12  ;;  %vm855_vm7 = vmand %vm341_vm5, %vm599_vm6  ;;  %vm356_vm8 = vcmp.ge.s32.totalorder %v97_v15, %v5123_v4  ;;  %vm614_vm9 = vcmp.lt.s32.totalorder %v97_v15, %v5134_v10 }
  0x4f   :  { %1920 = vmatpush.msra.mxu2 %v1639_v8  ;;  %v1606_v18 = vmul.f32 0.0625, %v4182_v14  ;;  %vm373_vm10 = vcmp.ge.s32.totalorder %v114_v17, %v5123_v4  ;;  %vm631_vm11 = vcmp.lt.s32.totalorder %v114_v17, %v5134_v10  ;;  %v4199_v19 = vsel %vm855_vm7, 1.0, %v5086_v12  ;;  %vm870_vm12 = vmand %vm356_vm8, %vm614_vm9 }
  0x50   :  { %1942 = vmatpush.msra.mxu3 %v1656_v13  ;;  %vm323_vm13 = vcmp.ge.s32.totalorder %v5115_v1, %v5123_v4  ;;  %vm581_vm14 = vcmp.lt.s32.totalorder %v5115_v1, %v5134_v10  ;;  %v81_v21 = vadd.s32 136, %v5115_v1  ;;  %v1623_v22 = vmul.f32 0.0625, %v4199_v19  ;;  %vm887_vm15 = vmand %vm373_vm10, %vm631_vm11 }
  0x51   :  { %1875 = vmatpush.msra.mxu0 %v1606_v18  ;;  %v4214_v23 = vsel %vm870_vm12, 1.0, %v5086_v12  ;;  %v96_v25 = vadd.s32 256, %v5115_v1  ;;  %v113_v26 = vadd.s32 392, %v5115_v1  ;;  %v4231_v29 = vsel %vm887_vm15, 1.0, %v5086_v12  ;;  %vm837_vm0 = vmand %vm323_vm13, %vm581_vm14 }
  0x52   :  { %v1638_v28 = vmul.f32 0.0625, %v4214_v23  ;;  %vm340_vm1 = vcmp.ge.s32.totalorder %v81_v21, %v5123_v4  ;;  %vm598_vm2 = vcmp.lt.s32.totalorder %v81_v21, %v5134_v10  ;;  %1897 = vmatpush.msra.mxu1 %v1623_v22  ;;  %v1655_v31 = vmul.f32 0.0625, %v4231_v29 }
  0x53   :  { %v4181_v32 = vsel %vm837_vm0, 1.0, %v5086_v12  ;;  %vm854_vm3 = vmand %vm340_vm1, %vm598_vm2  ;;  %vm355_vm4 = vcmp.ge.s32.totalorder %v96_v25, %v5123_v4  ;;  %vm613_vm5 = vcmp.lt.s32.totalorder %v96_v25, %v5134_v10  ;;  %vm372_vm7 = vcmp.ge.s32.totalorder %v113_v26, %v5123_v4 }
  0x54   :  { %1921 = vmatpush.msra.mxu2 %v1638_v28  ;;  %v1605_v34 = vmul.f32 0.0625, %v4181_v32  ;;  %v4198_v35 = vsel %vm854_vm3, 1.0, %v5086_v12  ;;  %vm869_vm6 = vmand %vm355_vm4, %vm613_vm5  ;;  %vm630_vm8 = vcmp.lt.s32.totalorder %v113_v26, %v5134_v10  ;;  %1943 = vmatpush.msra.mxu3 %v1655_v31  ;;  %v143_v39 = vadd.s32 632, %v5115_v1 }
  0x55   :  { %v1622_v36 = vmul.f32 0.0625, %v4198_v35  ;;  %v4213_v37 = vsel %vm869_vm6, 1.0, %v5086_v12  ;;  %vm886_vm9 = vmand %vm372_vm7, %vm630_vm8  ;;  %v175_v40 = vadd.s32 888, %v5115_v1  ;;  %v80_v43 = vadd.s32 128, %v5115_v1 }
  0x56   :  { %1876 = vmatpush.msra.mxu0 %v1605_v34  ;;  %v1637_v41 = vmul.f32 0.0625, %v4213_v37  ;;  %v4230_v42 = vsel %vm886_vm9, 1.0, %v5086_v12  ;;  %v112_v44 = vadd.s32 384, %v5115_v1  ;;  %vm402_vm10 = vcmp.ge.s32.totalorder %v143_v39, %v5123_v4 }
  0x57   :  { %1898 = vmatpush.msra.mxu1 %v1622_v36  ;;  %v1654_v45 = vmul.f32 0.0625, %v4230_v42  ;;  %vm660_vm11 = vcmp.lt.s32.totalorder %v143_v39, %v5134_v10  ;;  %vm434_vm12 = vcmp.ge.s32.totalorder %v175_v40, %v5123_v4  ;;  %vm692_vm14 = vcmp.lt.s32.totalorder %v175_v40, %v5134_v10 }
  0x58   :  { %1922 = vmatpush.msra.mxu2 %v1637_v41  ;;  %vm916_vm13 = vmand %vm402_vm10, %vm660_vm11  ;;  %vm339_vm15 = vcmp.ge.s32.totalorder %v80_v43, %v5123_v4  ;;  %vm597_vm0 = vcmp.lt.s32.totalorder %v80_v43, %v5134_v10  ;;  %vm371_vm1 = vcmp.ge.s32.totalorder %v112_v44, %v5123_v4  ;;  %vm629_vm3 = vcmp.lt.s32.totalorder %v112_v44, %v5134_v10 }
  0x59   :  { %1944 = vmatpush.msra.mxu3 %v1654_v45  ;;  %v4260_v46 = vsel %vm916_vm13, 1.0, %v5086_v12  ;;  %vm948_vm2 = vmand %vm434_vm12, %vm692_vm14  ;;  %v142_v48 = vadd.s32 624, %v5115_v1  ;;  %v159_v50 = vadd.s32 760, %v5115_v1  ;;  %v174_v56 = vadd.s32 880, %v5115_v1 }
  0x5a   :  { %v1684_v51 = vmul.f32 0.0625, %v4260_v46  ;;  %v4292_v52 = vsel %vm948_vm2, 1.0, %v5086_v12  ;;  %vm853_vm4 = vmand %vm339_vm15, %vm597_vm0  ;;  %v191_v57 = vadd.s32 1016, %v5115_v1  ;;  %v141_v11 = vadd.s32 616, %v5115_v1 }
  0x5b   :  { %v1716_v58 = vmul.f32 0.0625, %v4292_v52  ;;  %v4197_v59 = vsel %vm853_vm4, 1.0, %v5086_v12  ;;  %vm885_vm5 = vmand %vm371_vm1, %vm629_vm3  ;;  %vm401_vm6 = vcmp.ge.s32.totalorder %v142_v48, %v5123_v4  ;;  %vm659_vm7 = vcmp.lt.s32.totalorder %v142_v48, %v5134_v10 }
  0x5c   :  { %1953 = vmatpush.msrb.mxu0 %v1684_v51  ;;  %v1621_v61 = vmul.f32 0.0625, %v4197_v59  ;;  %v4229_v62 = vsel %vm885_vm5, 1.0, %v5086_v12  ;;  %vm915_vm8 = vmand %vm401_vm6, %vm659_vm7  ;;  %vm418_vm9 = vcmp.ge.s32.totalorder %v159_v50, %v5123_v4  ;;  %vm676_vm10 = vcmp.lt.s32.totalorder %v159_v50, %v5134_v10 }
  0x5d   :  { %1999 = vmatpush.msrb.mxu2 %v1716_v58  ;;  %v1653_v63 = vmul.f32 0.0625, %v4229_v62  ;;  %v4259_v0 = vsel %vm915_vm8, 1.0, %v5086_v12  ;;  %vm932_vm11 = vmand %vm418_vm9, %vm676_vm10  ;;  %vm433_vm12 = vcmp.ge.s32.totalorder %v174_v56, %v5123_v4  ;;  %vm691_vm13 = vcmp.lt.s32.totalorder %v174_v56, %v5134_v10 }
  0x5e   :  { %1899 = vmatpush.msra.mxu1 %v1621_v61  ;;  %v1683_v5 = vmul.f32 0.0625, %v4259_v0  ;;  %v4276_v6 = vsel %vm932_vm11, 1.0, %v5086_v12  ;;  %vm947_vm14 = vmand %vm433_vm12, %vm691_vm13  ;;  %vm450_vm15 = vcmp.ge.s32.totalorder %v191_v57, %v5123_v4  ;;  %vm708_vm0 = vcmp.lt.s32.totalorder %v191_v57, %v5134_v10 }
  0x5f   :  { %1945 = vmatpush.msra.mxu3 %v1653_v63  ;;  %v1700_v8 = vmul.f32 0.0625, %v4276_v6  ;;  %v4291_v9 = vsel %vm947_vm14, 1.0, %v5086_v12  ;;  %vm964_vm1 = vmand %vm450_vm15, %vm708_vm0  ;;  %v158_v13 = vadd.s32 752, %v5115_v1  ;;  %v173_v17 = vadd.s32 872, %v5115_v1 }
  0x60   :  { %1954 = vmatpush.msrb.mxu0 %v1683_v5  ;;  %v1715_v14 = vmul.f32 0.0625, %v4291_v9  ;;  %v4308_v15 = vsel %vm964_vm1, 1.0, %v5086_v12  ;;  %v190_v18 = vadd.s32 1008, %v5115_v1  ;;  %vm400_vm2 = vcmp.ge.s32.totalorder %v141_v11, %v5123_v4 }
  0x61   :  { %1976 = vmatpush.msrb.mxu1 %v1700_v8  ;;  %v1732_v19 = vmul.f32 0.0625, %v4308_v15  ;;  %vm658_vm3 = vcmp.lt.s32.totalorder %v141_v11, %v5134_v10  ;;  %vm417_vm4 = vcmp.ge.s32.totalorder %v158_v13, %v5123_v4  ;;  %vm675_vm6 = vcmp.lt.s32.totalorder %v158_v13, %v5134_v10  ;;  %v33_v11 = vld [vmem:[#allocation2 + $0x10] sm:$0xff] }
  0x62   :  { %2000 = vmatpush.msrb.mxu2 %v1715_v14  ;;  %vm914_vm5 = vmand %vm400_vm2, %vm658_vm3  ;;  %vm432_vm7 = vcmp.ge.s32.totalorder %v173_v17, %v5123_v4  ;;  %vm690_vm8 = vcmp.lt.s32.totalorder %v173_v17, %v5134_v10  ;;  %vm449_vm9 = vcmp.ge.s32.totalorder %v190_v18, %v5123_v4  ;;  %vm707_vm11 = vcmp.lt.s32.totalorder %v190_v18, %v5134_v10 }
  0x63   :  { %2022 = vmatpush.msrb.mxu3 %v1732_v19  ;;  %v4258_v21 = vsel %vm914_vm5, 1.0, %v5086_v12  ;;  %vm931_vm10 = vmand %vm417_vm4, %vm675_vm6  ;;  %v140_v22 = vadd.s32 608, %v5115_v1  ;;  %v157_v23 = vadd.s32 744, %v5115_v1  ;;  %v172_v28 = vadd.s32 864, %v5115_v1  ;;  %1923 = vmatmul.f32.vlgmr.msra.gmra.mxu2 %v33_v11 }
  0x64   :  { %v1682_v25 = vmul.f32 0.0625, %v4258_v21  ;;  %v4275_v26 = vsel %vm931_vm10, 1.0, %v5086_v12  ;;  %vm946_vm12 = vmand %vm432_vm7, %vm690_vm8  ;;  %v189_v29 = vadd.s32 1000, %v5115_v1  ;;  %v139_v43 = vadd.s32 600, %v5115_v1 }
  0x65   :  { %v1699_v31 = vmul.f32 0.0625, %v4275_v26  ;;  %v4290_v32 = vsel %vm946_vm12, 1.0, %v5086_v12  ;;  %vm963_vm13 = vmand %vm449_vm9, %vm707_vm11  ;;  %vm399_vm14 = vcmp.ge.s32.totalorder %v140_v22, %v5123_v4  ;;  %vm657_vm15 = vcmp.lt.s32.totalorder %v140_v22, %v5134_v10 }
  0x66   :  { %1955 = vmatpush.msrb.mxu0 %v1682_v25  ;;  %v1714_v34 = vmul.f32 0.0625, %v4290_v32  ;;  %v4307_v35 = vsel %vm963_vm13, 1.0, %v5086_v12  ;;  %vm913_vm0 = vmand %vm399_vm14, %vm657_vm15  ;;  %vm416_vm1 = vcmp.ge.s32.totalorder %v157_v23, %v5123_v4  ;;  %vm674_vm2 = vcmp.lt.s32.totalorder %v157_v23, %v5134_v10 }
  0x67   :  { %1977 = vmatpush.msrb.mxu1 %v1699_v31  ;;  %v1731_v36 = vmul.f32 0.0625, %v4307_v35  ;;  %v4257_v37 = vsel %vm913_vm0, 1.0, %v5086_v12  ;;  %vm930_vm3 = vmand %vm416_vm1, %vm674_vm2  ;;  %vm431_vm4 = vcmp.ge.s32.totalorder %v172_v28, %v5123_v4  ;;  %vm689_vm5 = vcmp.lt.s32.totalorder %v172_v28, %v5134_v10  ;;  %v31_v28 = vld [vmem:[#allocation2] sm:$0xff] }
  0x68   :  { %2001 = vmatpush.msrb.mxu2 %v1714_v34  ;;  %v1681_v39 = vmul.f32 0.0625, %v4257_v37  ;;  %v4274_v40 = vsel %vm930_vm3, 1.0, %v5086_v12  ;;  %vm945_vm6 = vmand %vm431_vm4, %vm689_vm5  ;;  %vm448_vm7 = vcmp.ge.s32.totalorder %v189_v29, %v5123_v4  ;;  %vm706_vm8 = vcmp.lt.s32.totalorder %v189_v29, %v5134_v10  ;;  %v34_v29 = vld [vmem:[#allocation2 + $0x18] sm:$0xff]  ;;  %1877 = vmatmul.f32.vlgmr.msra.gmra.mxu0 %v31_v28 }
  0x69   :  { %2023 = vmatpush.msrb.mxu3 %v1731_v36  ;;  %v1698_v41 = vmul.f32 0.0625, %v4274_v40  ;;  %v4289_v42 = vsel %vm945_vm6, 1.0, %v5086_v12  ;;  %vm962_vm9 = vmand %vm448_vm7, %vm706_vm8  ;;  %v156_v44 = vadd.s32 736, %v5115_v1  ;;  %v171_v48 = vadd.s32 856, %v5115_v1 }
  0x6a   :  { %1956 = vmatpush.msrb.mxu0 %v1681_v39  ;;  %v1713_v45 = vmul.f32 0.0625, %v4289_v42  ;;  %v4306_v46 = vsel %vm962_vm9, 1.0, %v5086_v12  ;;  %v188_v50 = vadd.s32 992, %v5115_v1  ;;  %vm398_vm10 = vcmp.ge.s32.totalorder %v139_v43, %v5123_v4  ;;  %1946 = vmatmul.f32.vlgmr.msra.gmra.mxu3 %v34_v29 }
  0x6b   :  { %1978 = vmatpush.msrb.mxu1 %v1698_v41  ;;  %v1730_v51 = vmul.f32 0.0625, %v4306_v46  ;;  %vm656_vm11 = vcmp.lt.s32.totalorder %v139_v43, %v5134_v10  ;;  %vm415_vm12 = vcmp.ge.s32.totalorder %v156_v44, %v5123_v4  ;;  %vm673_vm14 = vcmp.lt.s32.totalorder %v156_v44, %v5134_v10  ;;  %v32_v46 = vld [vmem:[#allocation2 + $0x8] sm:$0xff] }
  0x6c   :  { %2002 = vmatpush.msrb.mxu2 %v1713_v45  ;;  %vm912_vm13 = vmand %vm398_vm10, %vm656_vm11  ;;  %vm430_vm15 = vcmp.ge.s32.totalorder %v171_v48, %v5123_v4  ;;  %vm688_vm0 = vcmp.lt.s32.totalorder %v171_v48, %v5134_v10  ;;  %vm447_vm1 = vcmp.ge.s32.totalorder %v188_v50, %v5123_v4  ;;  %vm705_vm3 = vcmp.lt.s32.totalorder %v188_v50, %v5134_v10 }
  0x6d   :  { %2024 = vmatpush.msrb.mxu3 %v1730_v51  ;;  %v4256_v52 = vsel %vm912_vm13, 1.0, %v5086_v12  ;;  %vm929_vm2 = vmand %vm415_vm12, %vm673_vm14  ;;  %v138_v56 = vadd.s32 592, %v5115_v1  ;;  %v155_v57 = vadd.s32 728, %v5115_v1  ;;  %v170_v61 = vadd.s32 848, %v5115_v1  ;;  %1900 = vmatmul.f32.vlgmr.msra.gmra.mxu1 %v32_v46 }
  0x6e   :  { %v1680_v58 = vmul.f32 0.0625, %v4256_v52  ;;  %v4273_v59 = vsel %vm929_vm2, 1.0, %v5086_v12  ;;  %vm944_vm4 = vmand %vm430_vm15, %vm688_vm0  ;;  %v187_v62 = vadd.s32 984, %v5115_v1  ;;  %v137_v18 = vadd.s32 584, %v5115_v1 }
  0x6f   :  { %v1697_v63 = vmul.f32 0.0625, %v4273_v59  ;;  %v4288_v0 = vsel %vm944_vm4, 1.0, %v5086_v12  ;;  %vm961_vm5 = vmand %vm447_vm1, %vm705_vm3  ;;  %vm397_vm6 = vcmp.ge.s32.totalorder %v138_v56, %v5123_v4  ;;  %vm655_vm7 = vcmp.lt.s32.totalorder %v138_v56, %v5134_v10 }
  0x70   :  { %1957 = vmatpush.msrb.mxu0 %v1680_v58  ;;  %v1712_v5 = vmul.f32 0.0625, %v4288_v0  ;;  %v4305_v6 = vsel %vm961_vm5, 1.0, %v5086_v12  ;;  %vm911_vm8 = vmand %vm397_vm6, %vm655_vm7  ;;  %vm414_vm9 = vcmp.ge.s32.totalorder %v155_v57, %v5123_v4  ;;  %vm672_vm10 = vcmp.lt.s32.totalorder %v155_v57, %v5134_v10 }
  0x71   :  { %1979 = vmatpush.msrb.mxu1 %v1697_v63  ;;  %v1729_v8 = vmul.f32 0.0625, %v4305_v6  ;;  %v4255_v9 = vsel %vm911_vm8, 1.0, %v5086_v12  ;;  %vm928_vm11 = vmand %vm414_vm9, %vm672_vm10  ;;  %vm429_vm12 = vcmp.ge.s32.totalorder %v170_v61, %v5123_v4  ;;  %vm687_vm13 = vcmp.lt.s32.totalorder %v170_v61, %v5134_v10 }
  0x72   :  { %2003 = vmatpush.msrb.mxu2 %v1712_v5  ;;  %v1679_v13 = vmul.f32 0.0625, %v4255_v9  ;;  %v4272_v14 = vsel %vm928_vm11, 1.0, %v5086_v12  ;;  %vm943_vm14 = vmand %vm429_vm12, %vm687_vm13  ;;  %vm446_vm15 = vcmp.ge.s32.totalorder %v187_v62, %v5123_v4  ;;  %vm704_vm0 = vcmp.lt.s32.totalorder %v187_v62, %v5134_v10 }
  0x73   :  { %2025 = vmatpush.msrb.mxu3 %v1729_v8  ;;  %v1696_v15 = vmul.f32 0.0625, %v4272_v14  ;;  %v4287_v17 = vsel %vm943_vm14, 1.0, %v5086_v12  ;;  %vm960_vm1 = vmand %vm446_vm15, %vm704_vm0  ;;  %v154_v19 = vadd.s32 720, %v5115_v1  ;;  %v169_v23 = vadd.s32 840, %v5115_v1 }
  0x74   :  { %1958 = vmatpush.msrb.mxu0 %v1679_v13  ;;  %v1711_v21 = vmul.f32 0.0625, %v4287_v17  ;;  %v4304_v22 = vsel %vm960_vm1, 1.0, %v5086_v12  ;;  %v186_v25 = vadd.s32 976, %v5115_v1  ;;  %vm396_vm2 = vcmp.ge.s32.totalorder %v137_v18, %v5123_v4 }
  0x75   :  { %1980 = vmatpush.msrb.mxu1 %v1696_v15  ;;  %v1728_v26 = vmul.f32 0.0625, %v4304_v22  ;;  %vm654_vm3 = vcmp.lt.s32.totalorder %v137_v18, %v5134_v10  ;;  %vm413_vm4 = vcmp.ge.s32.totalorder %v154_v19, %v5123_v4  ;;  %vm671_vm6 = vcmp.lt.s32.totalorder %v154_v19, %v5134_v10  ;;  %v49_v22 = vld [vmem:[#allocation2 + $0x90] sm:$0xff] }
  0x76   :  { %2004 = vmatpush.msrb.mxu2 %v1711_v21  ;;  %vm910_vm5 = vmand %vm396_vm2, %vm654_vm3  ;;  %vm428_vm7 = vcmp.ge.s32.totalorder %v169_v23, %v5123_v4  ;;  %vm686_vm8 = vcmp.lt.s32.totalorder %v169_v23, %v5134_v10  ;;  %vm445_vm9 = vcmp.ge.s32.totalorder %v186_v25, %v5123_v4  ;;  %vm703_vm11 = vcmp.lt.s32.totalorder %v186_v25, %v5134_v10 }
  0x77   :  { %2026 = vmatpush.msrb.mxu3 %v1728_v26  ;;  %v4254_v31 = vsel %vm910_vm5, 1.0, %v5086_v12  ;;  %vm927_vm10 = vmand %vm413_vm4, %vm671_vm6  ;;  %v136_v32 = vadd.s32 576, %v5115_v1  ;;  %v153_v34 = vadd.s32 712, %v5115_v1  ;;  %v168_v37 = vadd.s32 832, %v5115_v1  ;;  %1926 = vmatmul.f32.gmra.mxu2 %v49_v22 }
  0x78   :  { %v1678_v35 = vmul.f32 0.0625, %v4254_v31  ;;  %v4271_v36 = vsel %vm927_vm10, 1.0, %v5086_v12  ;;  %vm942_vm12 = vmand %vm428_vm7, %vm686_vm8  ;;  %v185_v39 = vadd.s32 968, %v5115_v1  ;;  %v135_v56 = vadd.s32 568, %v5115_v1 }
  0x79   :  { %v1695_v40 = vmul.f32 0.0625, %v4271_v36  ;;  %v4286_v41 = vsel %vm942_vm12, 1.0, %v5086_v12  ;;  %vm959_vm13 = vmand %vm445_vm9, %vm703_vm11  ;;  %vm395_vm14 = vcmp.ge.s32.totalorder %v136_v32, %v5123_v4  ;;  %vm653_vm15 = vcmp.lt.s32.totalorder %v136_v32, %v5134_v10 }
  0x7a   :  { %1959 = vmatpush.msrb.mxu0 %v1678_v35  ;;  %v1710_v42 = vmul.f32 0.0625, %v4286_v41  ;;  %v4303_v43 = vsel %vm959_vm13, 1.0, %v5086_v12  ;;  %vm909_vm0 = vmand %vm395_vm14, %vm653_vm15  ;;  %vm412_vm1 = vcmp.ge.s32.totalorder %v153_v34, %v5123_v4  ;;  %vm670_vm2 = vcmp.lt.s32.totalorder %v153_v34, %v5134_v10 }
  0x7b   :  { %1981 = vmatpush.msrb.mxu1 %v1695_v40  ;;  %v1727_v44 = vmul.f32 0.0625, %v4303_v43  ;;  %v4253_v45 = vsel %vm909_vm0, 1.0, %v5086_v12  ;;  %vm926_vm3 = vmand %vm412_vm1, %vm670_vm2  ;;  %vm427_vm4 = vcmp.ge.s32.totalorder %v168_v37, %v5123_v4  ;;  %vm685_vm5 = vcmp.lt.s32.totalorder %v168_v37, %v5134_v10  ;;  %v50_v40 = vld [vmem:[#allocation2 + $0x98] sm:$0xff] }
  0x7c   :  { %2005 = vmatpush.msrb.mxu2 %v1710_v42  ;;  %v1677_v48 = vmul.f32 0.0625, %v4253_v45  ;;  %v4270_v50 = vsel %vm926_vm3, 1.0, %v5086_v12  ;;  %vm941_vm6 = vmand %vm427_vm4, %vm685_vm5  ;;  %vm444_vm7 = vcmp.ge.s32.totalorder %v185_v39, %v5123_v4  ;;  %vm702_vm8 = vcmp.lt.s32.totalorder %v185_v39, %v5134_v10  ;;  %v47_v39 = vld [vmem:[#allocation2 + $0x80] sm:$0xff]  ;;  %1949 = vmatmul.f32.gmra.mxu3 %v50_v40 }
  0x7d   :  { %2027 = vmatpush.msrb.mxu3 %v1727_v44  ;;  %v1694_v51 = vmul.f32 0.0625, %v4270_v50  ;;  %v4285_v52 = vsel %vm941_vm6, 1.0, %v5086_v12  ;;  %vm958_vm9 = vmand %vm444_vm7, %vm702_vm8  ;;  %v152_v57 = vadd.s32 704, %v5115_v1  ;;  %v167_v61 = vadd.s32 824, %v5115_v1  ;;  %1880 = vmatmul.f32.gmra.mxu0 %v47_v39 }
  0x7e   :  { %1960 = vmatpush.msrb.mxu0 %v1677_v48  ;;  %v1709_v58 = vmul.f32 0.0625, %v4285_v52  ;;  %v4302_v59 = vsel %vm958_vm9, 1.0, %v5086_v12  ;;  %v184_v62 = vadd.s32 960, %v5115_v1  ;;  %vm394_vm10 = vcmp.ge.s32.totalorder %v135_v56, %v5123_v4 }
  0x7f   :  { %1982 = vmatpush.msrb.mxu1 %v1694_v51  ;;  %v1726_v63 = vmul.f32 0.0625, %v4302_v59  ;;  %vm652_vm11 = vcmp.lt.s32.totalorder %v135_v56, %v5134_v10  ;;  %vm411_vm12 = vcmp.ge.s32.totalorder %v152_v57, %v5123_v4  ;;  %vm669_vm14 = vcmp.lt.s32.totalorder %v152_v57, %v5134_v10  ;;  %v48_v59 = vld [vmem:[#allocation2 + $0x88] sm:$0xff] }
  0x80   :  { %2006 = vmatpush.msrb.mxu2 %v1709_v58  ;;  %vm908_vm13 = vmand %vm394_vm10, %vm652_vm11  ;;  %vm426_vm15 = vcmp.ge.s32.totalorder %v167_v61, %v5123_v4  ;;  %vm684_vm0 = vcmp.lt.s32.totalorder %v167_v61, %v5134_v10  ;;  %vm443_vm1 = vcmp.ge.s32.totalorder %v184_v62, %v5123_v4  ;;  %vm701_vm3 = vcmp.lt.s32.totalorder %v184_v62, %v5134_v10 }
  0x81   :  { %2028 = vmatpush.msrb.mxu3 %v1726_v63  ;;  %v4252_v0 = vsel %vm908_vm13, 1.0, %v5086_v12  ;;  %vm925_vm2 = vmand %vm411_vm12, %vm669_vm14  ;;  %v134_v5 = vadd.s32 560, %v5115_v1  ;;  %v151_v6 = vadd.s32 696, %v5115_v1  ;;  %v166_v11 = vadd.s32 816, %v5115_v1  ;;  %1903 = vmatmul.f32.gmra.mxu1 %v48_v59 }
  0x82   :  { %v1676_v8 = vmul.f32 0.0625, %v4252_v0  ;;  %v4269_v9 = vsel %vm925_vm2, 1.0, %v5086_v12  ;;  %vm940_vm4 = vmand %vm426_vm15, %vm684_vm0  ;;  %v183_v13 = vadd.s32 952, %v5115_v1  ;;  %v133_v29 = vadd.s32 552, %v5115_v1 }
  0x83   :  { %v1693_v14 = vmul.f32 0.0625, %v4269_v9  ;;  %v4284_v15 = vsel %vm940_vm4, 1.0, %v5086_v12  ;;  %vm957_vm5 = vmand %vm443_vm1, %vm701_vm3  ;;  %vm393_vm6 = vcmp.ge.s32.totalorder %v134_v5, %v5123_v4  ;;  %vm651_vm7 = vcmp.lt.s32.totalorder %v134_v5, %v5134_v10 }
  0x84   :  { %1961 = vmatpush.msrb.mxu0 %v1676_v8  ;;  %v1708_v17 = vmul.f32 0.0625, %v4284_v15  ;;  %v4301_v18 = vsel %vm957_vm5, 1.0, %v5086_v12  ;;  %vm907_vm8 = vmand %vm393_vm6, %vm651_vm7  ;;  %vm410_vm9 = vcmp.ge.s32.totalorder %v151_v6, %v5123_v4  ;;  %vm668_vm10 = vcmp.lt.s32.totalorder %v151_v6, %v5134_v10 }
  0x85   :  { %1983 = vmatpush.msrb.mxu1 %v1693_v14  ;;  %v1725_v19 = vmul.f32 0.0625, %v4301_v18  ;;  %v4251_v21 = vsel %vm907_vm8, 1.0, %v5086_v12  ;;  %vm924_vm11 = vmand %vm410_vm9, %vm668_vm10  ;;  %vm425_vm12 = vcmp.ge.s32.totalorder %v166_v11, %v5123_v4  ;;  %vm683_vm13 = vcmp.lt.s32.totalorder %v166_v11, %v5134_v10 }
  0x86   :  { %2007 = vmatpush.msrb.mxu2 %v1708_v17  ;;  %v1675_v23 = vmul.f32 0.0625, %v4251_v21  ;;  %v4268_v25 = vsel %vm924_vm11, 1.0, %v5086_v12  ;;  %vm939_vm14 = vmand %vm425_vm12, %vm683_vm13  ;;  %vm442_vm15 = vcmp.ge.s32.totalorder %v183_v13, %v5123_v4  ;;  %vm700_vm0 = vcmp.lt.s32.totalorder %v183_v13, %v5134_v10 }
  0x87   :  { %2029 = vmatpush.msrb.mxu3 %v1725_v19  ;;  %v1692_v26 = vmul.f32 0.0625, %v4268_v25  ;;  %v4283_v28 = vsel %vm939_vm14, 1.0, %v5086_v12  ;;  %vm956_vm1 = vmand %vm442_vm15, %vm700_vm0  ;;  %v150_v31 = vadd.s32 688, %v5115_v1  ;;  %v165_v35 = vadd.s32 808, %v5115_v1 }
  0x88   :  { %1962 = vmatpush.msrb.mxu0 %v1675_v23  ;;  %v1707_v32 = vmul.f32 0.0625, %v4283_v28  ;;  %v4300_v34 = vsel %vm956_vm1, 1.0, %v5086_v12  ;;  %v182_v36 = vadd.s32 944, %v5115_v1  ;;  %vm392_vm2 = vcmp.ge.s32.totalorder %v133_v29, %v5123_v4 }
  0x89   :  { %1984 = vmatpush.msrb.mxu1 %v1692_v26  ;;  %v1724_v37 = vmul.f32 0.0625, %v4300_v34  ;;  %vm650_vm3 = vcmp.lt.s32.totalorder %v133_v29, %v5134_v10  ;;  %vm409_vm4 = vcmp.ge.s32.totalorder %v150_v31, %v5123_v4  ;;  %vm667_vm6 = vcmp.lt.s32.totalorder %v150_v31, %v5134_v10 }
  0x8a   :  { %2008 = vmatpush.msrb.mxu2 %v1707_v32  ;;  %vm906_vm5 = vmand %vm392_vm2, %vm650_vm3  ;;  %vm424_vm7 = vcmp.ge.s32.totalorder %v165_v35, %v5123_v4  ;;  %vm682_vm8 = vcmp.lt.s32.totalorder %v165_v35, %v5134_v10  ;;  %vm441_vm9 = vcmp.ge.s32.totalorder %v182_v36, %v5123_v4  ;;  %vm699_vm11 = vcmp.lt.s32.totalorder %v182_v36, %v5134_v10 }
  0x8b   :  { %2030 = vmatpush.msrb.mxu3 %v1724_v37  ;;  %v4250_v41 = vsel %vm906_vm5, 1.0, %v5086_v12  ;;  %vm923_vm10 = vmand %vm409_vm4, %vm667_vm6  ;;  %v132_v42 = vadd.s32 544, %v5115_v1  ;;  %v149_v43 = vadd.s32 680, %v5115_v1  ;;  %v164_v46 = vadd.s32 800, %v5115_v1 }
  0x8c   :  { %v1674_v44 = vmul.f32 0.0625, %v4250_v41  ;;  %v4267_v45 = vsel %vm923_vm10, 1.0, %v5086_v12  ;;  %vm938_vm12 = vmand %vm424_vm7, %vm682_vm8  ;;  %v181_v48 = vadd.s32 936, %v5115_v1  ;;  %v131_v5 = vadd.s32 536, %v5115_v1 }
  0x8d   :  { %v1691_v50 = vmul.f32 0.0625, %v4267_v45  ;;  %v4282_v51 = vsel %vm938_vm12, 1.0, %v5086_v12  ;;  %vm955_vm13 = vmand %vm441_vm9, %vm699_vm11  ;;  %vm391_vm14 = vcmp.ge.s32.totalorder %v132_v42, %v5123_v4  ;;  %vm649_vm15 = vcmp.lt.s32.totalorder %v132_v42, %v5134_v10 }
  0x8e   :  { %1963 = vmatpush.msrb.mxu0 %v1674_v44  ;;  %v1706_v52 = vmul.f32 0.0625, %v4282_v51  ;;  %v4299_v56 = vsel %vm955_vm13, 1.0, %v5086_v12  ;;  %vm905_vm0 = vmand %vm391_vm14, %vm649_vm15  ;;  %vm408_vm1 = vcmp.ge.s32.totalorder %v149_v43, %v5123_v4  ;;  %vm666_vm2 = vcmp.lt.s32.totalorder %v149_v43, %v5134_v10 }
  0x8f   :  { %1985 = vmatpush.msrb.mxu1 %v1691_v50  ;;  %v1723_v57 = vmul.f32 0.0625, %v4299_v56  ;;  %v4249_v58 = vsel %vm905_vm0, 1.0, %v5086_v12  ;;  %vm922_vm3 = vmand %vm408_vm1, %vm666_vm2  ;;  %vm423_vm4 = vcmp.ge.s32.totalorder %v164_v46, %v5123_v4  ;;  %vm681_vm5 = vcmp.lt.s32.totalorder %v164_v46, %v5134_v10 }
  0x90   :  { %2009 = vmatpush.msrb.mxu2 %v1706_v52  ;;  %v1673_v61 = vmul.f32 0.0625, %v4249_v58  ;;  %v4266_v62 = vsel %vm922_vm3, 1.0, %v5086_v12  ;;  %vm937_vm6 = vmand %vm423_vm4, %vm681_vm5  ;;  %vm440_vm7 = vcmp.ge.s32.totalorder %v181_v48, %v5123_v4  ;;  %vm698_vm8 = vcmp.lt.s32.totalorder %v181_v48, %v5134_v10 }
  0x91   :  { %2031 = vmatpush.msrb.mxu3 %v1723_v57  ;;  %v1690_v63 = vmul.f32 0.0625, %v4266_v62  ;;  %v4281_v0 = vsel %vm937_vm6, 1.0, %v5086_v12  ;;  %vm954_vm9 = vmand %vm440_vm7, %vm698_vm8  ;;  %v148_v6 = vadd.s32 672, %v5115_v1  ;;  %v163_v11 = vadd.s32 792, %v5115_v1 }
  0x92   :  { %1964 = vmatpush.msrb.mxu0 %v1673_v61  ;;  %v1705_v8 = vmul.f32 0.0625, %v4281_v0  ;;  %v4298_v9 = vsel %vm954_vm9, 1.0, %v5086_v12  ;;  %v180_v13 = vadd.s32 928, %v5115_v1  ;;  %vm390_vm10 = vcmp.ge.s32.totalorder %v131_v5, %v5123_v4 }
  0x93   :  { %1986 = vmatpush.msrb.mxu1 %v1690_v63  ;;  %v1722_v14 = vmul.f32 0.0625, %v4298_v9  ;;  %vm648_vm11 = vcmp.lt.s32.totalorder %v131_v5, %v5134_v10  ;;  %vm407_vm12 = vcmp.ge.s32.totalorder %v148_v6, %v5123_v4  ;;  %vm665_vm14 = vcmp.lt.s32.totalorder %v148_v6, %v5134_v10 }
  0x94   :  { %2010 = vmatpush.msrb.mxu2 %v1705_v8  ;;  %vm904_vm13 = vmand %vm390_vm10, %vm648_vm11  ;;  %vm422_vm15 = vcmp.ge.s32.totalorder %v163_v11, %v5123_v4  ;;  %vm680_vm0 = vcmp.lt.s32.totalorder %v163_v11, %v5134_v10  ;;  %vm439_vm1 = vcmp.ge.s32.totalorder %v180_v13, %v5123_v4  ;;  %vm697_vm3 = vcmp.lt.s32.totalorder %v180_v13, %v5134_v10  ;;  %v35_v8 = vld [vmem:[#allocation2 + $0x20] sm:$0xff] }
  0x95   :  { %2032 = vmatpush.msrb.mxu3 %v1722_v14  ;;  %v4248_v15 = vsel %vm904_vm13, 1.0, %v5086_v12  ;;  %vm921_vm2 = vmand %vm407_vm12, %vm665_vm14  ;;  %v130_v17 = vadd.s32 528, %v5115_v1  ;;  %v147_v18 = vadd.s32 664, %v5115_v1  ;;  %v162_v22 = vadd.s32 784, %v5115_v1 }
  0x96   :  { %v1672_v19 = vmul.f32 0.0625, %v4248_v15  ;;  %v4265_v21 = vsel %vm921_vm2, 1.0, %v5086_v12  ;;  %vm936_vm4 = vmand %vm422_vm15, %vm680_vm0  ;;  %v179_v23 = vadd.s32 920, %v5115_v1  ;;  %v129_v39 = vadd.s32 520, %v5115_v1 }
  0x97   :  { %v1689_v25 = vmul.f32 0.0625, %v4265_v21  ;;  %v4280_v26 = vsel %vm936_vm4, 1.0, %v5086_v12  ;;  %vm953_vm5 = vmand %vm439_vm1, %vm697_vm3  ;;  %vm389_vm6 = vcmp.ge.s32.totalorder %v130_v17, %v5123_v4  ;;  %vm647_vm7 = vcmp.lt.s32.totalorder %v130_v17, %v5134_v10  ;;  %v37_v21 = vld [vmem:[#allocation2 + $0x30] sm:$0xff] }
  0x98   :  { %1965 = vmatpush.msrb.mxu0 %v1672_v19  ;;  %v1704_v28 = vmul.f32 0.0625, %v4280_v26  ;;  %v4297_v29 = vsel %vm953_vm5, 1.0, %v5086_v12  ;;  %vm903_vm8 = vmand %vm389_vm6, %vm647_vm7  ;;  %vm406_vm9 = vcmp.ge.s32.totalorder %v147_v18, %v5123_v4  ;;  %vm664_vm10 = vcmp.lt.s32.totalorder %v147_v18, %v5134_v10 }
  0x99   :  { %1987 = vmatpush.msrb.mxu1 %v1689_v25  ;;  %v1721_v31 = vmul.f32 0.0625, %v4297_v29  ;;  %v4247_v32 = vsel %vm903_vm8, 1.0, %v5086_v12  ;;  %vm920_vm11 = vmand %vm406_vm9, %vm664_vm10  ;;  %vm421_vm12 = vcmp.ge.s32.totalorder %v162_v22, %v5123_v4  ;;  %vm679_vm13 = vcmp.lt.s32.totalorder %v162_v22, %v5134_v10 }
  0x9a   :  { %2011 = vmatpush.msrb.mxu2 %v1704_v28  ;;  %v1671_v34 = vmul.f32 0.0625, %v4247_v32  ;;  %v4264_v35 = vsel %vm920_vm11, 1.0, %v5086_v12  ;;  %vm935_vm14 = vmand %vm421_vm12, %vm679_vm13  ;;  %vm438_vm15 = vcmp.ge.s32.totalorder %v179_v23, %v5123_v4  ;;  %vm696_vm0 = vcmp.lt.s32.totalorder %v179_v23, %v5134_v10 }
  0x9b   :  { %2033 = vmatpush.msrb.mxu3 %v1721_v31  ;;  %v1688_v36 = vmul.f32 0.0625, %v4264_v35  ;;  %v4279_v37 = vsel %vm935_vm14, 1.0, %v5086_v12  ;;  %vm952_vm1 = vmand %vm438_vm15, %vm696_vm0  ;;  %v146_v40 = vadd.s32 656, %v5115_v1  ;;  %v161_v43 = vadd.s32 776, %v5115_v1 }
  0x9c   :  { %1966 = vmatpush.msrb.mxu0 %v1671_v34  ;;  %v1703_v41 = vmul.f32 0.0625, %v4279_v37  ;;  %v4296_v42 = vsel %vm952_vm1, 1.0, %v5086_v12  ;;  %v178_v44 = vadd.s32 912, %v5115_v1  ;;  %vm388_vm2 = vcmp.ge.s32.totalorder %v129_v39, %v5123_v4 }
  0x9d   :  { %1988 = vmatpush.msrb.mxu1 %v1688_v36  ;;  %v1720_v45 = vmul.f32 0.0625, %v4296_v42  ;;  %vm646_vm3 = vcmp.lt.s32.totalorder %v129_v39, %v5134_v10  ;;  %vm405_vm4 = vcmp.ge.s32.totalorder %v146_v40, %v5123_v4  ;;  %vm663_vm6 = vcmp.lt.s32.totalorder %v146_v40, %v5134_v10  ;;  %v36_v39 = vld [vmem:[#allocation2 + $0x28] sm:$0xff]  ;;  %v38_v42 = vld [vmem:[#allocation2 + $0x38] sm:$0xff] }
  0x9e   :  { %2012 = vmatpush.msrb.mxu2 %v1703_v41  ;;  %vm902_vm5 = vmand %vm388_vm2, %vm646_vm3  ;;  %vm420_vm7 = vcmp.ge.s32.totalorder %v161_v43, %v5123_v4  ;;  %vm678_vm8 = vcmp.lt.s32.totalorder %v161_v43, %v5134_v10  ;;  %vm437_vm9 = vcmp.ge.s32.totalorder %v178_v44, %v5123_v4  ;;  %vm695_vm11 = vcmp.lt.s32.totalorder %v178_v44, %v5134_v10 }
  0x9f   :  { %2034 = vmatpush.msrb.mxu3 %v1720_v45  ;;  %v4246_v46 = vsel %vm902_vm5, 1.0, %v5086_v12  ;;  %vm919_vm10 = vmand %vm405_vm4, %vm663_vm6  ;;  %v128_v48 = vadd.s32 512, %v5115_v1  ;;  %v145_v50 = vadd.s32 648, %v5115_v1  ;;  %v160_v56 = vadd.s32 768, %v5115_v1 }
  0xa0   :  { %v1670_v51 = vmul.f32 0.0625, %v4246_v46  ;;  %v4263_v52 = vsel %vm919_vm10, 1.0, %v5086_v12  ;;  %vm934_vm12 = vmand %vm420_vm7, %vm678_vm8  ;;  %v177_v57 = vadd.s32 904, %v5115_v1  ;;  %v207_v13 = vadd.s32 1144, %v5115_v1 }
  0xa1   :  { %v1687_v58 = vmul.f32 0.0625, %v4263_v52  ;;  %v4278_v59 = vsel %vm934_vm12, 1.0, %v5086_v12  ;;  %vm951_vm13 = vmand %vm437_vm9, %vm695_vm11  ;;  %vm387_vm14 = vcmp.ge.s32.totalorder %v128_v48, %v5123_v4  ;;  %vm645_vm15 = vcmp.lt.s32.totalorder %v128_v48, %v5134_v10 }
  0xa2   :  { %1967 = vmatpush.msrb.mxu0 %v1670_v51  ;;  %v1702_v61 = vmul.f32 0.0625, %v4278_v59  ;;  %v4295_v62 = vsel %vm951_vm13, 1.0, %v5086_v12  ;;  %vm901_vm0 = vmand %vm387_vm14, %vm645_vm15  ;;  %vm404_vm1 = vcmp.ge.s32.totalorder %v145_v50, %v5123_v4  ;;  %vm662_vm2 = vcmp.lt.s32.totalorder %v145_v50, %v5134_v10 }
  0xa3   :  { %1989 = vmatpush.msrb.mxu1 %v1687_v58  ;;  %v1719_v63 = vmul.f32 0.0625, %v4295_v62  ;;  %v4245_v0 = vsel %vm901_vm0, 1.0, %v5086_v12  ;;  %vm918_vm3 = vmand %vm404_vm1, %vm662_vm2  ;;  %vm419_vm4 = vcmp.ge.s32.totalorder %v160_v56, %v5123_v4  ;;  %vm677_vm5 = vcmp.lt.s32.totalorder %v160_v56, %v5134_v10 }
  0xa4   :  { %2013 = vmatpush.msrb.mxu2 %v1702_v61  ;;  %v1669_v5 = vmul.f32 0.0625, %v4245_v0  ;;  %v4262_v6 = vsel %vm918_vm3, 1.0, %v5086_v12  ;;  %vm933_vm6 = vmand %vm419_vm4, %vm677_vm5  ;;  %vm436_vm7 = vcmp.ge.s32.totalorder %v177_v57, %v5123_v4  ;;  %vm694_vm8 = vcmp.lt.s32.totalorder %v177_v57, %v5134_v10 }
  0xa5   :  { %2035 = vmatpush.msrb.mxu3 %v1719_v63  ;;  %v1686_v9 = vmul.f32 0.0625, %v4262_v6  ;;  %v4277_v11 = vsel %vm933_vm6, 1.0, %v5086_v12  ;;  %vm950_vm9 = vmand %vm436_vm7, %vm694_vm8  ;;  %v239_v14 = vadd.s32 1400, %v5115_v1  ;;  %v144_v18 = vadd.s32 640, %v5115_v1 }
  0xa6   :  { %1968 = vmatpush.msrb.mxu0 %v1669_v5  ;;  %v1701_v15 = vmul.f32 0.0625, %v4277_v11  ;;  %v4294_v17 = vsel %vm950_vm9, 1.0, %v5086_v12  ;;  %v176_v19 = vadd.s32 896, %v5115_v1  ;;  %vm466_vm10 = vcmp.ge.s32.totalorder %v207_v13, %v5123_v4 }
  0xa7   :  { %1990 = vmatpush.msrb.mxu1 %v1686_v9  ;;  %v1718_v22 = vmul.f32 0.0625, %v4294_v17  ;;  %vm724_vm11 = vcmp.lt.s32.totalorder %v207_v13, %v5134_v10  ;;  %vm498_vm12 = vcmp.ge.s32.totalorder %v239_v14, %v5123_v4  ;;  %1969 = vmatmul.f32.vlgmr.msrb.gmra.mxu0 %v35_v8  ;;  %vm756_vm14 = vcmp.lt.s32.totalorder %v239_v14, %v5134_v10 }
  0xa8   :  { %2014 = vmatpush.msrb.mxu2 %v1701_v15  ;;  %vm980_vm13 = vmand %vm466_vm10, %vm724_vm11  ;;  %vm403_vm15 = vcmp.ge.s32.totalorder %v144_v18, %v5123_v4  ;;  %vm661_vm0 = vcmp.lt.s32.totalorder %v144_v18, %v5134_v10  ;;  %vm435_vm1 = vcmp.ge.s32.totalorder %v176_v19, %v5123_v4  ;;  %vm693_vm3 = vcmp.lt.s32.totalorder %v176_v19, %v5134_v10 }
  0xa9   :  { %2036 = vmatpush.msrb.mxu3 %v1718_v22  ;;  %v4324_v23 = vsel %vm980_vm13, 1.0, %v5086_v12  ;;  %vm1012_vm2 = vmand %vm498_vm12, %vm756_vm14  ;;  %v206_v25 = vadd.s32 1136, %v5115_v1  ;;  %v223_v26 = vadd.s32 1272, %v5115_v1  ;;  %2015 = vmatmul.f32.vlgmr.msrb.gmra.mxu2 %v37_v21  ;;  %v238_v31 = vadd.s32 1392, %v5115_v1 }
  0xaa   :  { %v1748_v28 = vmul.f32 0.0625, %v4324_v23  ;;  %v4356_v29 = vsel %vm1012_vm2, 1.0, %v5086_v12  ;;  %vm917_vm4 = vmand %vm403_vm15, %vm661_vm0  ;;  %v255_v32 = vadd.s32 1528, %v5115_v1  ;;  %v205_v48 = vadd.s32 1128, %v5115_v1 }
  0xab   :  { %v1780_v34 = vmul.f32 0.0625, %v4356_v29  ;;  %v4261_v35 = vsel %vm917_vm4, 1.0, %v5086_v12  ;;  %vm949_vm5 = vmand %vm435_vm1, %vm693_vm3  ;;  %vm465_vm6 = vcmp.ge.s32.totalorder %v206_v25, %v5123_v4  ;;  %vm723_vm7 = vcmp.lt.s32.totalorder %v206_v25, %v5134_v10 }
  0xac   :  { %2045 = vmatpush.msra.mxu0 %v1748_v28  ;;  %v1685_v36 = vmul.f32 0.0625, %v4261_v35  ;;  %v4293_v37 = vsel %vm949_vm5, 1.0, %v5086_v12  ;;  %vm979_vm8 = vmand %vm465_vm6, %vm723_vm7  ;;  %vm482_vm9 = vcmp.ge.s32.totalorder %v223_v26, %v5123_v4  ;;  %vm740_vm10 = vcmp.lt.s32.totalorder %v223_v26, %v5134_v10 }
  0xad   :  { %2091 = vmatpush.msra.mxu2 %v1780_v34  ;;  %v1717_v40 = vmul.f32 0.0625, %v4293_v37  ;;  %v4323_v41 = vsel %vm979_vm8, 1.0, %v5086_v12  ;;  %vm996_vm11 = vmand %vm482_vm9, %vm740_vm10  ;;  %vm497_vm12 = vcmp.ge.s32.totalorder %v238_v31, %v5123_v4  ;;  %vm755_vm13 = vcmp.lt.s32.totalorder %v238_v31, %v5134_v10 }
  0xae   :  { %1991 = vmatpush.msrb.mxu1 %v1685_v36  ;;  %v1747_v43 = vmul.f32 0.0625, %v4323_v41  ;;  %v4340_v44 = vsel %vm996_vm11, 1.0, %v5086_v12  ;;  %vm1011_vm14 = vmand %vm497_vm12, %vm755_vm13  ;;  %vm514_vm15 = vcmp.ge.s32.totalorder %v255_v32, %v5123_v4  ;;  %vm772_vm0 = vcmp.lt.s32.totalorder %v255_v32, %v5134_v10 }
  0xaf   :  { %2037 = vmatpush.msrb.mxu3 %v1717_v40  ;;  %v1764_v45 = vmul.f32 0.0625, %v4340_v44  ;;  %v4355_v46 = vsel %vm1011_vm14, 1.0, %v5086_v12  ;;  %vm1028_vm1 = vmand %vm514_vm15, %vm772_vm0  ;;  %v222_v50 = vadd.s32 1264, %v5115_v1  ;;  %1992 = vmatmul.f32.vlgmr.msrb.gmra.mxu1 %v36_v39  ;;  %v237_v56 = vadd.s32 1384, %v5115_v1 }
  0xb0   :  { %2046 = vmatpush.msra.mxu0 %v1747_v43  ;;  %v1779_v51 = vmul.f32 0.0625, %v4355_v46  ;;  %v4372_v52 = vsel %vm1028_vm1, 1.0, %v5086_v12  ;;  %v254_v57 = vadd.s32 1520, %v5115_v1  ;;  %2038 = vmatmul.f32.vlgmr.msrb.gmra.mxu3 %v38_v42  ;;  %vm464_vm2 = vcmp.ge.s32.totalorder %v205_v48, %v5123_v4 }
  0xb1   :  { %2068 = vmatpush.msra.mxu1 %v1764_v45  ;;  %v1796_v58 = vmul.f32 0.0625, %v4372_v52  ;;  %vm722_vm3 = vcmp.lt.s32.totalorder %v205_v48, %v5134_v10  ;;  %vm481_vm4 = vcmp.ge.s32.totalorder %v222_v50, %v5123_v4  ;;  %vm739_vm6 = vcmp.lt.s32.totalorder %v222_v50, %v5134_v10 }
  0xb2   :  { %2092 = vmatpush.msra.mxu2 %v1779_v51  ;;  %vm978_vm5 = vmand %vm464_vm2, %vm722_vm3  ;;  %vm496_vm7 = vcmp.ge.s32.totalorder %v237_v56, %v5123_v4  ;;  %vm754_vm8 = vcmp.lt.s32.totalorder %v237_v56, %v5134_v10  ;;  %vm513_vm9 = vcmp.ge.s32.totalorder %v254_v57, %v5123_v4  ;;  %vm771_vm11 = vcmp.lt.s32.totalorder %v254_v57, %v5134_v10 }
  0xb3   :  { %2114 = vmatpush.msra.mxu3 %v1796_v58  ;;  %v4322_v59 = vsel %vm978_vm5, 1.0, %v5086_v12  ;;  %vm995_vm10 = vmand %vm481_vm4, %vm739_vm6  ;;  %v204_v61 = vadd.s32 1120, %v5115_v1  ;;  %v221_v62 = vadd.s32 1256, %v5115_v1  ;;  %v236_v5 = vadd.s32 1376, %v5115_v1 }
  0xb4   :  { %v1746_v63 = vmul.f32 0.0625, %v4322_v59  ;;  %v4339_v0 = vsel %vm995_vm10, 1.0, %v5086_v12  ;;  %vm1010_vm12 = vmand %vm496_vm7, %vm754_vm8  ;;  %v253_v6 = vadd.s32 1512, %v5115_v1  ;;  %v203_v22 = vadd.s32 1112, %v5115_v1 }
  0xb5   :  { %v1763_v8 = vmul.f32 0.0625, %v4339_v0  ;;  %v4354_v9 = vsel %vm1010_vm12, 1.0, %v5086_v12  ;;  %vm1027_vm13 = vmand %vm513_vm9, %vm771_vm11  ;;  %vm463_vm14 = vcmp.ge.s32.totalorder %v204_v61, %v5123_v4  ;;  %vm721_vm15 = vcmp.lt.s32.totalorder %v204_v61, %v5134_v10  ;;  %v51_v0 = vld [vmem:[#allocation2 + $0xa0] sm:$0xff] }
  0xb6   :  { %2047 = vmatpush.msra.mxu0 %v1746_v63  ;;  %v1778_v11 = vmul.f32 0.0625, %v4354_v9  ;;  %v4371_v13 = vsel %vm1027_vm13, 1.0, %v5086_v12  ;;  %vm977_vm0 = vmand %vm463_vm14, %vm721_vm15  ;;  %vm480_vm1 = vcmp.ge.s32.totalorder %v221_v62, %v5123_v4  ;;  %vm738_vm2 = vcmp.lt.s32.totalorder %v221_v62, %v5134_v10 }
  0xb7   :  { %2069 = vmatpush.msra.mxu1 %v1763_v8  ;;  %v1795_v14 = vmul.f32 0.0625, %v4371_v13  ;;  %v4321_v15 = vsel %vm977_vm0, 1.0, %v5086_v12  ;;  %vm994_vm3 = vmand %vm480_vm1, %vm738_vm2  ;;  %vm495_vm4 = vcmp.ge.s32.totalorder %v236_v5, %v5123_v4  ;;  %vm753_vm5 = vcmp.lt.s32.totalorder %v236_v5, %v5134_v10  ;;  %v53_v5 = vld [vmem:[#allocation2 + $0xb0] sm:$0xff]  ;;  %1972 = vmatmul.f32.gmra.mxu0 %v51_v0 }
  0xb8   :  { %2093 = vmatpush.msra.mxu2 %v1778_v11  ;;  %v1745_v17 = vmul.f32 0.0625, %v4321_v15  ;;  %v4338_v18 = vsel %vm994_vm3, 1.0, %v5086_v12  ;;  %vm1009_vm6 = vmand %vm495_vm4, %vm753_vm5  ;;  %vm512_vm7 = vcmp.ge.s32.totalorder %v253_v6, %v5123_v4  ;;  %vm770_vm8 = vcmp.lt.s32.totalorder %v253_v6, %v5134_v10 }
  0xb9   :  { %2115 = vmatpush.msra.mxu3 %v1795_v14  ;;  %v1762_v19 = vmul.f32 0.0625, %v4338_v18  ;;  %v4353_v21 = vsel %vm1009_vm6, 1.0, %v5086_v12  ;;  %vm1026_vm9 = vmand %vm512_vm7, %vm770_vm8  ;;  %v220_v23 = vadd.s32 1248, %v5115_v1  ;;  %v235_v28 = vadd.s32 1368, %v5115_v1  ;;  %2018 = vmatmul.f32.gmra.mxu2 %v53_v5 }
  0xba   :  { %2048 = vmatpush.msra.mxu0 %v1745_v17  ;;  %v1777_v25 = vmul.f32 0.0625, %v4353_v21  ;;  %v4370_v26 = vsel %vm1026_vm9, 1.0, %v5086_v12  ;;  %v252_v29 = vadd.s32 1504, %v5115_v1  ;;  %vm462_vm10 = vcmp.ge.s32.totalorder %v203_v22, %v5123_v4 }
  0xbb   :  { %2070 = vmatpush.msra.mxu1 %v1762_v19  ;;  %v1794_v31 = vmul.f32 0.0625, %v4370_v26  ;;  %vm720_vm11 = vcmp.lt.s32.totalorder %v203_v22, %v5134_v10  ;;  %vm479_vm12 = vcmp.ge.s32.totalorder %v220_v23, %v5123_v4  ;;  %vm737_vm14 = vcmp.lt.s32.totalorder %v220_v23, %v5134_v10  ;;  %v54_v26 = vld [vmem:[#allocation2 + $0xb8] sm:$0xff] }
  0xbc   :  { %2094 = vmatpush.msra.mxu2 %v1777_v25  ;;  %vm976_vm13 = vmand %vm462_vm10, %vm720_vm11  ;;  %vm494_vm15 = vcmp.ge.s32.totalorder %v235_v28, %v5123_v4  ;;  %vm752_vm0 = vcmp.lt.s32.totalorder %v235_v28, %v5134_v10  ;;  %vm511_vm1 = vcmp.ge.s32.totalorder %v252_v29, %v5123_v4  ;;  %vm769_vm3 = vcmp.lt.s32.totalorder %v252_v29, %v5134_v10  ;;  %v52_v25 = vld [vmem:[#allocation2 + $0xa8] sm:$0xff] }
  0xbd   :  { %2116 = vmatpush.msra.mxu3 %v1794_v31  ;;  %v4320_v32 = vsel %vm976_vm13, 1.0, %v5086_v12  ;;  %vm993_vm2 = vmand %vm479_vm12, %vm737_vm14  ;;  %v202_v34 = vadd.s32 1104, %v5115_v1  ;;  %v219_v35 = vadd.s32 1240, %v5115_v1  ;;  %v234_v39 = vadd.s32 1360, %v5115_v1  ;;  %1995 = vmatmul.f32.gmra.mxu1 %v52_v25 }
  0xbe   :  { %v1744_v36 = vmul.f32 0.0625, %v4320_v32  ;;  %v4337_v37 = vsel %vm993_vm2, 1.0, %v5086_v12  ;;  %vm1008_vm4 = vmand %vm494_vm15, %vm752_vm0  ;;  %v251_v40 = vadd.s32 1496, %v5115_v1  ;;  %v201_v56 = vadd.s32 1096, %v5115_v1  ;;  %2041 = vmatmul.f32.gmra.mxu3 %v54_v26 }
  0xbf   :  { %v1761_v41 = vmul.f32 0.0625, %v4337_v37  ;;  %v4352_v42 = vsel %vm1008_vm4, 1.0, %v5086_v12  ;;  %vm1025_vm5 = vmand %vm511_vm1, %vm769_vm3  ;;  %vm461_vm6 = vcmp.ge.s32.totalorder %v202_v34, %v5123_v4  ;;  %vm719_vm7 = vcmp.lt.s32.totalorder %v202_v34, %v5134_v10 }
  0xc0   :  { %2049 = vmatpush.msra.mxu0 %v1744_v36  ;;  %v1776_v43 = vmul.f32 0.0625, %v4352_v42  ;;  %v4369_v44 = vsel %vm1025_vm5, 1.0, %v5086_v12  ;;  %vm975_vm8 = vmand %vm461_vm6, %vm719_vm7  ;;  %vm478_vm9 = vcmp.ge.s32.totalorder %v219_v35, %v5123_v4  ;;  %vm736_vm10 = vcmp.lt.s32.totalorder %v219_v35, %v5134_v10 }
  0xc1   :  { %2071 = vmatpush.msra.mxu1 %v1761_v41  ;;  %v1793_v45 = vmul.f32 0.0625, %v4369_v44  ;;  %v4319_v46 = vsel %vm975_vm8, 1.0, %v5086_v12  ;;  %vm992_vm11 = vmand %vm478_vm9, %vm736_vm10  ;;  %vm493_vm12 = vcmp.ge.s32.totalorder %v234_v39, %v5123_v4  ;;  %vm751_vm13 = vcmp.lt.s32.totalorder %v234_v39, %v5134_v10 }
  0xc2   :  { %2095 = vmatpush.msra.mxu2 %v1776_v43  ;;  %v1743_v48 = vmul.f32 0.0625, %v4319_v46  ;;  %v4336_v50 = vsel %vm992_vm11, 1.0, %v5086_v12  ;;  %vm1007_vm14 = vmand %vm493_vm12, %vm751_vm13  ;;  %vm510_vm15 = vcmp.ge.s32.totalorder %v251_v40, %v5123_v4  ;;  %vm768_vm0 = vcmp.lt.s32.totalorder %v251_v40, %v5134_v10 }
  0xc3   :  { %2117 = vmatpush.msra.mxu3 %v1793_v45  ;;  %v1760_v51 = vmul.f32 0.0625, %v4336_v50  ;;  %v4351_v52 = vsel %vm1007_vm14, 1.0, %v5086_v12  ;;  %vm1024_vm1 = vmand %vm510_vm15, %vm768_vm0  ;;  %v218_v57 = vadd.s32 1232, %v5115_v1  ;;  %v233_v61 = vadd.s32 1352, %v5115_v1 }
  0xc4   :  { %2050 = vmatpush.msra.mxu0 %v1743_v48  ;;  %v1775_v58 = vmul.f32 0.0625, %v4351_v52  ;;  %v4368_v59 = vsel %vm1024_vm1, 1.0, %v5086_v12  ;;  %v250_v62 = vadd.s32 1488, %v5115_v1  ;;  %vm460_vm2 = vcmp.ge.s32.totalorder %v201_v56, %v5123_v4 }
  0xc5   :  { %2072 = vmatpush.msra.mxu1 %v1760_v51  ;;  %v1792_v63 = vmul.f32 0.0625, %v4368_v59  ;;  %vm718_vm3 = vcmp.lt.s32.totalorder %v201_v56, %v5134_v10  ;;  %vm477_vm4 = vcmp.ge.s32.totalorder %v218_v57, %v5123_v4  ;;  %vm735_vm6 = vcmp.lt.s32.totalorder %v218_v57, %v5134_v10 }
  0xc6   :  { %2096 = vmatpush.msra.mxu2 %v1775_v58  ;;  %vm974_vm5 = vmand %vm460_vm2, %vm718_vm3  ;;  %vm492_vm7 = vcmp.ge.s32.totalorder %v233_v61, %v5123_v4  ;;  %vm750_vm8 = vcmp.lt.s32.totalorder %v233_v61, %v5134_v10  ;;  %vm509_vm9 = vcmp.ge.s32.totalorder %v250_v62, %v5123_v4  ;;  %vm767_vm11 = vcmp.lt.s32.totalorder %v250_v62, %v5134_v10 }
  0xc7   :  { %2118 = vmatpush.msra.mxu3 %v1792_v63  ;;  %v4318_v6 = vsel %vm974_vm5, 1.0, %v5086_v12  ;;  %vm991_vm10 = vmand %vm477_vm4, %vm735_vm6  ;;  %v200_v8 = vadd.s32 1088, %v5115_v1  ;;  %v217_v9 = vadd.s32 1224, %v5115_v1  ;;  %v232_v14 = vadd.s32 1344, %v5115_v1 }
  0xc8   :  { %v1742_v11 = vmul.f32 0.0625, %v4318_v6  ;;  %v4335_v13 = vsel %vm991_vm10, 1.0, %v5086_v12  ;;  %vm1006_vm12 = vmand %vm492_vm7, %vm750_vm8  ;;  %v249_v15 = vadd.s32 1480, %v5115_v1  ;;  %v199_v34 = vadd.s32 1080, %v5115_v1 }
  0xc9   :  { %v1759_v17 = vmul.f32 0.0625, %v4335_v13  ;;  %v4350_v18 = vsel %vm1006_vm12, 1.0, %v5086_v12  ;;  %vm1023_vm13 = vmand %vm509_vm9, %vm767_vm11  ;;  %vm459_vm14 = vcmp.ge.s32.totalorder %v200_v8, %v5123_v4  ;;  %vm717_vm15 = vcmp.lt.s32.totalorder %v200_v8, %v5134_v10 }
  0xca   :  { %2051 = vmatpush.msra.mxu0 %v1742_v11  ;;  %v1774_v19 = vmul.f32 0.0625, %v4350_v18  ;;  %v4367_v21 = vsel %vm1023_vm13, 1.0, %v5086_v12  ;;  %vm973_vm0 = vmand %vm459_vm14, %vm717_vm15  ;;  %vm476_vm1 = vcmp.ge.s32.totalorder %v217_v9, %v5123_v4  ;;  %vm734_vm2 = vcmp.lt.s32.totalorder %v217_v9, %v5134_v10 }
  0xcb   :  { %2073 = vmatpush.msra.mxu1 %v1759_v17  ;;  %v1791_v22 = vmul.f32 0.0625, %v4367_v21  ;;  %v4317_v23 = vsel %vm973_vm0, 1.0, %v5086_v12  ;;  %vm990_vm3 = vmand %vm476_vm1, %vm734_vm2  ;;  %vm491_vm4 = vcmp.ge.s32.totalorder %v232_v14, %v5123_v4  ;;  %vm749_vm5 = vcmp.lt.s32.totalorder %v232_v14, %v5134_v10 }
  0xcc   :  { %2097 = vmatpush.msra.mxu2 %v1774_v19  ;;  %v1741_v28 = vmul.f32 0.0625, %v4317_v23  ;;  %v4334_v29 = vsel %vm990_vm3, 1.0, %v5086_v12  ;;  %vm1005_vm6 = vmand %vm491_vm4, %vm749_vm5  ;;  %vm508_vm7 = vcmp.ge.s32.totalorder %v249_v15, %v5123_v4  ;;  %vm766_vm8 = vcmp.lt.s32.totalorder %v249_v15, %v5134_v10 }
  0xcd   :  { %2119 = vmatpush.msra.mxu3 %v1791_v22  ;;  %v1758_v31 = vmul.f32 0.0625, %v4334_v29  ;;  %v4349_v32 = vsel %vm1005_vm6, 1.0, %v5086_v12  ;;  %vm1022_vm9 = vmand %vm508_vm7, %vm766_vm8  ;;  %v216_v35 = vadd.s32 1216, %v5115_v1  ;;  %v231_v39 = vadd.s32 1336, %v5115_v1 }
  0xce   :  { %2052 = vmatpush.msra.mxu0 %v1741_v28  ;;  %v1773_v36 = vmul.f32 0.0625, %v4349_v32  ;;  %v4366_v37 = vsel %vm1022_vm9, 1.0, %v5086_v12  ;;  %v248_v40 = vadd.s32 1472, %v5115_v1  ;;  %vm458_vm10 = vcmp.ge.s32.totalorder %v199_v34, %v5123_v4 }
  0xcf   :  { %2074 = vmatpush.msra.mxu1 %v1758_v31  ;;  %v1790_v41 = vmul.f32 0.0625, %v4366_v37  ;;  %vm716_vm11 = vcmp.lt.s32.totalorder %v199_v34, %v5134_v10  ;;  %vm475_vm12 = vcmp.ge.s32.totalorder %v216_v35, %v5123_v4  ;;  %vm733_vm14 = vcmp.lt.s32.totalorder %v216_v35, %v5134_v10 }
  0xd0   :  { %2098 = vmatpush.msra.mxu2 %v1773_v36  ;;  %vm972_vm13 = vmand %vm458_vm10, %vm716_vm11  ;;  %vm490_vm15 = vcmp.ge.s32.totalorder %v231_v39, %v5123_v4  ;;  %vm748_vm0 = vcmp.lt.s32.totalorder %v231_v39, %v5134_v10  ;;  %vm507_vm1 = vcmp.ge.s32.totalorder %v248_v40, %v5123_v4  ;;  %vm765_vm3 = vcmp.lt.s32.totalorder %v248_v40, %v5134_v10 }
  0xd1   :  { %2120 = vmatpush.msra.mxu3 %v1790_v41  ;;  %v4316_v42 = vsel %vm972_vm13, 1.0, %v5086_v12  ;;  %vm989_vm2 = vmand %vm475_vm12, %vm733_vm14  ;;  %v198_v43 = vadd.s32 1072, %v5115_v1  ;;  %v215_v44 = vadd.s32 1208, %v5115_v1  ;;  %v230_v48 = vadd.s32 1328, %v5115_v1 }
  0xd2   :  { %v1740_v45 = vmul.f32 0.0625, %v4316_v42  ;;  %v4333_v46 = vsel %vm989_vm2, 1.0, %v5086_v12  ;;  %vm1004_vm4 = vmand %vm490_vm15, %vm748_vm0  ;;  %v247_v50 = vadd.s32 1464, %v5115_v1  ;;  %v197_v5 = vadd.s32 1064, %v5115_v1 }
  0xd3   :  { %v1757_v51 = vmul.f32 0.0625, %v4333_v46  ;;  %v4348_v52 = vsel %vm1004_vm4, 1.0, %v5086_v12  ;;  %vm1021_vm5 = vmand %vm507_vm1, %vm765_vm3  ;;  %vm457_vm6 = vcmp.ge.s32.totalorder %v198_v43, %v5123_v4  ;;  %vm715_vm7 = vcmp.lt.s32.totalorder %v198_v43, %v5134_v10 }
  0xd4   :  { %2053 = vmatpush.msra.mxu0 %v1740_v45  ;;  %v1772_v56 = vmul.f32 0.0625, %v4348_v52  ;;  %v4365_v57 = vsel %vm1021_vm5, 1.0, %v5086_v12  ;;  %vm971_vm8 = vmand %vm457_vm6, %vm715_vm7  ;;  %vm474_vm9 = vcmp.ge.s32.totalorder %v215_v44, %v5123_v4  ;;  %vm732_vm10 = vcmp.lt.s32.totalorder %v215_v44, %v5134_v10 }
  0xd5   :  { %2075 = vmatpush.msra.mxu1 %v1757_v51  ;;  %v1789_v58 = vmul.f32 0.0625, %v4365_v57  ;;  %v4315_v59 = vsel %vm971_vm8, 1.0, %v5086_v12  ;;  %vm988_vm11 = vmand %vm474_vm9, %vm732_vm10  ;;  %vm489_vm12 = vcmp.ge.s32.totalorder %v230_v48, %v5123_v4  ;;  %vm747_vm13 = vcmp.lt.s32.totalorder %v230_v48, %v5134_v10 }
  0xd6   :  { %2099 = vmatpush.msra.mxu2 %v1772_v56  ;;  %v1739_v61 = vmul.f32 0.0625, %v4315_v59  ;;  %v4332_v62 = vsel %vm988_vm11, 1.0, %v5086_v12  ;;  %vm1003_vm14 = vmand %vm489_vm12, %vm747_vm13  ;;  %vm506_vm15 = vcmp.ge.s32.totalorder %v247_v50, %v5123_v4  ;;  %vm764_vm0 = vcmp.lt.s32.totalorder %v247_v50, %v5134_v10 }
  0xd7   :  { %2121 = vmatpush.msra.mxu3 %v1789_v58  ;;  %v1756_v63 = vmul.f32 0.0625, %v4332_v62  ;;  %v4347_v0 = vsel %vm1003_vm14, 1.0, %v5086_v12  ;;  %vm1020_vm1 = vmand %vm506_vm15, %vm764_vm0  ;;  %v214_v6 = vadd.s32 1200, %v5115_v1  ;;  %v229_v11 = vadd.s32 1320, %v5115_v1 }
  0xd8   :  { %2054 = vmatpush.msra.mxu0 %v1739_v61  ;;  %v1771_v8 = vmul.f32 0.0625, %v4347_v0  ;;  %v4364_v9 = vsel %vm1020_vm1, 1.0, %v5086_v12  ;;  %v246_v13 = vadd.s32 1456, %v5115_v1  ;;  %vm456_vm2 = vcmp.ge.s32.totalorder %v197_v5, %v5123_v4 }
  0xd9   :  { %2076 = vmatpush.msra.mxu1 %v1756_v63  ;;  %v1788_v14 = vmul.f32 0.0625, %v4364_v9  ;;  %vm714_vm3 = vcmp.lt.s32.totalorder %v197_v5, %v5134_v10  ;;  %vm473_vm4 = vcmp.ge.s32.totalorder %v214_v6, %v5123_v4  ;;  %vm731_vm6 = vcmp.lt.s32.totalorder %v214_v6, %v5134_v10 }
  0xda   :  { %2100 = vmatpush.msra.mxu2 %v1771_v8  ;;  %vm970_vm5 = vmand %vm456_vm2, %vm714_vm3  ;;  %vm488_vm7 = vcmp.ge.s32.totalorder %v229_v11, %v5123_v4  ;;  %vm746_vm8 = vcmp.lt.s32.totalorder %v229_v11, %v5134_v10  ;;  %vm505_vm9 = vcmp.ge.s32.totalorder %v246_v13, %v5123_v4  ;;  %vm763_vm11 = vcmp.lt.s32.totalorder %v246_v13, %v5134_v10 }
  0xdb   :  { %2122 = vmatpush.msra.mxu3 %v1788_v14  ;;  %v4314_v15 = vsel %vm970_vm5, 1.0, %v5086_v12  ;;  %vm987_vm10 = vmand %vm473_vm4, %vm731_vm6  ;;  %v196_v17 = vadd.s32 1056, %v5115_v1  ;;  %v213_v18 = vadd.s32 1192, %v5115_v1  ;;  %v228_v22 = vadd.s32 1312, %v5115_v1 }
  0xdc   :  { %v1738_v19 = vmul.f32 0.0625, %v4314_v15  ;;  %v4331_v21 = vsel %vm987_vm10, 1.0, %v5086_v12  ;;  %vm1002_vm12 = vmand %vm488_vm7, %vm746_vm8  ;;  %v245_v23 = vadd.s32 1448, %v5115_v1  ;;  %v195_v39 = vadd.s32 1048, %v5115_v1 }
  0xdd   :  { %v1755_v25 = vmul.f32 0.0625, %v4331_v21  ;;  %v4346_v26 = vsel %vm1002_vm12, 1.0, %v5086_v12  ;;  %vm1019_vm13 = vmand %vm505_vm9, %vm763_vm11  ;;  %vm455_vm14 = vcmp.ge.s32.totalorder %v196_v17, %v5123_v4  ;;  %vm713_vm15 = vcmp.lt.s32.totalorder %v196_v17, %v5134_v10 }
  0xde   :  { %2055 = vmatpush.msra.mxu0 %v1738_v19  ;;  %v1770_v28 = vmul.f32 0.0625, %v4346_v26  ;;  %v4363_v29 = vsel %vm1019_vm13, 1.0, %v5086_v12  ;;  %vm969_vm0 = vmand %vm455_vm14, %vm713_vm15  ;;  %vm472_vm1 = vcmp.ge.s32.totalorder %v213_v18, %v5123_v4  ;;  %vm730_vm2 = vcmp.lt.s32.totalorder %v213_v18, %v5134_v10 }
  0xdf   :  { %2077 = vmatpush.msra.mxu1 %v1755_v25  ;;  %v1787_v31 = vmul.f32 0.0625, %v4363_v29  ;;  %v4313_v32 = vsel %vm969_vm0, 1.0, %v5086_v12  ;;  %vm986_vm3 = vmand %vm472_vm1, %vm730_vm2  ;;  %vm487_vm4 = vcmp.ge.s32.totalorder %v228_v22, %v5123_v4  ;;  %vm745_vm5 = vcmp.lt.s32.totalorder %v228_v22, %v5134_v10 }
  0xe0   :  { %2101 = vmatpush.msra.mxu2 %v1770_v28  ;;  %v1737_v34 = vmul.f32 0.0625, %v4313_v32  ;;  %v4330_v35 = vsel %vm986_vm3, 1.0, %v5086_v12  ;;  %vm1001_vm6 = vmand %vm487_vm4, %vm745_vm5  ;;  %vm504_vm7 = vcmp.ge.s32.totalorder %v245_v23, %v5123_v4  ;;  %vm762_vm8 = vcmp.lt.s32.totalorder %v245_v23, %v5134_v10 }
  0xe1   :  { %2123 = vmatpush.msra.mxu3 %v1787_v31  ;;  %v1754_v36 = vmul.f32 0.0625, %v4330_v35  ;;  %v4345_v37 = vsel %vm1001_vm6, 1.0, %v5086_v12  ;;  %vm1018_vm9 = vmand %vm504_vm7, %vm762_vm8  ;;  %v212_v40 = vadd.s32 1184, %v5115_v1  ;;  %v227_v43 = vadd.s32 1304, %v5115_v1 }
  0xe2   :  { %2056 = vmatpush.msra.mxu0 %v1737_v34  ;;  %v1769_v41 = vmul.f32 0.0625, %v4345_v37  ;;  %v4362_v42 = vsel %vm1018_vm9, 1.0, %v5086_v12  ;;  %v244_v44 = vadd.s32 1440, %v5115_v1  ;;  %vm454_vm10 = vcmp.ge.s32.totalorder %v195_v39, %v5123_v4 }
  0xe3   :  { %2078 = vmatpush.msra.mxu1 %v1754_v36  ;;  %v1786_v45 = vmul.f32 0.0625, %v4362_v42  ;;  %vm712_vm11 = vcmp.lt.s32.totalorder %v195_v39, %v5134_v10  ;;  %vm471_vm12 = vcmp.ge.s32.totalorder %v212_v40, %v5123_v4  ;;  %vm729_vm14 = vcmp.lt.s32.totalorder %v212_v40, %v5134_v10 }
  0xe4   :  { %2102 = vmatpush.msra.mxu2 %v1769_v41  ;;  %vm968_vm13 = vmand %vm454_vm10, %vm712_vm11  ;;  %vm486_vm15 = vcmp.ge.s32.totalorder %v227_v43, %v5123_v4  ;;  %vm744_vm0 = vcmp.lt.s32.totalorder %v227_v43, %v5134_v10  ;;  %vm503_vm1 = vcmp.ge.s32.totalorder %v244_v44, %v5123_v4  ;;  %vm761_vm3 = vcmp.lt.s32.totalorder %v244_v44, %v5134_v10  ;;  %v39_v41 = vld [vmem:[#allocation2 + $0x40] sm:$0xff] }
  0xe5   :  { %2124 = vmatpush.msra.mxu3 %v1786_v45  ;;  %v4312_v46 = vsel %vm968_vm13, 1.0, %v5086_v12  ;;  %vm985_vm2 = vmand %vm471_vm12, %vm729_vm14  ;;  %v194_v48 = vadd.s32 1040, %v5115_v1  ;;  %v211_v50 = vadd.s32 1176, %v5115_v1  ;;  %v226_v56 = vadd.s32 1296, %v5115_v1 }
  0xe6   :  { %v1736_v51 = vmul.f32 0.0625, %v4312_v46  ;;  %v4329_v52 = vsel %vm985_vm2, 1.0, %v5086_v12  ;;  %vm1000_vm4 = vmand %vm486_vm15, %vm744_vm0  ;;  %v243_v57 = vadd.s32 1432, %v5115_v1  ;;  %v193_v11 = vadd.s32 1032, %v5115_v1 }
  0xe7   :  { %v1753_v58 = vmul.f32 0.0625, %v4329_v52  ;;  %v4344_v59 = vsel %vm1000_vm4, 1.0, %v5086_v12  ;;  %vm1017_vm5 = vmand %vm503_vm1, %vm761_vm3  ;;  %vm453_vm6 = vcmp.ge.s32.totalorder %v194_v48, %v5123_v4  ;;  %vm711_vm7 = vcmp.lt.s32.totalorder %v194_v48, %v5134_v10 }
  0xe8   :  { %2057 = vmatpush.msra.mxu0 %v1736_v51  ;;  %v1768_v61 = vmul.f32 0.0625, %v4344_v59  ;;  %v4361_v62 = vsel %vm1017_vm5, 1.0, %v5086_v12  ;;  %vm967_vm8 = vmand %vm453_vm6, %vm711_vm7  ;;  %vm470_vm9 = vcmp.ge.s32.totalorder %v211_v50, %v5123_v4  ;;  %vm728_vm10 = vcmp.lt.s32.totalorder %v211_v50, %v5134_v10  ;;  %v41_v50 = vld [vmem:[#allocation2 + $0x50] sm:$0xff] }
  0xe9   :  { %2079 = vmatpush.msra.mxu1 %v1753_v58  ;;  %v1785_v63 = vmul.f32 0.0625, %v4361_v62  ;;  %v4311_v0 = vsel %vm967_vm8, 1.0, %v5086_v12  ;;  %vm984_vm11 = vmand %vm470_vm9, %vm728_vm10  ;;  %vm485_vm12 = vcmp.ge.s32.totalorder %v226_v56, %v5123_v4  ;;  %vm743_vm13 = vcmp.lt.s32.totalorder %v226_v56, %v5134_v10 }
  0xea   :  { %2103 = vmatpush.msra.mxu2 %v1768_v61  ;;  %v1735_v5 = vmul.f32 0.0625, %v4311_v0  ;;  %v4328_v6 = vsel %vm984_vm11, 1.0, %v5086_v12  ;;  %vm999_vm14 = vmand %vm485_vm12, %vm743_vm13  ;;  %vm502_vm15 = vcmp.ge.s32.totalorder %v243_v57, %v5123_v4  ;;  %vm760_vm0 = vcmp.lt.s32.totalorder %v243_v57, %v5134_v10 }
  0xeb   :  { %2125 = vmatpush.msra.mxu3 %v1785_v63  ;;  %v1752_v8 = vmul.f32 0.0625, %v4328_v6  ;;  %v4343_v9 = vsel %vm999_vm14, 1.0, %v5086_v12  ;;  %vm1016_vm1 = vmand %vm502_vm15, %vm760_vm0  ;;  %v210_v13 = vadd.s32 1168, %v5115_v1  ;;  %v225_v17 = vadd.s32 1288, %v5115_v1 }
  0xec   :  { %2058 = vmatpush.msra.mxu0 %v1735_v5  ;;  %v1767_v14 = vmul.f32 0.0625, %v4343_v9  ;;  %v4360_v15 = vsel %vm1016_vm1, 1.0, %v5086_v12  ;;  %v242_v18 = vadd.s32 1424, %v5115_v1  ;;  %vm452_vm2 = vcmp.ge.s32.totalorder %v193_v11, %v5123_v4 }
  0xed   :  { %2080 = vmatpush.msra.mxu1 %v1752_v8  ;;  %v1784_v19 = vmul.f32 0.0625, %v4360_v15  ;;  %vm710_vm3 = vcmp.lt.s32.totalorder %v193_v11, %v5134_v10  ;;  %vm469_vm4 = vcmp.ge.s32.totalorder %v210_v13, %v5123_v4  ;;  %vm727_vm6 = vcmp.lt.s32.totalorder %v210_v13, %v5134_v10  ;;  %v40_v11 = vld [vmem:[#allocation2 + $0x48] sm:$0xff] }
  0xee   :  { %2104 = vmatpush.msra.mxu2 %v1767_v14  ;;  %vm966_vm5 = vmand %vm452_vm2, %vm710_vm3  ;;  %vm484_vm7 = vcmp.ge.s32.totalorder %v225_v17, %v5123_v4  ;;  %vm742_vm8 = vcmp.lt.s32.totalorder %v225_v17, %v5134_v10  ;;  %vm501_vm9 = vcmp.ge.s32.totalorder %v242_v18, %v5123_v4  ;;  %vm759_vm11 = vcmp.lt.s32.totalorder %v242_v18, %v5134_v10  ;;  %v42_v14 = vld [vmem:[#allocation2 + $0x58] sm:$0xff] }
  0xef   :  { %2126 = vmatpush.msra.mxu3 %v1784_v19  ;;  %v4310_v21 = vsel %vm966_vm5, 1.0, %v5086_v12  ;;  %vm983_vm10 = vmand %vm469_vm4, %vm727_vm6  ;;  %v192_v22 = vadd.s32 1024, %v5115_v1  ;;  %v209_v23 = vadd.s32 1160, %v5115_v1  ;;  %v224_v28 = vadd.s32 1280, %v5115_v1  ;;  %v55_v19 = vld [vmem:[#allocation2 + $0xc0] sm:$0xff] }
  0xf0   :  { %v1734_v25 = vmul.f32 0.0625, %v4310_v21  ;;  %v4327_v26 = vsel %vm983_vm10, 1.0, %v5086_v12  ;;  %vm998_vm12 = vmand %vm484_vm7, %vm742_vm8  ;;  %v241_v29 = vadd.s32 1416, %v5115_v1  ;;  %v271_v44 = vadd.s32 1656, %v5115_v1 }
  0xf1   :  { %v1751_v31 = vmul.f32 0.0625, %v4327_v26  ;;  %v4342_v32 = vsel %vm998_vm12, 1.0, %v5086_v12  ;;  %vm1015_vm13 = vmand %vm501_vm9, %vm759_vm11  ;;  %vm451_vm14 = vcmp.ge.s32.totalorder %v192_v22, %v5123_v4  ;;  %vm709_vm15 = vcmp.lt.s32.totalorder %v192_v22, %v5134_v10 }
  0xf2   :  { %2059 = vmatpush.msra.mxu0 %v1734_v25  ;;  %v1766_v34 = vmul.f32 0.0625, %v4342_v32  ;;  %v4359_v35 = vsel %vm1015_vm13, 1.0, %v5086_v12  ;;  %vm965_vm0 = vmand %vm451_vm14, %vm709_vm15  ;;  %vm468_vm1 = vcmp.ge.s32.totalorder %v209_v23, %v5123_v4  ;;  %vm726_vm2 = vcmp.lt.s32.totalorder %v209_v23, %v5134_v10  ;;  %v57_v32 = vld [vmem:[#allocation2 + $0xd0] sm:$0xff] }
  0xf3   :  { %2081 = vmatpush.msra.mxu1 %v1751_v31  ;;  %v1783_v36 = vmul.f32 0.0625, %v4359_v35  ;;  %v4309_v37 = vsel %vm965_vm0, 1.0, %v5086_v12  ;;  %vm982_vm3 = vmand %vm468_vm1, %vm726_vm2  ;;  %vm483_vm4 = vcmp.ge.s32.totalorder %v224_v28, %v5123_v4  ;;  %vm741_vm5 = vcmp.lt.s32.totalorder %v224_v28, %v5134_v10 }
  0xf4   :  { %2105 = vmatpush.msra.mxu2 %v1766_v34  ;;  %v1733_v39 = vmul.f32 0.0625, %v4309_v37  ;;  %v4326_v40 = vsel %vm982_vm3, 1.0, %v5086_v12  ;;  %vm997_vm6 = vmand %vm483_vm4, %vm741_vm5  ;;  %vm500_vm7 = vcmp.ge.s32.totalorder %v241_v29, %v5123_v4  ;;  %vm758_vm8 = vcmp.lt.s32.totalorder %v241_v29, %v5134_v10 }
  0xf5   :  { %2127 = vmatpush.msra.mxu3 %v1783_v36  ;;  %v1750_v42 = vmul.f32 0.0625, %v4326_v40  ;;  %v4341_v43 = vsel %vm997_vm6, 1.0, %v5086_v12  ;;  %vm1014_vm9 = vmand %vm500_vm7, %vm758_vm8  ;;  %v303_v45 = vadd.s32 1912, %v5115_v1  ;;  %v208_v51 = vadd.s32 1152, %v5115_v1 }
  0xf6   :  { %2060 = vmatpush.msra.mxu0 %v1733_v39  ;;  %v1765_v46 = vmul.f32 0.0625, %v4341_v43  ;;  %v4358_v48 = vsel %vm1014_vm9, 1.0, %v5086_v12  ;;  %v240_v52 = vadd.s32 1408, %v5115_v1  ;;  %vm530_vm10 = vcmp.ge.s32.totalorder %v271_v44, %v5123_v4 }
  0xf7   :  { %2082 = vmatpush.msra.mxu1 %v1750_v42  ;;  %v1782_v56 = vmul.f32 0.0625, %v4358_v48  ;;  %2061 = vmatmul.f32.vlgmr.msra.gmra.mxu0 %v39_v41  ;;  %vm788_vm11 = vcmp.lt.s32.totalorder %v271_v44, %v5134_v10  ;;  %vm562_vm12 = vcmp.ge.s32.totalorder %v303_v45, %v5123_v4  ;;  %vm820_vm14 = vcmp.lt.s32.totalorder %v303_v45, %v5134_v10  ;;  %v56_v45 = vld [vmem:[#allocation2 + $0xc8] sm:$0xff] }
  0xf8   :  { %2106 = vmatpush.msra.mxu2 %v1765_v46  ;;  %vm1044_vm13 = vmand %vm530_vm10, %vm788_vm11  ;;  %vm467_vm15 = vcmp.ge.s32.totalorder %v208_v51, %v5123_v4  ;;  %vm725_vm0 = vcmp.lt.s32.totalorder %v208_v51, %v5134_v10  ;;  %vm499_vm1 = vcmp.ge.s32.totalorder %v240_v52, %v5123_v4  ;;  %vm757_vm3 = vcmp.lt.s32.totalorder %v240_v52, %v5134_v10  ;;  %v58_v52 = vld [vmem:[#allocation2 + $0xd8] sm:$0xff] }
  0xf9   :  { %2128 = vmatpush.msra.mxu3 %v1782_v56  ;;  %2107 = vmatmul.f32.vlgmr.msra.gmra.mxu2 %v41_v50  ;;  %v4388_v57 = vsel %vm1044_vm13, 1.0, %v5086_v12  ;;  %vm1076_vm2 = vmand %vm562_vm12, %vm820_vm14  ;;  %v270_v58 = vadd.s32 1648, %v5115_v1  ;;  %v287_v59 = vadd.s32 1784, %v5115_v1  ;;  %v302_v63 = vadd.s32 1904, %v5115_v1 }
  0xfa   :  { %v1812_v61 = vmul.f32 0.0625, %v4388_v57  ;;  %v4420_v62 = vsel %vm1076_vm2, 1.0, %v5086_v12  ;;  %vm981_vm4 = vmand %vm467_vm15, %vm725_vm0  ;;  %v319_v0 = vadd.s32 2040, %v5115_v1  ;;  %v269_v23 = vadd.s32 1640, %v5115_v1 }
  0xfb   :  { %v1844_v5 = vmul.f32 0.0625, %v4420_v62  ;;  %v4325_v6 = vsel %vm981_vm4, 1.0, %v5086_v12  ;;  %vm1013_vm5 = vmand %vm499_vm1, %vm757_vm3  ;;  %vm529_vm6 = vcmp.ge.s32.totalorder %v270_v58, %v5123_v4  ;;  %vm787_vm7 = vcmp.lt.s32.totalorder %v270_v58, %v5134_v10 }
  0xfc   :  { %2137 = vmatpush.msrb.mxu0 %v1812_v61  ;;  %v1749_v8 = vmul.f32 0.0625, %v4325_v6  ;;  %v4357_v9 = vsel %vm1013_vm5, 1.0, %v5086_v12  ;;  %vm1043_vm8 = vmand %vm529_vm6, %vm787_vm7  ;;  %vm546_vm9 = vcmp.ge.s32.totalorder %v287_v59, %v5123_v4  ;;  %vm804_vm10 = vcmp.lt.s32.totalorder %v287_v59, %v5134_v10 }
  0xfd   :  { %2183 = vmatpush.msrb.mxu2 %v1844_v5  ;;  %v1781_v13 = vmul.f32 0.0625, %v4357_v9  ;;  %v4387_v15 = vsel %vm1043_vm8, 1.0, %v5086_v12  ;;  %vm1060_vm11 = vmand %vm546_vm9, %vm804_vm10  ;;  %vm561_vm12 = vcmp.ge.s32.totalorder %v302_v63, %v5123_v4  ;;  %vm819_vm13 = vcmp.lt.s32.totalorder %v302_v63, %v5134_v10 }
  0xfe   :  { %2083 = vmatpush.msra.mxu1 %v1749_v8  ;;  %v1811_v17 = vmul.f32 0.0625, %v4387_v15  ;;  %v4404_v18 = vsel %vm1060_vm11, 1.0, %v5086_v12  ;;  %vm1075_vm14 = vmand %vm561_vm12, %vm819_vm13  ;;  %vm578_vm15 = vcmp.ge.s32.totalorder %v319_v0, %v5123_v4  ;;  %vm836_vm0 = vcmp.lt.s32.totalorder %v319_v0, %v5134_v10 }
  0xff   :  { %2129 = vmatpush.msra.mxu3 %v1781_v13  ;;  %2084 = vmatmul.f32.vlgmr.msra.gmra.mxu1 %v40_v11  ;;  %v1828_v21 = vmul.f32 0.0625, %v4404_v18  ;;  %v4419_v22 = vsel %vm1075_vm14, 1.0, %v5086_v12  ;;  %vm1092_vm1 = vmand %vm578_vm15, %vm836_vm0  ;;  %v286_v25 = vadd.s32 1776, %v5115_v1  ;;  %v301_v29 = vadd.s32 1896, %v5115_v1 }
 0x100   :  { %2130 = vmatmul.f32.vlgmr.msra.gmra.mxu3 %v42_v14  ;;  %2138 = vmatpush.msrb.mxu0 %v1811_v17  ;;  %v1843_v26 = vmul.f32 0.0625, %v4419_v22  ;;  %v4436_v28 = vsel %vm1092_vm1, 1.0, %v5086_v12  ;;  %v318_v31 = vadd.s32 2032, %v5115_v1  ;;  %vm528_vm2 = vcmp.ge.s32.totalorder %v269_v23, %v5123_v4 }
 0x101   :  { %2160 = vmatpush.msrb.mxu1 %v1828_v21  ;;  %v1860_v34 = vmul.f32 0.0625, %v4436_v28  ;;  %vm786_vm3 = vcmp.lt.s32.totalorder %v269_v23, %v5134_v10  ;;  %vm545_vm4 = vcmp.ge.s32.totalorder %v286_v25, %v5123_v4  ;;  %2064 = vmatmul.f32.gmra.mxu0 %v55_v19  ;;  %vm803_vm6 = vcmp.lt.s32.totalorder %v286_v25, %v5134_v10 }
 0x102   :  { %2184 = vmatpush.msrb.mxu2 %v1843_v26  ;;  %vm1042_vm5 = vmand %vm528_vm2, %vm786_vm3  ;;  %vm560_vm7 = vcmp.ge.s32.totalorder %v301_v29, %v5123_v4  ;;  %vm818_vm8 = vcmp.lt.s32.totalorder %v301_v29, %v5134_v10  ;;  %vm577_vm9 = vcmp.ge.s32.totalorder %v318_v31, %v5123_v4  ;;  %vm835_vm11 = vcmp.lt.s32.totalorder %v318_v31, %v5134_v10 }
 0x103   :  { %2206 = vmatpush.msrb.mxu3 %v1860_v34  ;;  %v4386_v35 = vsel %vm1042_vm5, 1.0, %v5086_v12  ;;  %vm1059_vm10 = vmand %vm545_vm4, %vm803_vm6  ;;  %v268_v36 = vadd.s32 1632, %v5115_v1  ;;  %v285_v37 = vadd.s32 1768, %v5115_v1  ;;  %2110 = vmatmul.f32.gmra.mxu2 %v57_v32  ;;  %v300_v41 = vadd.s32 1888, %v5115_v1 }
 0x104   :  { %v1810_v39 = vmul.f32 0.0625, %v4386_v35  ;;  %v4403_v40 = vsel %vm1059_vm10, 1.0, %v5086_v12  ;;  %vm1074_vm12 = vmand %vm560_vm7, %vm818_vm8  ;;  %v317_v42 = vadd.s32 2024, %v5115_v1  ;;  %v267_v61 = vadd.s32 1624, %v5115_v1 }
 0x105   :  { %v1827_v43 = vmul.f32 0.0625, %v4403_v40  ;;  %v4418_v44 = vsel %vm1074_vm12, 1.0, %v5086_v12  ;;  %vm1091_vm13 = vmand %vm577_vm9, %vm835_vm11  ;;  %vm527_vm14 = vcmp.ge.s32.totalorder %v268_v36, %v5123_v4  ;;  %vm785_vm15 = vcmp.lt.s32.totalorder %v268_v36, %v5134_v10 }
 0x106   :  { %2139 = vmatpush.msrb.mxu0 %v1810_v39  ;;  %v1842_v46 = vmul.f32 0.0625, %v4418_v44  ;;  %v4435_v48 = vsel %vm1091_vm13, 1.0, %v5086_v12  ;;  %vm1041_vm0 = vmand %vm527_vm14, %vm785_vm15  ;;  %vm544_vm1 = vcmp.ge.s32.totalorder %v285_v37, %v5123_v4  ;;  %vm802_vm2 = vcmp.lt.s32.totalorder %v285_v37, %v5134_v10 }
 0x107   :  { %2161 = vmatpush.msrb.mxu1 %v1827_v43  ;;  %v1859_v50 = vmul.f32 0.0625, %v4435_v48  ;;  %v4385_v51 = vsel %vm1041_vm0, 1.0, %v5086_v12  ;;  %vm1058_vm3 = vmand %vm544_vm1, %vm802_vm2  ;;  %vm559_vm4 = vcmp.ge.s32.totalorder %v300_v41, %v5123_v4  ;;  %vm817_vm5 = vcmp.lt.s32.totalorder %v300_v41, %v5134_v10 }
 0x108   :  { %2185 = vmatpush.msrb.mxu2 %v1842_v46  ;;  %v1809_v56 = vmul.f32 0.0625, %v4385_v51  ;;  %v4402_v57 = vsel %vm1058_vm3, 1.0, %v5086_v12  ;;  %vm1073_vm6 = vmand %vm559_vm4, %vm817_vm5  ;;  %vm576_vm7 = vcmp.ge.s32.totalorder %v317_v42, %v5123_v4  ;;  %vm834_vm8 = vcmp.lt.s32.totalorder %v317_v42, %v5134_v10  ;;  %2087 = vmatmul.f32.gmra.mxu1 %v56_v45 }
 0x109   :  { %2207 = vmatpush.msrb.mxu3 %v1859_v50  ;;  %v1826_v58 = vmul.f32 0.0625, %v4402_v57  ;;  %v4417_v59 = vsel %vm1073_vm6, 1.0, %v5086_v12  ;;  %vm1090_vm9 = vmand %vm576_vm7, %vm834_vm8  ;;  %v284_v62 = vadd.s32 1760, %v5115_v1  ;;  %v299_v5 = vadd.s32 1880, %v5115_v1 }
 0x10a   :  { %2140 = vmatpush.msrb.mxu0 %v1809_v56  ;;  %v1841_v63 = vmul.f32 0.0625, %v4417_v59  ;;  %v4434_v0 = vsel %vm1090_vm9, 1.0, %v5086_v12  ;;  %v316_v6 = vadd.s32 2016, %v5115_v1  ;;  %2133 = vmatmul.f32.gmra.mxu3 %v58_v52  ;;  %vm526_vm10 = vcmp.ge.s32.totalorder %v267_v61, %v5123_v4 }
 0x10b   :  { %2162 = vmatpush.msrb.mxu1 %v1826_v58  ;;  %v1858_v8 = vmul.f32 0.0625, %v4434_v0  ;;  %vm784_vm11 = vcmp.lt.s32.totalorder %v267_v61, %v5134_v10  ;;  %vm543_vm12 = vcmp.ge.s32.totalorder %v284_v62, %v5123_v4  ;;  %vm801_vm14 = vcmp.lt.s32.totalorder %v284_v62, %v5134_v10 }
 0x10c   :  { %2186 = vmatpush.msrb.mxu2 %v1841_v63  ;;  %vm1040_vm13 = vmand %vm526_vm10, %vm784_vm11  ;;  %vm558_vm15 = vcmp.ge.s32.totalorder %v299_v5, %v5123_v4  ;;  %vm816_vm0 = vcmp.lt.s32.totalorder %v299_v5, %v5134_v10  ;;  %vm575_vm1 = vcmp.ge.s32.totalorder %v316_v6, %v5123_v4  ;;  %vm833_vm3 = vcmp.lt.s32.totalorder %v316_v6, %v5134_v10 }
 0x10d   :  { %2208 = vmatpush.msrb.mxu3 %v1858_v8  ;;  %v4384_v9 = vsel %vm1040_vm13, 1.0, %v5086_v12  ;;  %vm1057_vm2 = vmand %vm543_vm12, %vm801_vm14  ;;  %v266_v11 = vadd.s32 1616, %v5115_v1  ;;  %v283_v13 = vadd.s32 1752, %v5115_v1  ;;  %v298_v17 = vadd.s32 1872, %v5115_v1 }
 0x10e   :  { %v1808_v14 = vmul.f32 0.0625, %v4384_v9  ;;  %v4401_v15 = vsel %vm1057_vm2, 1.0, %v5086_v12  ;;  %vm1072_vm4 = vmand %vm558_vm15, %vm816_vm0  ;;  %v315_v18 = vadd.s32 2008, %v5115_v1  ;;  %v265_v34 = vadd.s32 1608, %v5115_v1 }
 0x10f   :  { %v1825_v19 = vmul.f32 0.0625, %v4401_v15  ;;  %v4416_v21 = vsel %vm1072_vm4, 1.0, %v5086_v12  ;;  %vm1089_vm5 = vmand %vm575_vm1, %vm833_vm3  ;;  %vm525_vm6 = vcmp.ge.s32.totalorder %v266_v11, %v5123_v4  ;;  %vm783_vm7 = vcmp.lt.s32.totalorder %v266_v11, %v5134_v10 }
 0x110   :  { %2141 = vmatpush.msrb.mxu0 %v1808_v14  ;;  %v1840_v22 = vmul.f32 0.0625, %v4416_v21  ;;  %v4433_v23 = vsel %vm1089_vm5, 1.0, %v5086_v12  ;;  %vm1039_vm8 = vmand %vm525_vm6, %vm783_vm7  ;;  %vm542_vm9 = vcmp.ge.s32.totalorder %v283_v13, %v5123_v4  ;;  %vm800_vm10 = vcmp.lt.s32.totalorder %v283_v13, %v5134_v10 }
 0x111   :  { %2163 = vmatpush.msrb.mxu1 %v1825_v19  ;;  %v1857_v25 = vmul.f32 0.0625, %v4433_v23  ;;  %v4383_v26 = vsel %vm1039_vm8, 1.0, %v5086_v12  ;;  %vm1056_vm11 = vmand %vm542_vm9, %vm800_vm10  ;;  %vm557_vm12 = vcmp.ge.s32.totalorder %v298_v17, %v5123_v4  ;;  %vm815_vm13 = vcmp.lt.s32.totalorder %v298_v17, %v5134_v10 }
 0x112   :  { %2187 = vmatpush.msrb.mxu2 %v1840_v22  ;;  %v1807_v28 = vmul.f32 0.0625, %v4383_v26  ;;  %v4400_v29 = vsel %vm1056_vm11, 1.0, %v5086_v12  ;;  %vm1071_vm14 = vmand %vm557_vm12, %vm815_vm13  ;;  %vm574_vm15 = vcmp.ge.s32.totalorder %v315_v18, %v5123_v4  ;;  %vm832_vm0 = vcmp.lt.s32.totalorder %v315_v18, %v5134_v10 }
 0x113   :  { %2209 = vmatpush.msrb.mxu3 %v1857_v25  ;;  %v1824_v31 = vmul.f32 0.0625, %v4400_v29  ;;  %v4415_v32 = vsel %vm1071_vm14, 1.0, %v5086_v12  ;;  %vm1088_vm1 = vmand %vm574_vm15, %vm832_vm0  ;;  %v282_v35 = vadd.s32 1744, %v5115_v1  ;;  %v297_v39 = vadd.s32 1864, %v5115_v1 }
 0x114   :  { %2142 = vmatpush.msrb.mxu0 %v1807_v28  ;;  %v1839_v36 = vmul.f32 0.0625, %v4415_v32  ;;  %v4432_v37 = vsel %vm1088_vm1, 1.0, %v5086_v12  ;;  %v314_v40 = vadd.s32 2000, %v5115_v1  ;;  %vm524_vm2 = vcmp.ge.s32.totalorder %v265_v34, %v5123_v4 }
 0x115   :  { %2164 = vmatpush.msrb.mxu1 %v1824_v31  ;;  %v1856_v41 = vmul.f32 0.0625, %v4432_v37  ;;  %vm782_vm3 = vcmp.lt.s32.totalorder %v265_v34, %v5134_v10  ;;  %vm541_vm4 = vcmp.ge.s32.totalorder %v282_v35, %v5123_v4  ;;  %vm799_vm6 = vcmp.lt.s32.totalorder %v282_v35, %v5134_v10 }
 0x116   :  { %2188 = vmatpush.msrb.mxu2 %v1839_v36  ;;  %vm1038_vm5 = vmand %vm524_vm2, %vm782_vm3  ;;  %vm556_vm7 = vcmp.ge.s32.totalorder %v297_v39, %v5123_v4  ;;  %vm814_vm8 = vcmp.lt.s32.totalorder %v297_v39, %v5134_v10  ;;  %vm573_vm9 = vcmp.ge.s32.totalorder %v314_v40, %v5123_v4  ;;  %vm831_vm11 = vcmp.lt.s32.totalorder %v314_v40, %v5134_v10 }
 0x117   :  { %2210 = vmatpush.msrb.mxu3 %v1856_v41  ;;  %v4382_v42 = vsel %vm1038_vm5, 1.0, %v5086_v12  ;;  %vm1055_vm10 = vmand %vm541_vm4, %vm799_vm6  ;;  %v264_v43 = vadd.s32 1600, %v5115_v1  ;;  %v281_v44 = vadd.s32 1736, %v5115_v1  ;;  %v296_v48 = vadd.s32 1856, %v5115_v1 }
 0x118   :  { %v1806_v45 = vmul.f32 0.0625, %v4382_v42  ;;  %v4399_v46 = vsel %vm1055_vm10, 1.0, %v5086_v12  ;;  %vm1070_vm12 = vmand %vm556_vm7, %vm814_vm8  ;;  %v313_v50 = vadd.s32 1992, %v5115_v1  ;;  %v263_v5 = vadd.s32 1592, %v5115_v1 }
 0x119   :  { %v1823_v51 = vmul.f32 0.0625, %v4399_v46  ;;  %v4414_v52 = vsel %vm1070_vm12, 1.0, %v5086_v12  ;;  %vm1087_vm13 = vmand %vm573_vm9, %vm831_vm11  ;;  %vm523_vm14 = vcmp.ge.s32.totalorder %v264_v43, %v5123_v4  ;;  %vm781_vm15 = vcmp.lt.s32.totalorder %v264_v43, %v5134_v10 }
 0x11a   :  { %2143 = vmatpush.msrb.mxu0 %v1806_v45  ;;  %v1838_v56 = vmul.f32 0.0625, %v4414_v52  ;;  %v4431_v57 = vsel %vm1087_vm13, 1.0, %v5086_v12  ;;  %vm1037_vm0 = vmand %vm523_vm14, %vm781_vm15  ;;  %vm540_vm1 = vcmp.ge.s32.totalorder %v281_v44, %v5123_v4  ;;  %vm798_vm2 = vcmp.lt.s32.totalorder %v281_v44, %v5134_v10 }
 0x11b   :  { %2165 = vmatpush.msrb.mxu1 %v1823_v51  ;;  %v1855_v58 = vmul.f32 0.0625, %v4431_v57  ;;  %v4381_v59 = vsel %vm1037_vm0, 1.0, %v5086_v12  ;;  %vm1054_vm3 = vmand %vm540_vm1, %vm798_vm2  ;;  %vm555_vm4 = vcmp.ge.s32.totalorder %v296_v48, %v5123_v4  ;;  %vm813_vm5 = vcmp.lt.s32.totalorder %v296_v48, %v5134_v10 }
 0x11c   :  { %2189 = vmatpush.msrb.mxu2 %v1838_v56  ;;  %v1805_v61 = vmul.f32 0.0625, %v4381_v59  ;;  %v4398_v62 = vsel %vm1054_vm3, 1.0, %v5086_v12  ;;  %vm1069_vm6 = vmand %vm555_vm4, %vm813_vm5  ;;  %vm572_vm7 = vcmp.ge.s32.totalorder %v313_v50, %v5123_v4  ;;  %vm830_vm8 = vcmp.lt.s32.totalorder %v313_v50, %v5134_v10 }
 0x11d   :  { %2211 = vmatpush.msrb.mxu3 %v1855_v58  ;;  %v1822_v63 = vmul.f32 0.0625, %v4398_v62  ;;  %v4413_v0 = vsel %vm1069_vm6, 1.0, %v5086_v12  ;;  %vm1086_vm9 = vmand %vm572_vm7, %vm830_vm8  ;;  %v280_v6 = vadd.s32 1728, %v5115_v1  ;;  %v295_v11 = vadd.s32 1848, %v5115_v1 }
 0x11e   :  { %2144 = vmatpush.msrb.mxu0 %v1805_v61  ;;  %v1837_v8 = vmul.f32 0.0625, %v4413_v0  ;;  %v4430_v9 = vsel %vm1086_vm9, 1.0, %v5086_v12  ;;  %v312_v13 = vadd.s32 1984, %v5115_v1  ;;  %vm522_vm10 = vcmp.ge.s32.totalorder %v263_v5, %v5123_v4 }
 0x11f   :  { %2166 = vmatpush.msrb.mxu1 %v1822_v63  ;;  %v1854_v14 = vmul.f32 0.0625, %v4430_v9  ;;  %vm780_vm11 = vcmp.lt.s32.totalorder %v263_v5, %v5134_v10  ;;  %vm539_vm12 = vcmp.ge.s32.totalorder %v280_v6, %v5123_v4  ;;  %vm797_vm14 = vcmp.lt.s32.totalorder %v280_v6, %v5134_v10 }
 0x120   :  { %2190 = vmatpush.msrb.mxu2 %v1837_v8  ;;  %vm1036_vm13 = vmand %vm522_vm10, %vm780_vm11  ;;  %vm554_vm15 = vcmp.ge.s32.totalorder %v295_v11, %v5123_v4  ;;  %vm812_vm0 = vcmp.lt.s32.totalorder %v295_v11, %v5134_v10  ;;  %vm571_vm1 = vcmp.ge.s32.totalorder %v312_v13, %v5123_v4  ;;  %vm829_vm3 = vcmp.lt.s32.totalorder %v312_v13, %v5134_v10 }
 0x121   :  { %2212 = vmatpush.msrb.mxu3 %v1854_v14  ;;  %v4380_v15 = vsel %vm1036_vm13, 1.0, %v5086_v12  ;;  %vm1053_vm2 = vmand %vm539_vm12, %vm797_vm14  ;;  %v262_v17 = vadd.s32 1584, %v5115_v1  ;;  %v279_v18 = vadd.s32 1720, %v5115_v1  ;;  %v294_v22 = vadd.s32 1840, %v5115_v1 }
 0x122   :  { %v1804_v19 = vmul.f32 0.0625, %v4380_v15  ;;  %v4397_v21 = vsel %vm1053_vm2, 1.0, %v5086_v12  ;;  %vm1068_vm4 = vmand %vm554_vm15, %vm812_vm0  ;;  %v311_v23 = vadd.s32 1976, %v5115_v1  ;;  %v261_v39 = vadd.s32 1576, %v5115_v1 }
 0x123   :  { %v1821_v25 = vmul.f32 0.0625, %v4397_v21  ;;  %v4412_v26 = vsel %vm1068_vm4, 1.0, %v5086_v12  ;;  %vm1085_vm5 = vmand %vm571_vm1, %vm829_vm3  ;;  %vm521_vm6 = vcmp.ge.s32.totalorder %v262_v17, %v5123_v4  ;;  %vm779_vm7 = vcmp.lt.s32.totalorder %v262_v17, %v5134_v10 }
 0x124   :  { %2145 = vmatpush.msrb.mxu0 %v1804_v19  ;;  %v1836_v28 = vmul.f32 0.0625, %v4412_v26  ;;  %v4429_v29 = vsel %vm1085_vm5, 1.0, %v5086_v12  ;;  %vm1035_vm8 = vmand %vm521_vm6, %vm779_vm7  ;;  %vm538_vm9 = vcmp.ge.s32.totalorder %v279_v18, %v5123_v4  ;;  %vm796_vm10 = vcmp.lt.s32.totalorder %v279_v18, %v5134_v10 }
 0x125   :  { %2167 = vmatpush.msrb.mxu1 %v1821_v25  ;;  %v1853_v31 = vmul.f32 0.0625, %v4429_v29  ;;  %v4379_v32 = vsel %vm1035_vm8, 1.0, %v5086_v12  ;;  %vm1052_vm11 = vmand %vm538_vm9, %vm796_vm10  ;;  %vm553_vm12 = vcmp.ge.s32.totalorder %v294_v22, %v5123_v4  ;;  %vm811_vm13 = vcmp.lt.s32.totalorder %v294_v22, %v5134_v10 }
 0x126   :  { %2191 = vmatpush.msrb.mxu2 %v1836_v28  ;;  %v1803_v34 = vmul.f32 0.0625, %v4379_v32  ;;  %v4396_v35 = vsel %vm1052_vm11, 1.0, %v5086_v12  ;;  %vm1067_vm14 = vmand %vm553_vm12, %vm811_vm13  ;;  %vm570_vm15 = vcmp.ge.s32.totalorder %v311_v23, %v5123_v4  ;;  %vm828_vm0 = vcmp.lt.s32.totalorder %v311_v23, %v5134_v10 }
 0x127   :  { %2213 = vmatpush.msrb.mxu3 %v1853_v31  ;;  %v1820_v36 = vmul.f32 0.0625, %v4396_v35  ;;  %v4411_v37 = vsel %vm1067_vm14, 1.0, %v5086_v12  ;;  %vm1084_vm1 = vmand %vm570_vm15, %vm828_vm0  ;;  %v278_v40 = vadd.s32 1712, %v5115_v1  ;;  %v293_v43 = vadd.s32 1832, %v5115_v1 }
 0x128   :  { %2146 = vmatpush.msrb.mxu0 %v1803_v34  ;;  %v1835_v41 = vmul.f32 0.0625, %v4411_v37  ;;  %v4428_v42 = vsel %vm1084_vm1, 1.0, %v5086_v12  ;;  %v310_v44 = vadd.s32 1968, %v5115_v1  ;;  %vm520_vm2 = vcmp.ge.s32.totalorder %v261_v39, %v5123_v4 }
 0x129   :  { %2168 = vmatpush.msrb.mxu1 %v1820_v36  ;;  %v1852_v45 = vmul.f32 0.0625, %v4428_v42  ;;  %vm778_vm3 = vcmp.lt.s32.totalorder %v261_v39, %v5134_v10  ;;  %vm537_vm4 = vcmp.ge.s32.totalorder %v278_v40, %v5123_v4  ;;  %vm795_vm6 = vcmp.lt.s32.totalorder %v278_v40, %v5134_v10 }
 0x12a   :  { %2192 = vmatpush.msrb.mxu2 %v1835_v41  ;;  %vm1034_vm5 = vmand %vm520_vm2, %vm778_vm3  ;;  %vm552_vm7 = vcmp.ge.s32.totalorder %v293_v43, %v5123_v4  ;;  %vm810_vm8 = vcmp.lt.s32.totalorder %v293_v43, %v5134_v10  ;;  %vm569_vm9 = vcmp.ge.s32.totalorder %v310_v44, %v5123_v4  ;;  %vm827_vm11 = vcmp.lt.s32.totalorder %v310_v44, %v5134_v10 }
 0x12b   :  { %2214 = vmatpush.msrb.mxu3 %v1852_v45  ;;  %v4378_v46 = vsel %vm1034_vm5, 1.0, %v5086_v12  ;;  %vm1051_vm10 = vmand %vm537_vm4, %vm795_vm6  ;;  %v260_v48 = vadd.s32 1568, %v5115_v1  ;;  %v277_v50 = vadd.s32 1704, %v5115_v1  ;;  %v292_v56 = vadd.s32 1824, %v5115_v1 }
 0x12c   :  { %v1802_v51 = vmul.f32 0.0625, %v4378_v46  ;;  %v4395_v52 = vsel %vm1051_vm10, 1.0, %v5086_v12  ;;  %vm1066_vm12 = vmand %vm552_vm7, %vm810_vm8  ;;  %v309_v57 = vadd.s32 1960, %v5115_v1  ;;  %v259_v11 = vadd.s32 1560, %v5115_v1 }
 0x12d   :  { %v1819_v58 = vmul.f32 0.0625, %v4395_v52  ;;  %v4410_v59 = vsel %vm1066_vm12, 1.0, %v5086_v12  ;;  %vm1083_vm13 = vmand %vm569_vm9, %vm827_vm11  ;;  %vm519_vm14 = vcmp.ge.s32.totalorder %v260_v48, %v5123_v4  ;;  %vm777_vm15 = vcmp.lt.s32.totalorder %v260_v48, %v5134_v10 }
 0x12e   :  { %2147 = vmatpush.msrb.mxu0 %v1802_v51  ;;  %v1834_v61 = vmul.f32 0.0625, %v4410_v59  ;;  %v4427_v62 = vsel %vm1083_vm13, 1.0, %v5086_v12  ;;  %vm1033_vm0 = vmand %vm519_vm14, %vm777_vm15  ;;  %vm536_vm1 = vcmp.ge.s32.totalorder %v277_v50, %v5123_v4  ;;  %vm794_vm2 = vcmp.lt.s32.totalorder %v277_v50, %v5134_v10 }
 0x12f   :  { %2169 = vmatpush.msrb.mxu1 %v1819_v58  ;;  %v1851_v63 = vmul.f32 0.0625, %v4427_v62  ;;  %v4377_v0 = vsel %vm1033_vm0, 1.0, %v5086_v12  ;;  %vm1050_vm3 = vmand %vm536_vm1, %vm794_vm2  ;;  %vm551_vm4 = vcmp.ge.s32.totalorder %v292_v56, %v5123_v4  ;;  %vm809_vm5 = vcmp.lt.s32.totalorder %v292_v56, %v5134_v10 }
 0x130   :  { %2193 = vmatpush.msrb.mxu2 %v1834_v61  ;;  %v1801_v5 = vmul.f32 0.0625, %v4377_v0  ;;  %v4394_v6 = vsel %vm1050_vm3, 1.0, %v5086_v12  ;;  %vm1065_vm6 = vmand %vm551_vm4, %vm809_vm5  ;;  %vm568_vm7 = vcmp.ge.s32.totalorder %v309_v57, %v5123_v4  ;;  %vm826_vm8 = vcmp.lt.s32.totalorder %v309_v57, %v5134_v10 }
 0x131   :  { %2215 = vmatpush.msrb.mxu3 %v1851_v63  ;;  %v1818_v8 = vmul.f32 0.0625, %v4394_v6  ;;  %v4409_v9 = vsel %vm1065_vm6, 1.0, %v5086_v12  ;;  %vm1082_vm9 = vmand %vm568_vm7, %vm826_vm8  ;;  %v276_v13 = vadd.s32 1696, %v5115_v1  ;;  %v291_v17 = vadd.s32 1816, %v5115_v1 }
 0x132   :  { %2148 = vmatpush.msrb.mxu0 %v1801_v5  ;;  %v1833_v14 = vmul.f32 0.0625, %v4409_v9  ;;  %v4426_v15 = vsel %vm1082_vm9, 1.0, %v5086_v12  ;;  %v308_v18 = vadd.s32 1952, %v5115_v1  ;;  %vm518_vm10 = vcmp.ge.s32.totalorder %v259_v11, %v5123_v4 }
 0x133   :  { %2170 = vmatpush.msrb.mxu1 %v1818_v8  ;;  %v1850_v19 = vmul.f32 0.0625, %v4426_v15  ;;  %vm776_vm11 = vcmp.lt.s32.totalorder %v259_v11, %v5134_v10  ;;  %vm535_vm12 = vcmp.ge.s32.totalorder %v276_v13, %v5123_v4  ;;  %vm793_vm14 = vcmp.lt.s32.totalorder %v276_v13, %v5134_v10 }
 0x134   :  { %2194 = vmatpush.msrb.mxu2 %v1833_v14  ;;  %vm1032_vm13 = vmand %vm518_vm10, %vm776_vm11  ;;  %vm550_vm15 = vcmp.ge.s32.totalorder %v291_v17, %v5123_v4  ;;  %vm808_vm0 = vcmp.lt.s32.totalorder %v291_v17, %v5134_v10  ;;  %vm567_vm1 = vcmp.ge.s32.totalorder %v308_v18, %v5123_v4  ;;  %vm825_vm3 = vcmp.lt.s32.totalorder %v308_v18, %v5134_v10  ;;  %v43_v14 = vld [vmem:[#allocation2 + $0x60] sm:$0xff] }
 0x135   :  { %2216 = vmatpush.msrb.mxu3 %v1850_v19  ;;  %v4376_v21 = vsel %vm1032_vm13, 1.0, %v5086_v12  ;;  %vm1049_vm2 = vmand %vm535_vm12, %vm793_vm14  ;;  %v258_v22 = vadd.s32 1552, %v5115_v1  ;;  %v275_v23 = vadd.s32 1688, %v5115_v1  ;;  %v290_v28 = vadd.s32 1808, %v5115_v1 }
 0x136   :  { %v1800_v25 = vmul.f32 0.0625, %v4376_v21  ;;  %v4393_v26 = vsel %vm1049_vm2, 1.0, %v5086_v12  ;;  %vm1064_vm4 = vmand %vm550_vm15, %vm808_vm0  ;;  %v307_v29 = vadd.s32 1944, %v5115_v1  ;;  %v257_v43 = vadd.s32 1544, %v5115_v1 }
 0x137   :  { %v1817_v31 = vmul.f32 0.0625, %v4393_v26  ;;  %v4408_v32 = vsel %vm1064_vm4, 1.0, %v5086_v12  ;;  %vm1081_vm5 = vmand %vm567_vm1, %vm825_vm3  ;;  %vm517_vm6 = vcmp.ge.s32.totalorder %v258_v22, %v5123_v4  ;;  %vm775_vm7 = vcmp.lt.s32.totalorder %v258_v22, %v5134_v10 }
 0x138   :  { %2149 = vmatpush.msrb.mxu0 %v1800_v25  ;;  %v1832_v34 = vmul.f32 0.0625, %v4408_v32  ;;  %v4425_v35 = vsel %vm1081_vm5, 1.0, %v5086_v12  ;;  %vm1031_vm8 = vmand %vm517_vm6, %vm775_vm7  ;;  %vm534_vm9 = vcmp.ge.s32.totalorder %v275_v23, %v5123_v4  ;;  %vm792_vm10 = vcmp.lt.s32.totalorder %v275_v23, %v5134_v10  ;;  %v45_v23 = vld [vmem:[#allocation2 + $0x70] sm:$0xff] }
 0x139   :  { %2171 = vmatpush.msrb.mxu1 %v1817_v31  ;;  %v1849_v36 = vmul.f32 0.0625, %v4425_v35  ;;  %v4375_v37 = vsel %vm1031_vm8, 1.0, %v5086_v12  ;;  %vm1048_vm11 = vmand %vm534_vm9, %vm792_vm10  ;;  %vm549_vm12 = vcmp.ge.s32.totalorder %v290_v28, %v5123_v4  ;;  %vm807_vm13 = vcmp.lt.s32.totalorder %v290_v28, %v5134_v10  ;;  %v44_v31 = vld [vmem:[#allocation2 + $0x68] sm:$0xff]  ;;  %v59_v35 = vld [vmem:[#allocation2 + $0xe0] sm:$0xff] }
 0x13a   :  { %2195 = vmatpush.msrb.mxu2 %v1832_v34  ;;  %v1799_v39 = vmul.f32 0.0625, %v4375_v37  ;;  %v4392_v40 = vsel %vm1048_vm11, 1.0, %v5086_v12  ;;  %vm1063_vm14 = vmand %vm549_vm12, %vm807_vm13  ;;  %vm566_vm15 = vcmp.ge.s32.totalorder %v307_v29, %v5123_v4  ;;  %vm824_vm0 = vcmp.lt.s32.totalorder %v307_v29, %v5134_v10  ;;  %v46_v34 = vld [vmem:[#allocation2 + $0x78] sm:$0xff]  ;;  %v1878_v37 = vpop.f32.mrf.mxu0 }
 0x13b   :  { %2217 = vmatpush.msrb.mxu3 %v1849_v36  ;;  %v1816_v41 = vmul.f32 0.0625, %v4392_v40  ;;  %v4407_v42 = vsel %vm1063_vm14, 1.0, %v5086_v12  ;;  %vm1080_vm1 = vmand %vm566_vm15, %vm824_vm0  ;;  %v274_v44 = vadd.s32 1680, %v5115_v1  ;;  %v289_v48 = vadd.s32 1800, %v5115_v1  ;;  %v62_v36 = vld [vmem:[#allocation2 + $0xf8] sm:$0xff]  ;;  %v1924_v40 = vpop.f32.mrf.mxu2 }
 0x13c   :  { %2150 = vmatpush.msrb.mxu0 %v1799_v39  ;;  %v1831_v45 = vmul.f32 0.0625, %v4407_v42  ;;  %v4424_v46 = vsel %vm1080_vm1, 1.0, %v5086_v12  ;;  %v306_v50 = vadd.s32 1936, %v5115_v1  ;;  %vm516_vm2 = vcmp.ge.s32.totalorder %v257_v43, %v5123_v4  ;;  %v1901_v39 = vpop.f32.mrf.mxu1 }
 0x13d   :  { %2172 = vmatpush.msrb.mxu1 %v1816_v41  ;;  %v1848_v51 = vmul.f32 0.0625, %v4424_v46  ;;  %vm774_vm3 = vcmp.lt.s32.totalorder %v257_v43, %v5134_v10  ;;  %vm533_vm4 = vcmp.ge.s32.totalorder %v274_v44, %v5123_v4  ;;  %vm791_vm6 = vcmp.lt.s32.totalorder %v274_v44, %v5134_v10 }
 0x13e   :  { %2196 = vmatpush.msrb.mxu2 %v1831_v45  ;;  %vm1030_vm5 = vmand %vm516_vm2, %vm774_vm3  ;;  %vm548_vm7 = vcmp.ge.s32.totalorder %v289_v48, %v5123_v4  ;;  %vm806_vm8 = vcmp.lt.s32.totalorder %v289_v48, %v5134_v10  ;;  %vm565_vm9 = vcmp.ge.s32.totalorder %v306_v50, %v5123_v4  ;;  %vm823_vm11 = vcmp.lt.s32.totalorder %v306_v50, %v5134_v10 }
 0x13f   :  { %2218 = vmatpush.msrb.mxu3 %v1848_v51  ;;  %v4374_v52 = vsel %vm1030_vm5, 1.0, %v5086_v12  ;;  %vm1047_vm10 = vmand %vm533_vm4, %vm791_vm6  ;;  %v256_v56 = vadd.s32 1536, %v5115_v1  ;;  %v273_v57 = vadd.s32 1672, %v5115_v1  ;;  %v288_v61 = vadd.s32 1792, %v5115_v1 }
 0x140   :  { %v1798_v58 = vmul.f32 0.0625, %v4374_v52  ;;  %v4391_v59 = vsel %vm1047_vm10, 1.0, %v5086_v12  ;;  %vm1062_vm12 = vmand %vm548_vm7, %vm806_vm8  ;;  %v305_v62 = vadd.s32 1928, %v5115_v1  ;;  %v272_v18 = vadd.s32 1664, %v5115_v1 }
 0x141   :  { %v1815_v63 = vmul.f32 0.0625, %v4391_v59  ;;  %v4406_v0 = vsel %vm1062_vm12, 1.0, %v5086_v12  ;;  %vm1079_vm13 = vmand %vm565_vm9, %vm823_vm11  ;;  %vm515_vm14 = vcmp.ge.s32.totalorder %v256_v56, %v5123_v4  ;;  %vm773_vm15 = vcmp.lt.s32.totalorder %v256_v56, %v5134_v10 }
 0x142   :  { %2151 = vmatpush.msrb.mxu0 %v1798_v58  ;;  %v1830_v5 = vmul.f32 0.0625, %v4406_v0  ;;  %v4423_v6 = vsel %vm1079_vm13, 1.0, %v5086_v12  ;;  %vm1029_vm0 = vmand %vm515_vm14, %vm773_vm15  ;;  %vm532_vm1 = vcmp.ge.s32.totalorder %v273_v57, %v5123_v4  ;;  %vm790_vm2 = vcmp.lt.s32.totalorder %v273_v57, %v5134_v10  ;;  %v1881_v41 = vpop.f32.mrf.mxu0 }
 0x143   :  { %2173 = vmatpush.msrb.mxu1 %v1815_v63  ;;  %v1847_v8 = vmul.f32 0.0625, %v4423_v6  ;;  %v4373_v9 = vsel %vm1029_vm0, 1.0, %v5086_v12  ;;  %vm1046_vm3 = vmand %vm532_vm1, %vm790_vm2  ;;  %vm547_vm4 = vcmp.ge.s32.totalorder %v288_v61, %v5123_v4  ;;  %vm805_vm5 = vcmp.lt.s32.totalorder %v288_v61, %v5134_v10  ;;  %v1927_v43 = vpop.f32.mrf.mxu2 }
 0x144   :  { %2197 = vmatpush.msrb.mxu2 %v1830_v5  ;;  %v1797_v11 = vmul.f32 0.0625, %v4373_v9  ;;  %v4390_v13 = vsel %vm1046_vm3, 1.0, %v5086_v12  ;;  %vm1061_vm6 = vmand %vm547_vm4, %vm805_vm5  ;;  %vm564_vm7 = vcmp.ge.s32.totalorder %v305_v62, %v5123_v4  ;;  %vm822_vm8 = vcmp.lt.s32.totalorder %v305_v62, %v5134_v10  ;;  %v1904_v42 = vpop.f32.mrf.mxu1  ;;  %v2229_v5 = vld [vmem:[%s8069_s1] sm:$0xff] }
 0x145   :  { %2219 = vmatpush.msrb.mxu3 %v1847_v8  ;;  %v1814_v15 = vmul.f32 0.0625, %v4390_v13  ;;  %v4405_v17 = vsel %vm1061_vm6, 1.0, %v5086_v12  ;;  %vm1078_vm9 = vmand %vm564_vm7, %vm822_vm8  ;;  %v304_v19 = vadd.s32 1920, %v5115_v1  ;;  %vm531_vm10 = vcmp.ge.s32.totalorder %v272_v18, %v5123_v4 }
 0x146   :  { %2152 = vmatpush.msrb.mxu0 %v1797_v11  ;;  %v1829_v21 = vmul.f32 0.0625, %v4405_v17  ;;  %v4422_v22 = vsel %vm1078_vm9, 1.0, %v5086_v12  ;;  %vm789_vm11 = vcmp.lt.s32.totalorder %v272_v18, %v5134_v10  ;;  %v1902_v45 = vadd.f32 %v1901_v39, %v1878_v37  ;;  %v2267_v37 = vld [vmem:[%s8070_s2 + $0x60] sm:$0xff] }
 0x147   :  { %2174 = vmatpush.msrb.mxu1 %v1814_v15  ;;  %v1846_v25 = vmul.f32 0.0625, %v4422_v22  ;;  %2153 = vmatmul.f32.vlgmr.msrb.gmra.mxu0 %v43_v14  ;;  %vm563_vm12 = vcmp.ge.s32.totalorder %v304_v19, %v5123_v4  ;;  %vm1045_vm13 = vmand %vm531_vm10, %vm789_vm11  ;;  %vm821_vm14 = vcmp.lt.s32.totalorder %v304_v19, %v5134_v10  ;;  %v61_v4 = vld [vmem:[#allocation2 + $0xf0] sm:$0xff]  ;;  %v60_v10 = vld [vmem:[#allocation2 + $0xe8] sm:$0xff]  ;;  %v1905_v51 = vadd.f32 %v1904_v42, %v1881_v41 }
 0x148   :  { %2198 = vmatpush.msrb.mxu2 %v1829_v21  ;;  %v4389_v26 = vsel %vm1045_vm13, 1.0, %v5086_v12  ;;  %vm1077_vm15 = vmand %vm563_vm12, %vm821_vm14  ;;  %v1925_v48 = vadd.f32 %v1924_v40, %v1902_v45  ;;  %2245 = vmatpush.xpose.msra.mxu0 %v2229_v5  ;;  %vm2271_vm0 = vcmask 64512  }
 0x149   :  { %2220 = vmatpush.msrb.mxu3 %v1846_v25  ;;  %2199 = vmatmul.f32.vlgmr.msrb.gmra.mxu2 %v45_v23  ;;  %v1813_v28 = vmul.f32 0.0625, %v4389_v26  ;;  %v4421_v29 = vsel %vm1077_vm15, 1.0, %v5086_v12  ;;  %v1947_v12 = vpop.f32.mrf.mxu3  ;;  %v1928_v58 = vadd.f32 %v1927_v43, %v1905_v51  ;;  %v2270_v23 = vld [vmem:[%s8070_s2 + $0x78] sm:$0xff]  ;;  %v2269_v25 = vld [vmem:[%s8070_s2 + $0x70] sm:$0xff] }
 0x14a   :  { %v1845_v32 = vmul.f32 0.0625, %v4421_v29  ;;  %v1970_v44 = vpop.f32.mrf.mxu0  ;;  %v1948_v57 = vadd.f32 %v1947_v12, %v1925_v48  ;;  %v2266_v43 = vld [vmem:[%s8070_s2 + $0x58] sm:$0xff]  ;;  %v2265_v51 = vld [vmem:[%s8070_s2 + $0x50] sm:$0xff] }
 0x14b   :  { %2175 = vmatpush.msrb.mxu1 %v1813_v28  ;;  %v2016_v52 = vpop.f32.mrf.mxu2 }
 0x14c   :  { %2221 = vmatpush.msrb.mxu3 %v1845_v32  ;;  %2176 = vmatmul.f32.vlgmr.msrb.gmra.mxu1 %v44_v31  ;;  %v1993_v50 = vpop.f32.mrf.mxu1  ;;  %v1971_v61 = vadd.f32 %v1970_v44, %v1948_v57 }
 0x14d   :  { %2222 = vmatmul.f32.vlgmr.msrb.gmra.mxu3 %v46_v34  ;;  %4437 = vmatpush.xpose.msk.msra.mxu1 %vm2271_vm0, %v2270_v23  ;;  %v2268_v34 = vld [vmem:[%s8070_s2 + $0x68] sm:$0xff]  ;;  %v6305_v23 = vmul.u32 16, %v5120_v3 }
 0x14e   :  { %v1994_v6 = vadd.f32 %v1993_v50, %v1971_v61 }
 0x14f   :  { %2156 = vmatmul.f32.gmra.mxu0 %v59_v35  ;;  %vm2658_vm1 = vcmp.ge.s32.totalorder %v5117_v2, %v6305_v23 }
 0x150   :  { %v2017_v13 = vadd.f32 %v2016_v52, %v1994_v6 }
 0x151   :  { %2202 = vmatmul.f32.gmra.mxu2 %v61_v4  ;;  %v1950_v46 = vpop.f32.mrf.mxu3  ;;  %4438 = vmatpush.xpose.msk.msra.mxu1 %vm2271_vm0, %v2269_v25 }
 0x152   :  { %v1973_v56 = vpop.f32.mrf.mxu0  ;;  %v1951_v63 = vadd.f32 %v1950_v46, %v1928_v58 }
 0x153   :  { %v2019_v0 = vpop.f32.mrf.mxu2 }
 0x154   :  { %2179 = vmatmul.f32.gmra.mxu1 %v60_v10  ;;  %v1996_v62 = vpop.f32.mrf.mxu1  ;;  %v1974_v9 = vadd.f32 %v1973_v56, %v1951_v63 }
 0x155   :  { %2225 = vmatmul.f32.gmra.mxu3 %v62_v36  ;;  %4439 = vmatpush.xpose.msk.msra.mxu1 %vm2271_vm0, %v2268_v34  ;;  %v5087_v34 = vmov 1.0  }
 0x156   :  { %v1997_v14 = vadd.f32 %v1996_v62, %v1974_v9  ;;  %v2261_v9 = vld [vmem:[%s8070_s2 + $0x30] sm:$0xff] }
 0x158   :  { %v2020_v19 = vadd.f32 %v2019_v0, %v1997_v14  ;;  %v2263_v0 = vld [vmem:[%s8070_s2 + $0x40] sm:$0xff]  ;;  %v2258_v14 = vld [vmem:[%s8070_s2 + $0x18] sm:$0xff] }
 0x159   :  { %v2039_v59 = vpop.f32.mrf.mxu3  ;;  %4440 = vmatpush.xpose.msk.msra.mxu1 %vm2271_vm0, %v2267_v37  ;;  %v2684_v37 = vadd.s32 1, %v5227_v55 }
 0x15a   :  { %v2040_v17 = vadd.f32 %v2039_v59, %v2017_v13  ;;  %v2264_v59 = vld [vmem:[%s8070_s2 + $0x48] sm:$0xff]  ;;  %v2259_v13 = vld [vmem:[%s8070_s2 + $0x20] sm:$0xff] }
 0x15d   :  { %4441 = vmatpush.xpose.msk.msra.mxu1 %vm2271_vm0, %v2266_v43 }
 0x161   :  { %v2042_v11 = vpop.f32.mrf.mxu3  ;;  %4442 = vmatpush.xpose.msk.msra.mxu1 %vm2271_vm0, %v2265_v51 }
 0x162   :  { %v2043_v28 = vadd.f32 %v2042_v11, %v2020_v19  ;;  %v2260_v11 = vld [vmem:[%s8070_s2 + $0x28] sm:$0xff]  ;;  %v2689_v19 = vadd.s32 1, %v5120_v3  ;;  %v6325_v3 = vadd.s32 128, %v5117_v2 }
 0x164   :  { %v6307_v25 = vmul.u32 16, %v2689_v19  ;;  %vm2659_vm6 = vcmp.ge.s32.totalorder %v6325_v3, %v6305_v23 }
 0x165   :  { %4443 = vmatpush.xpose.msk.msra.mxu1 %vm2271_vm0, %v2264_v59 }
 0x166   :  { %vm2946_vm2 = vcmp.lt.s32.totalorder %v5117_v2, %v6307_v25  ;;  %vm2947_vm7 = vcmp.lt.s32.totalorder %v6325_v3, %v6307_v25 }
 0x167   :  { %vm3202_vm3 = vmand %vm2658_vm1, %vm2946_vm2 }
 0x168   :  { %4713 = vmatpush.msk.msra.mxu2 %vm3202_vm3, %v5087_v34  ;;  %vm3203_vm11 = vmand %vm2659_vm6, %vm2947_vm7 }
 0x169   :  { %4444 = vmatpush.xpose.msk.msra.mxu1 %vm2271_vm0, %v2263_v0  ;;  %4729 = vmatpush.msk.msra.mxu3 %vm3203_vm11, %v5087_v34 }
 0x174   :  { %v2062_v8 = vpop.f32.mrf.mxu0 }
 0x175   :  { %v2063_v21 = vadd.f32 %v2062_v8, %v2040_v17  ;;  %v2262_v8 = vld [vmem:[%s8070_s2 + $0x38] sm:$0xff]  ;;  %v2256_v17 = vld [vmem:[%s8070_s2 + $0x8] sm:$0xff] }
 0x176   :  { %4445 = vmatpush.xpose.msk.msra.mxu1 %vm2271_vm0, %v2262_v8  ;;  %v6721_v8 = vmul.u32 16, %v5115_v1 }
 0x17a   :  { %4446 = vmatpush.xpose.msk.msra.mxu1 %vm2271_vm0, %v2261_v9 }
 0x17c   :  { %v2085_v15 = vpop.f32.mrf.mxu1  ;;  %v2108_v18 = vpop.f32.mrf.mxu2 }
 0x17d   :  { %v2086_v29 = vadd.f32 %v2085_v15, %v2063_v21  ;;  %v2257_v15 = vld [vmem:[%s8070_s2 + $0x10] sm:$0xff]  ;;  %v2688_v21 = vadd.s32 1, %v5128_v7 }
 0x17e   :  { %v2065_v22 = vpop.f32.mrf.mxu0  ;;  %4447 = vmatpush.xpose.msk.msra.mxu1 %vm2271_vm0, %v2260_v11  ;;  %v6749_v11 = vadd.s32 512, %v5117_v2 }
 0x17f   :  { %v2109_v31 = vadd.f32 %v2108_v18, %v2086_v29  ;;  %v2066_v35 = vadd.f32 %v2065_v22, %v2043_v28  ;;  %v2255_v18 = vld [vmem:[%s8070_s2] sm:$0xff]  ;;  %v2687_v22 = vadd.s32 1, %v5154_v16  ;;  %v6312_v28 = vmul.u32 16, %v2688_v21  ;;  %s5088_s2 = smov [#allocation5]  }
 0x180   :  { %v6315_v29 = vmul.u32 16, %v5154_v16  ;;  %v6331_v16 = vadd.s32 768, %v5117_v2  ;;  %s4166_s24 = sshll.u32 %s5088_s2, 4  ;;  %s4167_s24 = int_to_ptr.vmem [resolvable:$true] %s4166_s24 }
 0x181   :  { %vm2930_vm5 = vcmp.lt.s32.totalorder %v5117_v2, %v6312_v28  ;;  %vm2931_vm10 = vcmp.lt.s32.totalorder %v6325_v3, %v6312_v28 }
 0x182   :  { %4448 = vmatpush.xpose.msk.msra.mxu1 %vm2271_vm0, %v2259_v13  ;;  %vm2664_vm14 = vcmp.ge.s32.totalorder %v6331_v16, %v6305_v23  ;;  %vm2952_vm15 = vcmp.lt.s32.totalorder %v6331_v16, %v6307_v25  ;;  %vm2936_vm6 = vcmp.lt.s32.totalorder %v6331_v16, %v6312_v28  ;;  %v6757_v13 = vadd.s32 640, %v5117_v2 }
 0x183   :  { %v2131_v26 = vpop.f32.mrf.mxu3 }
 0x184   :  { %v2132_v36 = vadd.f32 %v2131_v26, %v2109_v31  ;;  %v6310_v26 = vmul.u32 16, %v5128_v7  ;;  %v6317_v31 = vmul.u32 16, %v2687_v22  ;;  %v6328_v7 = vadd.s32 256, %v5117_v2 }
 0x185   :  { %v2088_v32 = vpop.f32.mrf.mxu1 }
 0x186   :  { %v2111_v4 = vpop.f32.mrf.mxu2  ;;  %v2089_v39 = vadd.f32 %v2088_v32, %v2066_v35  ;;  %4449 = vmatpush.xpose.msk.msra.mxu1 %vm2271_vm0, %v2258_v14  ;;  %v2686_v32 = vadd.s32 1, %v5188_v33  ;;  %vm2642_vm4 = vcmp.ge.s32.totalorder %v5117_v2, %v6310_v26  ;;  %vm2643_vm9 = vcmp.ge.s32.totalorder %v6325_v3, %v6310_v26 }
 0x187   :  { %vm3186_vm8 = vmand %vm2642_vm4, %vm2930_vm5  ;;  %vm2660_vm12 = vcmp.ge.s32.totalorder %v6328_v7, %v6305_v23  ;;  %vm2948_vm13 = vcmp.lt.s32.totalorder %v6328_v7, %v6307_v25  ;;  %vm2644_vm2 = vcmp.ge.s32.totalorder %v6328_v7, %v6310_v26  ;;  %vm2932_vm3 = vcmp.lt.s32.totalorder %v6328_v7, %v6312_v28 }
 0x188   :  { %v2112_v12 = vadd.f32 %v2111_v4, %v2089_v39  ;;  %vm3204_vm1 = vmand %vm2660_vm12, %vm2948_vm13  ;;  %4714 = vmatpush.msk.msra.mxu2 %vm3186_vm8, %v5087_v34  ;;  %v6361_v35 = vmul.u32 16, %v5188_v33  ;;  %vm2648_vm5 = vcmp.ge.s32.totalorder %v6331_v16, %v6310_v26  ;;  %v6368_v4 = vmul.u32 16, %v2686_v32 }
 0x189   :  { %4745 = vmatpush.msk.msrb.mxu0 %vm3204_vm1, %v5087_v34  ;;  %vm3208_vm4 = vmand %vm2664_vm14, %vm2952_vm15  ;;  %vm2626_vm8 = vcmp.ge.s32.totalorder %v5117_v2, %v6315_v29  ;;  %vm2914_vm11 = vcmp.lt.s32.totalorder %v5117_v2, %v6317_v31  ;;  %vm2627_vm13 = vcmp.ge.s32.totalorder %v6325_v3, %v6315_v29  ;;  %vm2915_vm14 = vcmp.lt.s32.totalorder %v6325_v3, %v6317_v31 }
 0x18a   :  { %4450 = vmatpush.xpose.msk.msra.mxu1 %vm2271_vm0, %v2257_v15  ;;  %vm3187_vm7 = vmand %vm2643_vm9, %vm2931_vm10  ;;  %vm2628_vm9 = vcmp.ge.s32.totalorder %v6328_v7, %v6315_v29  ;;  %vm2916_vm10 = vcmp.lt.s32.totalorder %v6328_v7, %v6317_v31  ;;  %v6393_v33 = vmul.u32 16, %v5195_v38  ;;  %v6426_v39 = vmul.u32 16, %v2684_v37 }
 0x18b   :  { %4730 = vmatpush.msk.msra.mxu3 %vm3187_vm7, %v5087_v34  ;;  %vm3188_vm12 = vmand %vm2644_vm2, %vm2932_vm3  ;;  %vm2632_vm2 = vcmp.ge.s32.totalorder %v6331_v16, %v6315_v29  ;;  %vm2920_vm3 = vcmp.lt.s32.totalorder %v6331_v16, %v6317_v31  ;;  %v6770_v14 = vadd.s32 1280, %v5117_v2  ;;  %v7100_v37 = vadd.s32 896, %v5117_v2 }
 0x18c   :  { %4746 = vmatpush.msk.msrb.mxu0 %vm3188_vm12, %v5087_v34  ;;  %vm3192_vm15 = vmand %vm2648_vm5, %vm2936_vm6  ;;  %vm2610_vm5 = vcmp.ge.s32.totalorder %v5117_v2, %v6361_v35  ;;  %vm2898_vm6 = vcmp.lt.s32.totalorder %v5117_v2, %v6368_v4 }
 0x18d   :  { %v2134_v41 = vpop.f32.mrf.mxu3  ;;  %vm3170_vm1 = vmand %vm2626_vm8, %vm2914_vm11  ;;  %vm2611_vm8 = vcmp.ge.s32.totalorder %v6325_v3, %v6361_v35  ;;  %vm2899_vm11 = vcmp.lt.s32.totalorder %v6325_v3, %v6368_v4 }
 0x18e   :  { %v2135_v48 = vadd.f32 %v2134_v41, %v2112_v12  ;;  %4451 = vmatpush.xpose.msk.msra.mxu1 %vm2271_vm0, %v2256_v17  ;;  %4715 = vmatpush.msk.msra.mxu2 %vm3170_vm1, %v5087_v34  ;;  %vm3172_vm7 = vmand %vm2628_vm9, %vm2916_vm10  ;;  %vm2616_vm9 = vcmp.ge.s32.totalorder %v6331_v16, %v6361_v35  ;;  %vm2904_vm10 = vcmp.lt.s32.totalorder %v6331_v16, %v6368_v4  ;;  %v6451_v41 = vmul.u32 16, %v5234_v60 }
 0x18f   :  { %4747 = vmatpush.msk.msrb.mxu0 %vm3172_vm7, %v5087_v34  ;;  %vm3176_vm12 = vmand %vm2632_vm2, %vm2920_vm3  ;;  %vm2594_vm2 = vcmp.ge.s32.totalorder %v5117_v2, %v6393_v33 }
 0x190   :  { %vm3155_vm1 = vmand %vm2611_vm8, %vm2899_vm11  ;;  %vm2596_vm8 = vcmp.ge.s32.totalorder %v6328_v7, %v6393_v33 }
 0x191   :  { %vm3160_vm7 = vmand %vm2616_vm9, %vm2904_vm10  ;;  %vm2866_vm10 = vcmp.lt.s32.totalorder %v5117_v2, %v6426_v39 }
 0x192   :  { %4452 = vmatpush.xpose.msk.msra.mxu1 %vm2271_vm0, %v2255_v18 }
 0x196   :  { %4809 = vmatpush.msk.msrb.mxu1 %vm3208_vm4, %v5087_v34  ;;  %vm3171_vm4 = vmand %vm2627_vm13, %vm2915_vm14  ;;  %vm2612_vm13 = vcmp.ge.s32.totalorder %v6328_v7, %v6361_v35  ;;  %vm2900_vm14 = vcmp.lt.s32.totalorder %v6328_v7, %v6368_v4 }
 0x197   :  { %4731 = vmatpush.msk.msra.mxu3 %vm3171_vm4, %v5087_v34  ;;  %vm3156_vm4 = vmand %vm2612_vm13, %vm2900_vm14  ;;  %vm2600_vm13 = vcmp.ge.s32.totalorder %v6331_v16, %v6393_v33 }
 0x198   :  { %4810 = vmatpush.msk.msrb.mxu1 %vm3192_vm15, %v5087_v34  ;;  %vm3154_vm15 = vmand %vm2610_vm5, %vm2898_vm6  ;;  %vm2595_vm5 = vcmp.ge.s32.totalorder %v6325_v3, %v6393_v33  ;;  %4748 = vmatpush.msk.msrb.mxu0 %vm3156_vm4, %v5087_v34 }
 0x199   :  { %4716 = vmatpush.msk.msra.mxu2 %vm3154_vm15, %v5087_v34  ;;  %4732 = vmatpush.msk.msra.mxu3 %vm3155_vm1, %v5087_v34 }
 0x19a   :  { %4811 = vmatpush.msk.msrb.mxu1 %vm3176_vm12, %v5087_v34 }
 0x19c   :  { %4812 = vmatpush.msk.msrb.mxu1 %vm3160_vm7, %v5087_v34 }
 0x1c4   :  { %v2154_v10 = vpop.f32.mrf.mxu0 }
 0x1c5   :  { %v2155_v40 = vadd.f32 %v2154_v10, %v2132_v36  ;;  %v2685_v10 = vadd.s32 1, %v5195_v38  ;;  %v6419_v38 = vmul.u32 16, %v5227_v55  ;;  %v2682_v55 = vadd.s32 1, %v5268_v24 }
 0x1c7   :  { %v6400_v36 = vmul.u32 16, %v2685_v10  ;;  %vm2578_vm9 = vcmp.ge.s32.totalorder %v5117_v2, %v6419_v38  ;;  %v8102_v10 = vmov 0 }
 0x1c8   :  { %vm3122_vm7 = vmand %vm2578_vm9, %vm2866_vm10  ;;  %vm2563_vm9 = vcmp.ge.s32.totalorder %v6325_v3, %v6451_v41 }
 0x1c9   :  { %v2177_v42 = vpop.f32.mrf.mxu1  ;;  %vm2882_vm3 = vcmp.lt.s32.totalorder %v5117_v2, %v6400_v36  ;;  %vm2883_vm6 = vcmp.lt.s32.totalorder %v6325_v3, %v6400_v36  ;;  %vm2884_vm11 = vcmp.lt.s32.totalorder %v6328_v7, %v6400_v36  ;;  %vm2888_vm14 = vcmp.lt.s32.totalorder %v6331_v16, %v6400_v36 }
 0x1ca   :  { %v2178_v44 = vadd.f32 %v2177_v42, %v2155_v40  ;;  %v2683_v40 = vadd.s32 1, %v5234_v60  ;;  %vm3138_vm12 = vmand %vm2594_vm2, %vm2882_vm3  ;;  %vm2579_vm2 = vcmp.ge.s32.totalorder %v6325_v3, %v6419_v38  ;;  %vm2867_vm3 = vcmp.lt.s32.totalorder %v6325_v3, %v6426_v39 }
 0x1cb   :  { %4717 = vmatpush.msk.msra.mxu2 %vm3138_vm12, %v5087_v34  ;;  %vm3139_vm15 = vmand %vm2595_vm5, %vm2883_vm6  ;;  %vm2580_vm5 = vcmp.ge.s32.totalorder %v6328_v7, %v6419_v38  ;;  %vm2868_vm6 = vcmp.lt.s32.totalorder %v6328_v7, %v6426_v39  ;;  %v6471_v60 = vmul.u32 16, %v5268_v24  ;;  %v6473_v42 = vmul.u32 16, %v2682_v55 }
 0x1cc   :  { %v2200_v45 = vpop.f32.mrf.mxu2  ;;  %v2157_v46 = vpop.f32.mrf.mxu0  ;;  %v6453_v12 = vmul.u32 16, %v2683_v40  ;;  %4733 = vmatpush.msk.msra.mxu3 %vm3139_vm15, %v5087_v34  ;;  %vm3140_vm1 = vmand %vm2596_vm8, %vm2884_vm11  ;;  %vm2584_vm8 = vcmp.ge.s32.totalorder %v6331_v16, %v6419_v38  ;;  %vm2872_vm11 = vcmp.lt.s32.totalorder %v6331_v16, %v6426_v39  ;;  %v2680_v24 = vadd.s32 1, %v5307_v49 }
 0x1cd   :  { %v2201_v50 = vadd.f32 %v2200_v45, %v2178_v44  ;;  %v2158_v52 = vadd.f32 %v2157_v46, %v2135_v48  ;;  %4749 = vmatpush.msk.msrb.mxu0 %vm3140_vm1, %v5087_v34  ;;  %vm3144_vm4 = vmand %vm2600_vm13, %vm2888_vm14  ;;  %v2681_v44 = vadd.s32 1, %v5275_v30  ;;  %4718 = vmatpush.msk.msra.mxu2 %vm3122_vm7, %v5087_v34  ;;  %vm2562_vm13 = vcmp.ge.s32.totalorder %v5117_v2, %v6451_v41 }
 0x1ce   :  { %4813 = vmatpush.msk.msrb.mxu1 %vm3144_vm4, %v5087_v34  ;;  %vm3123_vm12 = vmand %vm2579_vm2, %vm2867_vm3  ;;  %vm2850_vm14 = vcmp.lt.s32.totalorder %v5117_v2, %v6453_v12  ;;  %vm2851_vm10 = vcmp.lt.s32.totalorder %v6325_v3, %v6453_v12  ;;  %vm2564_vm2 = vcmp.ge.s32.totalorder %v6328_v7, %v6451_v41  ;;  %vm2852_vm3 = vcmp.lt.s32.totalorder %v6328_v7, %v6453_v12 }
 0x1cf   :  { %4734 = vmatpush.msk.msra.mxu3 %vm3123_vm12, %v5087_v34  ;;  %vm3124_vm15 = vmand %vm2580_vm5, %vm2868_vm6  ;;  %vm2568_vm5 = vcmp.ge.s32.totalorder %v6331_v16, %v6451_v41  ;;  %vm2856_vm6 = vcmp.lt.s32.totalorder %v6331_v16, %v6453_v12  ;;  %v6516_v46 = vmul.u32 16, %v5275_v30  ;;  %v6518_v48 = vmul.u32 16, %v2681_v44 }
 0x1d0   :  { %v2223_v56 = vpop.f32.mrf.mxu3  ;;  %4750 = vmatpush.msk.msrb.mxu0 %vm3124_vm15, %v5087_v34  ;;  %vm3128_vm1 = vmand %vm2584_vm8, %vm2872_vm11  ;;  %vm2546_vm8 = vcmp.ge.s32.totalorder %v5117_v2, %v6471_v60  ;;  %vm2834_vm11 = vcmp.lt.s32.totalorder %v5117_v2, %v6473_v42  ;;  %v6539_v30 = vmul.u32 16, %v5307_v49  ;;  %v6578_v49 = vmul.u32 16, %v5314_v54 }
 0x1d1   :  { %v2224_v57 = vadd.f32 %v2223_v56, %v2201_v50  ;;  %v2180_v58 = vpop.f32.mrf.mxu1  ;;  %4814 = vmatpush.msk.msrb.mxu1 %vm3128_vm1, %v5087_v34  ;;  %vm3106_vm4 = vmand %vm2562_vm13, %vm2850_vm14  ;;  %vm2547_vm13 = vcmp.ge.s32.totalorder %v6325_v3, %v6471_v60  ;;  %vm2835_vm14 = vcmp.lt.s32.totalorder %v6325_v3, %v6473_v42  ;;  %v6541_v50 = vmul.u32 16, %v2680_v24 }
 0x1d2   :  { %v2181_v61 = vadd.f32 %v2180_v58, %v2158_v52  ;;  %4719 = vmatpush.msk.msra.mxu2 %vm3106_vm4, %v5087_v34  ;;  %vm3107_vm7 = vmand %vm2563_vm9, %vm2851_vm10  ;;  %vm2548_vm9 = vcmp.ge.s32.totalorder %v6328_v7, %v6471_v60  ;;  %vm2836_vm10 = vcmp.lt.s32.totalorder %v6328_v7, %v6473_v42  ;;  %v2679_v52 = vadd.s32 1, %v5314_v54 }
 0x1d3   :  { %2246 = vmatmul.f32.vlgmr.msra.gmra.mxu0 %v2224_v57  ;;  %4735 = vmatpush.msk.msra.mxu3 %vm3107_vm7, %v5087_v34  ;;  %vm3108_vm12 = vmand %vm2564_vm2, %vm2852_vm3  ;;  %vm2552_vm2 = vcmp.ge.s32.totalorder %v6331_v16, %v6471_v60  ;;  %vm2840_vm3 = vcmp.lt.s32.totalorder %v6331_v16, %v6473_v42  ;;  %v2678_v58 = vadd.s32 1, %v5348_v20  ;;  %v6607_v54 = vmul.u32 16, %v5348_v20 }
 0x1d4   :  { %v2203_v62 = vpop.f32.mrf.mxu2  ;;  %4751 = vmatpush.msk.msrb.mxu0 %vm3108_vm12, %v5087_v34  ;;  %vm3112_vm15 = vmand %vm2568_vm5, %vm2856_vm6  ;;  %vm2530_vm5 = vcmp.ge.s32.totalorder %v5117_v2, %v6516_v46  ;;  %vm2818_vm6 = vcmp.lt.s32.totalorder %v5117_v2, %v6518_v48  ;;  %v6585_v57 = vmul.u32 16, %v2679_v52  ;;  %v6633_v20 = vmul.u32 16, %v5355_v27 }
 0x1d5   :  { %v2204_v63 = vadd.f32 %v2203_v62, %v2181_v61  ;;  %4815 = vmatpush.msk.msrb.mxu1 %vm3112_vm15, %v5087_v34  ;;  %vm3090_vm1 = vmand %vm2546_vm8, %vm2834_vm11  ;;  %vm2531_vm8 = vcmp.ge.s32.totalorder %v6325_v3, %v6516_v46  ;;  %vm2819_vm11 = vcmp.lt.s32.totalorder %v6325_v3, %v6518_v48  ;;  %v6614_v59 = vmul.u32 16, %v2678_v58 }
 0x1d6   :  { %4720 = vmatpush.msk.msra.mxu2 %vm3090_vm1, %v5087_v34  ;;  %vm3091_vm4 = vmand %vm2547_vm13, %vm2835_vm14  ;;  %vm2532_vm13 = vcmp.ge.s32.totalorder %v6328_v7, %v6516_v46  ;;  %vm2820_vm14 = vcmp.lt.s32.totalorder %v6328_v7, %v6518_v48  ;;  %vm2514_vm1 = vcmp.ge.s32.totalorder %v5117_v2, %v6539_v30  ;;  %v2677_v61 = vadd.s32 1, %v5355_v27 }
 0x1d7   :  { %4736 = vmatpush.msk.msra.mxu3 %vm3091_vm4, %v5087_v34  ;;  %vm3092_vm7 = vmand %vm2548_vm9, %vm2836_vm10  ;;  %vm2536_vm9 = vcmp.ge.s32.totalorder %v6331_v16, %v6516_v46  ;;  %vm2515_vm4 = vcmp.ge.s32.totalorder %v6325_v3, %v6539_v30  ;;  %v6659_v27 = vmul.u32 16, %v5387_v47  ;;  %v7113_v55 = vadd.s32 1024, %v5117_v2 }
 0x1d8   :  { %v2226_v5 = vpop.f32.mrf.mxu3  ;;  %4752 = vmatpush.msk.msrb.mxu0 %vm3092_vm7, %v5087_v34  ;;  %vm3096_vm12 = vmand %vm2552_vm2, %vm2840_vm3  ;;  %vm2802_vm2 = vcmp.lt.s32.totalorder %v5117_v2, %v6541_v50  ;;  %vm2516_vm7 = vcmp.ge.s32.totalorder %v6328_v7, %v6539_v30  ;;  %v6640_v62 = vmul.u32 16, %v2677_v61  ;;  %v7160_v52 = vadd.s32 1792, %v5117_v2 }
 0x1d9   :  { %v2227_v6 = vadd.f32 %v2226_v5, %v2204_v63  ;;  %4816 = vmatpush.msk.msrb.mxu1 %vm3096_vm12, %v5087_v34  ;;  %vm3074_vm15 = vmand %vm2530_vm5, %vm2818_vm6  ;;  %vm2803_vm5 = vcmp.lt.s32.totalorder %v6325_v3, %v6541_v50  ;;  %vm2520_vm12 = vcmp.ge.s32.totalorder %v6331_v16, %v6539_v30  ;;  %v2676_v63 = vadd.s32 1, %v5387_v47 }
 0x1da   :  { %4721 = vmatpush.msk.msra.mxu2 %vm3074_vm15, %v5087_v34  ;;  %vm3075_vm10 = vmand %vm2531_vm8, %vm2819_vm11  ;;  %vm2804_vm8 = vcmp.lt.s32.totalorder %v6328_v7, %v6541_v50  ;;  %vm2498_vm15 = vcmp.ge.s32.totalorder %v5117_v2, %v6578_v49  ;;  %v2675_v5 = vadd.s32 1, %v5394_v53  ;;  %v6685_v47 = vmul.u32 16, %v5394_v53 }
 0x1db   :  { %2249 = vmatmul.f32.gmra.mxu0 %v2227_v6  ;;  %4737 = vmatpush.msk.msra.mxu3 %vm3075_vm10, %v5087_v34  ;;  %vm3076_vm3 = vmand %vm2532_vm13, %vm2820_vm14  ;;  %vm2808_vm13 = vcmp.lt.s32.totalorder %v6331_v16, %v6541_v50  ;;  %vm2499_vm10 = vcmp.ge.s32.totalorder %v6325_v3, %v6578_v49  ;;  %v6666_v0 = vmul.u32 16, %v2676_v63  ;;  %v2674_v53 = vadd.s32 1, %v5115_v1 }
 0x1dc   :  { %4753 = vmatpush.msk.msrb.mxu0 %vm3076_vm3, %v5087_v34  ;;  %vm3058_vm11 = vmand %vm2514_vm1, %vm2802_vm2  ;;  %vm2787_vm1 = vcmp.lt.s32.totalorder %v6325_v3, %v6585_v57  ;;  %vm2500_vm3 = vcmp.ge.s32.totalorder %v6328_v7, %v6578_v49  ;;  %v6692_v6 = vmul.u32 16, %v2675_v5  ;;  %v6741_v1 = vadd.s32 384, %v5117_v2 }
 0x1dd   :  { %4722 = vmatpush.msk.msra.mxu2 %vm3058_vm11, %v5087_v34  ;;  %vm3059_vm14 = vmand %vm2515_vm4, %vm2803_vm5  ;;  %vm2788_vm4 = vcmp.lt.s32.totalorder %v6328_v7, %v6585_v57  ;;  %vm2482_vm11 = vcmp.ge.s32.totalorder %v5117_v2, %v6607_v54  ;;  %v6723_v9 = vmul.u32 16, %v2674_v53  ;;  %v7636_v5 = vadd.s32 1536, %v5117_v2 }
 0x1de   :  { %4738 = vmatpush.msk.msra.mxu3 %vm3059_vm14, %v5087_v34  ;;  %vm3064_vm2 = vmand %vm2520_vm12, %vm2808_vm13  ;;  %vm2770_vm12 = vcmp.lt.s32.totalorder %v5117_v2, %v6614_v59  ;;  %vm2483_vm14 = vcmp.ge.s32.totalorder %v6325_v3, %v6607_v54 }
 0x1df   :  { %vm3044_vm13 = vmand %vm2500_vm3, %vm2788_vm4  ;;  %vm2776_vm3 = vcmp.lt.s32.totalorder %v6331_v16, %v6614_v59 }
 0x250   :  { %v2247_v43 = vpop.f32.mrf.mxu0 }
 0x251   :  { %v2253_v45 = vmax.f32 %v2247_v43, 0.0 }
 0x253   :  { %4453 = vmatmul.msk.f32.vlgmr.msra.gmra.mxu1 %vm2271_vm0, %v2253_v45  ;;  %v7127_v45 = vadd.s32 1152, %v5117_v2 }
 0x258   :  { %v2250_v51 = vpop.f32.mrf.mxu0 }
 0x259   :  { %v2254_v56 = vmax.f32 %v2250_v51, 0.0 }
 0x25b   :  { %4454 = vmatmul.msk.f32.gmra.mxu1 %vm2271_vm0, %v2254_v56  ;;  %vm2824_vm0 = vcmp.lt.s32.totalorder %v6331_v16, %v6518_v48 }
 0x25c   :  { %vm3080_vm6 = vmand %vm2536_vm9, %vm2824_vm0  ;;  %vm2786_vm9 = vcmp.lt.s32.totalorder %v5117_v2, %v6585_v57 }
 0x25d   :  { %4817 = vmatpush.msk.msrb.mxu1 %vm3080_vm6, %v5087_v34  ;;  %vm3060_vm0 = vmand %vm2516_vm7, %vm2804_vm8  ;;  %vm2504_vm6 = vcmp.ge.s32.totalorder %v6331_v16, %v6578_v49  ;;  %vm2792_vm7 = vcmp.lt.s32.totalorder %v6331_v16, %v6585_v57 }
 0x25e   :  { %4754 = vmatpush.msk.msrb.mxu0 %vm3060_vm0, %v5087_v34  ;;  %vm3042_vm5 = vmand %vm2498_vm15, %vm2786_vm9  ;;  %vm2771_vm15 = vcmp.lt.s32.totalorder %v6325_v3, %v6614_v59  ;;  %vm2484_vm0 = vcmp.ge.s32.totalorder %v6328_v7, %v6607_v54 }
 0x25f   :  { %4818 = vmatpush.msk.msrb.mxu1 %vm3064_vm2, %v5087_v34  ;;  %4723 = vmatpush.msk.msra.mxu2 %vm3042_vm5, %v5087_v34  ;;  %vm3043_vm8 = vmand %vm2499_vm10, %vm2787_vm1  ;;  %vm2772_vm10 = vcmp.lt.s32.totalorder %v6328_v7, %v6614_v59  ;;  %vm2488_vm2 = vcmp.ge.s32.totalorder %v6331_v16, %v6607_v54  ;;  %vm2466_vm5 = vcmp.ge.s32.totalorder %v5117_v2, %v6633_v20 }
 0x260   :  { %4739 = vmatpush.msk.msra.mxu3 %vm3043_vm8, %v5087_v34  ;;  %4755 = vmatpush.msk.msrb.mxu0 %vm3044_vm13, %v5087_v34  ;;  %vm3048_vm9 = vmand %vm2504_vm6, %vm2792_vm7  ;;  %vm2754_vm6 = vcmp.lt.s32.totalorder %v5117_v2, %v6640_v62  ;;  %vm2467_vm8 = vcmp.ge.s32.totalorder %v6325_v3, %v6633_v20  ;;  %vm2468_vm13 = vcmp.ge.s32.totalorder %v6328_v7, %v6633_v20 }
 0x261   :  { %4819 = vmatpush.msk.msrb.mxu1 %vm3048_vm9, %v5087_v34  ;;  %vm3026_vm1 = vmand %vm2482_vm11, %vm2770_vm12  ;;  %vm2755_vm11 = vcmp.lt.s32.totalorder %v6325_v3, %v6640_v62  ;;  %vm2472_vm9 = vcmp.ge.s32.totalorder %v6331_v16, %v6633_v20 }
 0x262   :  { %4724 = vmatpush.msk.msra.mxu2 %vm3026_vm1, %v5087_v34  ;;  %vm3027_vm4 = vmand %vm2483_vm14, %vm2771_vm15  ;;  %vm2756_vm14 = vcmp.lt.s32.totalorder %v6328_v7, %v6640_v62  ;;  %vm2450_vm1 = vcmp.ge.s32.totalorder %v5117_v2, %v6659_v27 }
 0x263   :  { %4740 = vmatpush.msk.msra.mxu3 %vm3027_vm4, %v5087_v34  ;;  %vm3028_vm7 = vmand %vm2484_vm0, %vm2772_vm10  ;;  %vm2760_vm0 = vcmp.lt.s32.totalorder %v6331_v16, %v6640_v62  ;;  %vm2451_vm4 = vcmp.ge.s32.totalorder %v6325_v3, %v6659_v27 }
 0x264   :  { %4756 = vmatpush.msk.msrb.mxu0 %vm3028_vm7, %v5087_v34  ;;  %vm3032_vm12 = vmand %vm2488_vm2, %vm2776_vm3  ;;  %vm2738_vm2 = vcmp.lt.s32.totalorder %v5117_v2, %v6666_v0  ;;  %vm2452_vm7 = vcmp.ge.s32.totalorder %v6328_v7, %v6659_v27 }
 0x265   :  { %4820 = vmatpush.msk.msrb.mxu1 %vm3032_vm12, %v5087_v34  ;;  %vm3010_vm15 = vmand %vm2466_vm5, %vm2754_vm6  ;;  %vm2739_vm5 = vcmp.lt.s32.totalorder %v6325_v3, %v6666_v0  ;;  %vm2456_vm12 = vcmp.ge.s32.totalorder %v6331_v16, %v6659_v27 }
 0x266   :  { %4725 = vmatpush.msk.msra.mxu2 %vm3010_vm15, %v5087_v34  ;;  %vm3011_vm10 = vmand %vm2467_vm8, %vm2755_vm11  ;;  %vm2740_vm8 = vcmp.lt.s32.totalorder %v6328_v7, %v6666_v0  ;;  %vm2434_vm15 = vcmp.ge.s32.totalorder %v5117_v2, %v6685_v47 }
 0x267   :  { %4741 = vmatpush.msk.msra.mxu3 %vm3011_vm10, %v5087_v34  ;;  %vm3012_vm3 = vmand %vm2468_vm13, %vm2756_vm14  ;;  %vm2744_vm13 = vcmp.lt.s32.totalorder %v6331_v16, %v6666_v0  ;;  %vm2435_vm10 = vcmp.ge.s32.totalorder %v6325_v3, %v6685_v47 }
 0x268   :  { %4757 = vmatpush.msk.msrb.mxu0 %vm3012_vm3, %v5087_v34  ;;  %vm3016_vm6 = vmand %vm2472_vm9, %vm2760_vm0  ;;  %vm2722_vm9 = vcmp.lt.s32.totalorder %v5117_v2, %v6692_v6  ;;  %vm2436_vm3 = vcmp.ge.s32.totalorder %v6328_v7, %v6685_v47 }
 0x269   :  { %4821 = vmatpush.msk.msrb.mxu1 %vm3016_vm6, %v5087_v34  ;;  %vm2994_vm11 = vmand %vm2450_vm1, %vm2738_vm2  ;;  %vm2723_vm1 = vcmp.lt.s32.totalorder %v6325_v3, %v6692_v6  ;;  %vm2440_vm6 = vcmp.ge.s32.totalorder %v6331_v16, %v6685_v47 }
 0x26a   :  { %4726 = vmatpush.msk.msra.mxu2 %vm2994_vm11, %v5087_v34  ;;  %vm2995_vm14 = vmand %vm2451_vm4, %vm2739_vm5  ;;  %vm2724_vm4 = vcmp.lt.s32.totalorder %v6328_v7, %v6692_v6  ;;  %vm2418_vm11 = vcmp.ge.s32.totalorder %v5117_v2, %v6721_v8 }
 0x26b   :  { %4742 = vmatpush.msk.msra.mxu3 %vm2995_vm14, %v5087_v34  ;;  %vm2996_vm0 = vmand %vm2452_vm7, %vm2740_vm8  ;;  %vm2728_vm7 = vcmp.lt.s32.totalorder %v6331_v16, %v6692_v6  ;;  %vm2419_vm14 = vcmp.ge.s32.totalorder %v6325_v3, %v6721_v8 }
 0x26c   :  { %4758 = vmatpush.msk.msrb.mxu0 %vm2996_vm0, %v5087_v34  ;;  %vm3000_vm2 = vmand %vm2456_vm12, %vm2744_vm13  ;;  %vm2706_vm12 = vcmp.lt.s32.totalorder %v5117_v2, %v6723_v9  ;;  %vm2420_vm0 = vcmp.ge.s32.totalorder %v6328_v7, %v6721_v8 }
 0x26d   :  { %4822 = vmatpush.msk.msrb.mxu1 %vm3000_vm2, %v5087_v34  ;;  %vm2978_vm5 = vmand %vm2434_vm15, %vm2722_vm9  ;;  %vm2707_vm15 = vcmp.lt.s32.totalorder %v6325_v3, %v6723_v9  ;;  %vm2661_vm2 = vcmp.ge.s32.totalorder %v6741_v1, %v6305_v23 }
 0x26e   :  { %4727 = vmatpush.msk.msra.mxu2 %vm2978_vm5, %v5087_v34  ;;  %vm2979_vm8 = vmand %vm2435_vm10, %vm2723_vm1  ;;  %vm2708_vm10 = vcmp.lt.s32.totalorder %v6328_v7, %v6723_v9  ;;  %vm2662_vm5 = vcmp.ge.s32.totalorder %v6749_v11, %v6305_v23 }
 0x26f   :  { %4743 = vmatpush.msk.msra.mxu3 %vm2979_vm8, %v5087_v34  ;;  %vm2980_vm13 = vmand %vm2436_vm3, %vm2724_vm4  ;;  %vm2949_vm3 = vcmp.lt.s32.totalorder %v6741_v1, %v6307_v25  ;;  %vm2663_vm8 = vcmp.ge.s32.totalorder %v6757_v13, %v6305_v23 }
 0x270   :  { %4759 = vmatpush.msk.msrb.mxu0 %vm2980_vm13, %v5087_v34  ;;  %vm2984_vm9 = vmand %vm2440_vm6, %vm2728_vm7  ;;  %vm2950_vm6 = vcmp.lt.s32.totalorder %v6749_v11, %v6307_v25  ;;  %vm2424_vm13 = vcmp.ge.s32.totalorder %v6331_v16, %v6721_v8 }
 0x271   :  { %4823 = vmatpush.msk.msrb.mxu1 %vm2984_vm9, %v5087_v34  ;;  %vm2962_vm1 = vmand %vm2418_vm11, %vm2706_vm12  ;;  %vm2951_vm11 = vcmp.lt.s32.totalorder %v6757_v13, %v6307_v25  ;;  %vm2668_vm9 = vcmp.ge.s32.totalorder %v6770_v14, %v6305_v23 }
 0x272   :  { %4728 = vmatpush.msk.msra.mxu2 %vm2962_vm1, %v5087_v34  ;;  %vm2963_vm4 = vmand %vm2419_vm14, %vm2707_vm15  ;;  %vm2712_vm14 = vcmp.lt.s32.totalorder %v6331_v16, %v6723_v9 }
 0x273   :  { %4744 = vmatpush.msk.msra.mxu3 %vm2963_vm4, %v5087_v34  ;;  %vm2964_vm7 = vmand %vm2420_vm0, %vm2708_vm10  ;;  %vm2956_vm0 = vcmp.lt.s32.totalorder %v6770_v14, %v6307_v25  ;;  %vm2933_vm4 = vcmp.lt.s32.totalorder %v6741_v1, %v6312_v28 }
 0x274   :  { %4760 = vmatpush.msk.msrb.mxu0 %vm2964_vm7, %v5087_v34  ;;  %vm3205_vm12 = vmand %vm2661_vm2, %vm2949_vm3  ;;  %vm2645_vm3 = vcmp.ge.s32.totalorder %v6741_v1, %v6310_v26 }
 0x275   :  { %4761 = vmatpush.msk.msrb.mxu2 %vm3205_vm12, %v5087_v34  ;;  %vm3206_vm15 = vmand %vm2662_vm5, %vm2950_vm6  ;;  %vm2646_vm5 = vcmp.ge.s32.totalorder %v6749_v11, %v6310_v26  ;;  %vm2934_vm6 = vcmp.lt.s32.totalorder %v6749_v11, %v6312_v28  ;;  %vm2652_vm12 = vcmp.ge.s32.totalorder %v6770_v14, %v6310_v26 }
 0x276   :  { %4777 = vmatpush.msk.msrb.mxu3 %vm3206_vm15, %v5087_v34  ;;  %vm3207_vm10 = vmand %vm2663_vm8, %vm2951_vm11  ;;  %vm2647_vm8 = vcmp.ge.s32.totalorder %v6757_v13, %v6310_v26  ;;  %vm2935_vm11 = vcmp.lt.s32.totalorder %v6757_v13, %v6312_v28  ;;  %vm2629_vm15 = vcmp.ge.s32.totalorder %v6741_v1, %v6315_v29 }
 0x277   :  { %4793 = vmatpush.msk.msra.mxu0 %vm3207_vm10, %v5087_v34  ;;  %vm2968_vm1 = vmand %vm2424_vm13, %vm2712_vm14  ;;  %vm2940_vm13 = vcmp.lt.s32.totalorder %v6770_v14, %v6312_v28  ;;  %vm2630_vm10 = vcmp.ge.s32.totalorder %v6749_v11, %v6315_v29 }
 0x278   :  { %4824 = vmatpush.msk.msrb.mxu1 %vm2968_vm1, %v5087_v34  ;;  %vm3212_vm2 = vmand %vm2668_vm9, %vm2956_vm0  ;;  %vm2917_vm9 = vcmp.lt.s32.totalorder %v6741_v1, %v6317_v31  ;;  %vm2918_vm1 = vcmp.lt.s32.totalorder %v6749_v11, %v6317_v31 }
 0x279   :  { %vm3189_vm7 = vmand %vm2645_vm3, %vm2933_vm4  ;;  %vm2631_vm3 = vcmp.ge.s32.totalorder %v6757_v13, %v6315_v29  ;;  %vm2919_vm4 = vcmp.lt.s32.totalorder %v6757_v13, %v6317_v31 }
 0x27a   :  { %4873 = vmatpush.msk.msra.mxu1 %vm3212_vm2, %v5087_v34  ;;  %4762 = vmatpush.msk.msrb.mxu2 %vm3189_vm7, %v5087_v34  ;;  %vm3190_vm14 = vmand %vm2646_vm5, %vm2934_vm6  ;;  %vm2636_vm6 = vcmp.ge.s32.totalorder %v6770_v14, %v6315_v29  ;;  %vm2924_vm7 = vcmp.lt.s32.totalorder %v6770_v14, %v6317_v31 }
 0x27b   :  { %4778 = vmatpush.msk.msrb.mxu3 %vm3190_vm14, %v5087_v34  ;;  %vm3191_vm0 = vmand %vm2647_vm8, %vm2935_vm11  ;;  %vm2613_vm11 = vcmp.ge.s32.totalorder %v6741_v1, %v6361_v35  ;;  %vm2614_vm14 = vcmp.ge.s32.totalorder %v6749_v11, %v6361_v35 }
 0x27c   :  { %4794 = vmatpush.msk.msra.mxu0 %vm3191_vm0, %v5087_v34  ;;  %vm3196_vm2 = vmand %vm2652_vm12, %vm2940_vm13  ;;  %vm2901_vm12 = vcmp.lt.s32.totalorder %v6741_v1, %v6368_v4  ;;  %vm2615_vm0 = vcmp.ge.s32.totalorder %v6757_v13, %v6361_v35 }
 0x27d   :  { %4874 = vmatpush.msk.msra.mxu1 %vm3196_vm2, %v5087_v34  ;;  %vm3173_vm5 = vmand %vm2629_vm15, %vm2917_vm9  ;;  %vm2902_vm15 = vcmp.lt.s32.totalorder %v6749_v11, %v6368_v4  ;;  %vm2620_vm2 = vcmp.ge.s32.totalorder %v6770_v14, %v6361_v35 }
 0x27e   :  { %4763 = vmatpush.msk.msrb.mxu2 %vm3173_vm5, %v5087_v34  ;;  %vm3174_vm8 = vmand %vm2630_vm10, %vm2918_vm1  ;;  %vm2903_vm10 = vcmp.lt.s32.totalorder %v6757_v13, %v6368_v4  ;;  %vm2597_vm5 = vcmp.ge.s32.totalorder %v6741_v1, %v6393_v33 }
 0x27f   :  { %4779 = vmatpush.msk.msrb.mxu3 %vm3174_vm8, %v5087_v34  ;;  %vm3175_vm13 = vmand %vm2631_vm3, %vm2919_vm4  ;;  %vm2908_vm3 = vcmp.lt.s32.totalorder %v6770_v14, %v6368_v4  ;;  %vm2598_vm8 = vcmp.ge.s32.totalorder %v6749_v11, %v6393_v33 }
 0x280   :  { %4795 = vmatpush.msk.msra.mxu0 %vm3175_vm13, %v5087_v34  ;;  %vm3180_vm9 = vmand %vm2636_vm6, %vm2924_vm7  ;;  %vm2885_vm6 = vcmp.lt.s32.totalorder %v6741_v1, %v6400_v36  ;;  %vm2599_vm13 = vcmp.ge.s32.totalorder %v6757_v13, %v6393_v33 }
 0x281   :  { %4875 = vmatpush.msk.msra.mxu1 %vm3180_vm9, %v5087_v34  ;;  %vm3157_vm1 = vmand %vm2613_vm11, %vm2901_vm12  ;;  %vm2886_vm11 = vcmp.lt.s32.totalorder %v6749_v11, %v6400_v36  ;;  %vm2604_vm9 = vcmp.ge.s32.totalorder %v6770_v14, %v6393_v33 }
 0x282   :  { %4764 = vmatpush.msk.msrb.mxu2 %vm3157_vm1, %v5087_v34  ;;  %vm3158_vm4 = vmand %vm2614_vm14, %vm2902_vm15  ;;  %vm2887_vm14 = vcmp.lt.s32.totalorder %v6757_v13, %v6400_v36  ;;  %vm2581_vm1 = vcmp.ge.s32.totalorder %v6741_v1, %v6419_v38 }
 0x283   :  { %4780 = vmatpush.msk.msrb.mxu3 %vm3158_vm4, %v5087_v34  ;;  %vm3159_vm7 = vmand %vm2615_vm0, %vm2903_vm10  ;;  %vm2892_vm0 = vcmp.lt.s32.totalorder %v6770_v14, %v6400_v36  ;;  %vm2582_vm4 = vcmp.ge.s32.totalorder %v6749_v11, %v6419_v38 }
 0x284   :  { %4796 = vmatpush.msk.msra.mxu0 %vm3159_vm7, %v5087_v34  ;;  %vm3164_vm12 = vmand %vm2620_vm2, %vm2908_vm3  ;;  %vm2869_vm2 = vcmp.lt.s32.totalorder %v6741_v1, %v6426_v39  ;;  %vm2583_vm7 = vcmp.ge.s32.totalorder %v6757_v13, %v6419_v38 }
 0x285   :  { %4876 = vmatpush.msk.msra.mxu1 %vm3164_vm12, %v5087_v34  ;;  %vm3141_vm15 = vmand %vm2597_vm5, %vm2885_vm6  ;;  %vm2870_vm5 = vcmp.lt.s32.totalorder %v6749_v11, %v6426_v39  ;;  %vm2588_vm12 = vcmp.ge.s32.totalorder %v6770_v14, %v6419_v38 }
 0x286   :  { %4765 = vmatpush.msk.msrb.mxu2 %vm3141_vm15, %v5087_v34  ;;  %vm3142_vm10 = vmand %vm2598_vm8, %vm2886_vm11  ;;  %vm2871_vm8 = vcmp.lt.s32.totalorder %v6757_v13, %v6426_v39  ;;  %vm2565_vm15 = vcmp.ge.s32.totalorder %v6741_v1, %v6451_v41 }
 0x287   :  { %4781 = vmatpush.msk.msrb.mxu3 %vm3142_vm10, %v5087_v34  ;;  %vm3143_vm3 = vmand %vm2599_vm13, %vm2887_vm14  ;;  %vm2876_vm13 = vcmp.lt.s32.totalorder %v6770_v14, %v6426_v39  ;;  %vm2566_vm10 = vcmp.ge.s32.totalorder %v6749_v11, %v6451_v41 }
 0x288   :  { %4797 = vmatpush.msk.msra.mxu0 %vm3143_vm3, %v5087_v34  ;;  %vm3148_vm6 = vmand %vm2604_vm9, %vm2892_vm0  ;;  %vm2853_vm9 = vcmp.lt.s32.totalorder %v6741_v1, %v6453_v12  ;;  %vm2567_vm3 = vcmp.ge.s32.totalorder %v6757_v13, %v6451_v41 }
 0x289   :  { %4877 = vmatpush.msk.msra.mxu1 %vm3148_vm6, %v5087_v34  ;;  %vm3125_vm11 = vmand %vm2581_vm1, %vm2869_vm2  ;;  %vm2854_vm1 = vcmp.lt.s32.totalorder %v6749_v11, %v6453_v12  ;;  %vm2572_vm6 = vcmp.ge.s32.totalorder %v6770_v14, %v6451_v41 }
 0x28a   :  { %4766 = vmatpush.msk.msrb.mxu2 %vm3125_vm11, %v5087_v34  ;;  %vm3126_vm14 = vmand %vm2582_vm4, %vm2870_vm5  ;;  %vm2855_vm4 = vcmp.lt.s32.totalorder %v6757_v13, %v6453_v12  ;;  %vm2549_vm11 = vcmp.ge.s32.totalorder %v6741_v1, %v6471_v60 }
 0x28b   :  { %4782 = vmatpush.msk.msrb.mxu3 %vm3126_vm14, %v5087_v34  ;;  %vm3127_vm0 = vmand %vm2583_vm7, %vm2871_vm8  ;;  %vm2860_vm7 = vcmp.lt.s32.totalorder %v6770_v14, %v6453_v12  ;;  %vm2550_vm14 = vcmp.ge.s32.totalorder %v6749_v11, %v6471_v60 }
 0x28c   :  { %4798 = vmatpush.msk.msra.mxu0 %vm3127_vm0, %v5087_v34  ;;  %vm3132_vm2 = vmand %vm2588_vm12, %vm2876_vm13  ;;  %vm2837_vm12 = vcmp.lt.s32.totalorder %v6741_v1, %v6473_v42  ;;  %vm2551_vm0 = vcmp.ge.s32.totalorder %v6757_v13, %v6471_v60 }
 0x28d   :  { %4878 = vmatpush.msk.msra.mxu1 %vm3132_vm2, %v5087_v34  ;;  %vm3109_vm5 = vmand %vm2565_vm15, %vm2853_vm9  ;;  %vm2838_vm15 = vcmp.lt.s32.totalorder %v6749_v11, %v6473_v42  ;;  %vm2556_vm2 = vcmp.ge.s32.totalorder %v6770_v14, %v6471_v60 }
 0x28e   :  { %4767 = vmatpush.msk.msrb.mxu2 %vm3109_vm5, %v5087_v34  ;;  %vm3110_vm8 = vmand %vm2566_vm10, %vm2854_vm1  ;;  %vm2839_vm10 = vcmp.lt.s32.totalorder %v6757_v13, %v6473_v42  ;;  %vm2533_vm5 = vcmp.ge.s32.totalorder %v6741_v1, %v6516_v46 }
 0x28f   :  { %4783 = vmatpush.msk.msrb.mxu3 %vm3110_vm8, %v5087_v34  ;;  %vm3111_vm13 = vmand %vm2567_vm3, %vm2855_vm4  ;;  %vm2844_vm3 = vcmp.lt.s32.totalorder %v6770_v14, %v6473_v42  ;;  %vm2534_vm8 = vcmp.ge.s32.totalorder %v6749_v11, %v6516_v46 }
 0x290   :  { %4799 = vmatpush.msk.msra.mxu0 %vm3111_vm13, %v5087_v34  ;;  %vm3116_vm9 = vmand %vm2572_vm6, %vm2860_vm7  ;;  %vm2821_vm6 = vcmp.lt.s32.totalorder %v6741_v1, %v6518_v48  ;;  %vm2535_vm13 = vcmp.ge.s32.totalorder %v6757_v13, %v6516_v46 }
 0x291   :  { %4879 = vmatpush.msk.msra.mxu1 %vm3116_vm9, %v5087_v34  ;;  %vm3093_vm1 = vmand %vm2549_vm11, %vm2837_vm12  ;;  %vm2822_vm11 = vcmp.lt.s32.totalorder %v6749_v11, %v6518_v48  ;;  %vm2540_vm9 = vcmp.ge.s32.totalorder %v6770_v14, %v6516_v46 }
 0x292   :  { %4768 = vmatpush.msk.msrb.mxu2 %vm3093_vm1, %v5087_v34  ;;  %vm3094_vm4 = vmand %vm2550_vm14, %vm2838_vm15  ;;  %vm2823_vm14 = vcmp.lt.s32.totalorder %v6757_v13, %v6518_v48  ;;  %vm2517_vm1 = vcmp.ge.s32.totalorder %v6741_v1, %v6539_v30 }
 0x293   :  { %4784 = vmatpush.msk.msrb.mxu3 %vm3094_vm4, %v5087_v34  ;;  %vm3095_vm7 = vmand %vm2551_vm0, %vm2839_vm10  ;;  %vm2828_vm0 = vcmp.lt.s32.totalorder %v6770_v14, %v6518_v48  ;;  %vm2518_vm4 = vcmp.ge.s32.totalorder %v6749_v11, %v6539_v30 }
 0x294   :  { %4800 = vmatpush.msk.msra.mxu0 %vm3095_vm7, %v5087_v34  ;;  %vm3100_vm12 = vmand %vm2556_vm2, %vm2844_vm3  ;;  %vm2805_vm2 = vcmp.lt.s32.totalorder %v6741_v1, %v6541_v50  ;;  %vm2519_vm7 = vcmp.ge.s32.totalorder %v6757_v13, %v6539_v30 }
 0x295   :  { %4880 = vmatpush.msk.msra.mxu1 %vm3100_vm12, %v5087_v34  ;;  %vm3077_vm15 = vmand %vm2533_vm5, %vm2821_vm6  ;;  %vm2806_vm5 = vcmp.lt.s32.totalorder %v6749_v11, %v6541_v50  ;;  %vm2524_vm12 = vcmp.ge.s32.totalorder %v6770_v14, %v6539_v30 }
 0x296   :  { %4769 = vmatpush.msk.msrb.mxu2 %vm3077_vm15, %v5087_v34  ;;  %vm3078_vm10 = vmand %vm2534_vm8, %vm2822_vm11  ;;  %vm2807_vm8 = vcmp.lt.s32.totalorder %v6757_v13, %v6541_v50  ;;  %vm2501_vm15 = vcmp.ge.s32.totalorder %v6741_v1, %v6578_v49 }
 0x297   :  { %4785 = vmatpush.msk.msrb.mxu3 %vm3078_vm10, %v5087_v34  ;;  %vm3079_vm3 = vmand %vm2535_vm13, %vm2823_vm14  ;;  %vm2812_vm13 = vcmp.lt.s32.totalorder %v6770_v14, %v6541_v50  ;;  %vm2502_vm10 = vcmp.ge.s32.totalorder %v6749_v11, %v6578_v49 }
 0x298   :  { %4801 = vmatpush.msk.msra.mxu0 %vm3079_vm3, %v5087_v34  ;;  %vm3084_vm6 = vmand %vm2540_vm9, %vm2828_vm0  ;;  %vm2789_vm9 = vcmp.lt.s32.totalorder %v6741_v1, %v6585_v57  ;;  %vm2503_vm3 = vcmp.ge.s32.totalorder %v6757_v13, %v6578_v49 }
 0x299   :  { %4881 = vmatpush.msk.msra.mxu1 %vm3084_vm6, %v5087_v34  ;;  %vm3061_vm11 = vmand %vm2517_vm1, %vm2805_vm2  ;;  %vm2790_vm1 = vcmp.lt.s32.totalorder %v6749_v11, %v6585_v57  ;;  %vm2508_vm6 = vcmp.ge.s32.totalorder %v6770_v14, %v6578_v49 }
 0x29a   :  { %4770 = vmatpush.msk.msrb.mxu2 %vm3061_vm11, %v5087_v34  ;;  %vm3062_vm14 = vmand %vm2518_vm4, %vm2806_vm5  ;;  %vm2791_vm4 = vcmp.lt.s32.totalorder %v6757_v13, %v6585_v57  ;;  %vm2485_vm11 = vcmp.ge.s32.totalorder %v6741_v1, %v6607_v54 }
 0x29b   :  { %4786 = vmatpush.msk.msrb.mxu3 %vm3062_vm14, %v5087_v34  ;;  %vm3063_vm0 = vmand %vm2519_vm7, %vm2807_vm8  ;;  %vm2796_vm7 = vcmp.lt.s32.totalorder %v6770_v14, %v6585_v57  ;;  %vm2486_vm14 = vcmp.ge.s32.totalorder %v6749_v11, %v6607_v54 }
 0x29c   :  { %4802 = vmatpush.msk.msra.mxu0 %vm3063_vm0, %v5087_v34  ;;  %vm3068_vm2 = vmand %vm2524_vm12, %vm2812_vm13  ;;  %vm2773_vm12 = vcmp.lt.s32.totalorder %v6741_v1, %v6614_v59  ;;  %vm2487_vm0 = vcmp.ge.s32.totalorder %v6757_v13, %v6607_v54 }
 0x29d   :  { %4882 = vmatpush.msk.msra.mxu1 %vm3068_vm2, %v5087_v34  ;;  %vm3045_vm5 = vmand %vm2501_vm15, %vm2789_vm9  ;;  %vm2774_vm15 = vcmp.lt.s32.totalorder %v6749_v11, %v6614_v59  ;;  %vm2492_vm2 = vcmp.ge.s32.totalorder %v6770_v14, %v6607_v54 }
 0x29e   :  { %4771 = vmatpush.msk.msrb.mxu2 %vm3045_vm5, %v5087_v34  ;;  %vm3046_vm8 = vmand %vm2502_vm10, %vm2790_vm1  ;;  %vm2775_vm10 = vcmp.lt.s32.totalorder %v6757_v13, %v6614_v59  ;;  %vm2469_vm5 = vcmp.ge.s32.totalorder %v6741_v1, %v6633_v20 }
 0x29f   :  { %4787 = vmatpush.msk.msrb.mxu3 %vm3046_vm8, %v5087_v34  ;;  %vm3047_vm13 = vmand %vm2503_vm3, %vm2791_vm4  ;;  %vm2780_vm3 = vcmp.lt.s32.totalorder %v6770_v14, %v6614_v59  ;;  %vm2470_vm8 = vcmp.ge.s32.totalorder %v6749_v11, %v6633_v20 }
 0x2a0   :  { %4803 = vmatpush.msk.msra.mxu0 %vm3047_vm13, %v5087_v34  ;;  %vm3052_vm9 = vmand %vm2508_vm6, %vm2796_vm7  ;;  %vm2757_vm6 = vcmp.lt.s32.totalorder %v6741_v1, %v6640_v62  ;;  %vm2471_vm13 = vcmp.ge.s32.totalorder %v6757_v13, %v6633_v20 }
 0x2a1   :  { %4883 = vmatpush.msk.msra.mxu1 %vm3052_vm9, %v5087_v34  ;;  %vm3029_vm1 = vmand %vm2485_vm11, %vm2773_vm12  ;;  %vm2758_vm11 = vcmp.lt.s32.totalorder %v6749_v11, %v6640_v62  ;;  %vm2476_vm9 = vcmp.ge.s32.totalorder %v6770_v14, %v6633_v20 }
 0x2a2   :  { %4772 = vmatpush.msk.msrb.mxu2 %vm3029_vm1, %v5087_v34  ;;  %vm3030_vm4 = vmand %vm2486_vm14, %vm2774_vm15  ;;  %vm2759_vm14 = vcmp.lt.s32.totalorder %v6757_v13, %v6640_v62  ;;  %vm2453_vm1 = vcmp.ge.s32.totalorder %v6741_v1, %v6659_v27 }
 0x2a3   :  { %4788 = vmatpush.msk.msrb.mxu3 %vm3030_vm4, %v5087_v34  ;;  %vm3031_vm7 = vmand %vm2487_vm0, %vm2775_vm10  ;;  %vm2764_vm0 = vcmp.lt.s32.totalorder %v6770_v14, %v6640_v62  ;;  %vm2454_vm4 = vcmp.ge.s32.totalorder %v6749_v11, %v6659_v27 }
 0x2a4   :  { %4804 = vmatpush.msk.msra.mxu0 %vm3031_vm7, %v5087_v34  ;;  %vm3036_vm12 = vmand %vm2492_vm2, %vm2780_vm3  ;;  %vm2741_vm2 = vcmp.lt.s32.totalorder %v6741_v1, %v6666_v0  ;;  %vm2455_vm7 = vcmp.ge.s32.totalorder %v6757_v13, %v6659_v27 }
 0x2a5   :  { %4884 = vmatpush.msk.msra.mxu1 %vm3036_vm12, %v5087_v34  ;;  %vm3013_vm15 = vmand %vm2469_vm5, %vm2757_vm6  ;;  %vm2742_vm5 = vcmp.lt.s32.totalorder %v6749_v11, %v6666_v0  ;;  %vm2460_vm12 = vcmp.ge.s32.totalorder %v6770_v14, %v6659_v27 }
 0x2a6   :  { %4773 = vmatpush.msk.msrb.mxu2 %vm3013_vm15, %v5087_v34  ;;  %vm3014_vm10 = vmand %vm2470_vm8, %vm2758_vm11  ;;  %vm2743_vm8 = vcmp.lt.s32.totalorder %v6757_v13, %v6666_v0  ;;  %vm2437_vm15 = vcmp.ge.s32.totalorder %v6741_v1, %v6685_v47 }
 0x2a7   :  { %4789 = vmatpush.msk.msrb.mxu3 %vm3014_vm10, %v5087_v34  ;;  %vm3015_vm3 = vmand %vm2471_vm13, %vm2759_vm14  ;;  %vm2748_vm13 = vcmp.lt.s32.totalorder %v6770_v14, %v6666_v0  ;;  %vm2438_vm10 = vcmp.ge.s32.totalorder %v6749_v11, %v6685_v47 }
 0x2a8   :  { %4805 = vmatpush.msk.msra.mxu0 %vm3015_vm3, %v5087_v34  ;;  %vm3020_vm6 = vmand %vm2476_vm9, %vm2764_vm0  ;;  %vm2725_vm9 = vcmp.lt.s32.totalorder %v6741_v1, %v6692_v6  ;;  %vm2439_vm3 = vcmp.ge.s32.totalorder %v6757_v13, %v6685_v47 }
 0x2a9   :  { %4885 = vmatpush.msk.msra.mxu1 %vm3020_vm6, %v5087_v34  ;;  %vm2997_vm11 = vmand %vm2453_vm1, %vm2741_vm2  ;;  %vm2726_vm2 = vcmp.lt.s32.totalorder %v6749_v11, %v6692_v6 }
 0x2aa   :  { %4774 = vmatpush.msk.msrb.mxu2 %vm2997_vm11, %v5087_v34  ;;  %vm2998_vm14 = vmand %vm2454_vm4, %vm2742_vm5  ;;  %vm2727_vm4 = vcmp.lt.s32.totalorder %v6757_v13, %v6692_v6 }
 0x2ab   :  { %4790 = vmatpush.msk.msrb.mxu3 %vm2998_vm14, %v5087_v34  ;;  %vm2999_vm0 = vmand %vm2455_vm7, %vm2743_vm8  ;;  %vm2444_vm8 = vcmp.ge.s32.totalorder %v6770_v14, %v6685_v47 }
 0x2ac   :  { %4806 = vmatpush.msk.msra.mxu0 %vm2999_vm0, %v5087_v34  ;;  %vm3004_vm1 = vmand %vm2460_vm12, %vm2748_vm13  ;;  %vm2732_vm12 = vcmp.lt.s32.totalorder %v6770_v14, %v6692_v6  ;;  %vm2421_vm13 = vcmp.ge.s32.totalorder %v6741_v1, %v6721_v8 }
 0x2ad   :  { %4886 = vmatpush.msk.msra.mxu1 %vm3004_vm1, %v5087_v34  ;;  %vm2981_vm7 = vmand %vm2437_vm15, %vm2725_vm9  ;;  %vm2709_vm15 = vcmp.lt.s32.totalorder %v6741_v1, %v6723_v9  ;;  %vm2422_vm9 = vcmp.ge.s32.totalorder %v6749_v11, %v6721_v8  ;;  %v7644_v1 = vadd.s32 1664, %v5117_v2 }
 0x2ae   :  { %4775 = vmatpush.msk.msrb.mxu2 %vm2981_vm7, %v5087_v34  ;;  %vm2982_vm14 = vmand %vm2438_vm10, %vm2726_vm2  ;;  %vm2710_vm10 = vcmp.lt.s32.totalorder %v6749_v11, %v6723_v9  ;;  %vm2423_vm2 = vcmp.ge.s32.totalorder %v6757_v13, %v6721_v8 }
 0x2af   :  { %4791 = vmatpush.msk.msrb.mxu3 %vm2982_vm14, %v5087_v34  ;;  %vm2983_vm0 = vmand %vm2439_vm3, %vm2727_vm4  ;;  %vm2711_vm3 = vcmp.lt.s32.totalorder %v6757_v13, %v6723_v9 }
 0x2b0   :  { %4807 = vmatpush.msk.msra.mxu0 %vm2983_vm0, %v5087_v34  ;;  %vm2988_vm1 = vmand %vm2444_vm8, %vm2732_vm12  ;;  %vm2666_vm8 = vcmp.ge.s32.totalorder %v7113_v55, %v6305_v23  ;;  %vm2954_vm12 = vcmp.lt.s32.totalorder %v7113_v55, %v6307_v25 }
 0x2b1   :  { %4887 = vmatpush.msk.msra.mxu1 %vm2988_vm1, %v5087_v34  ;;  %vm2965_vm4 = vmand %vm2421_vm13, %vm2709_vm15  ;;  %vm2667_vm15 = vcmp.ge.s32.totalorder %v7127_v45, %v6305_v23 }
 0x2b2   :  { %4776 = vmatpush.msk.msrb.mxu2 %vm2965_vm4, %v5087_v34  ;;  %vm2966_vm7 = vmand %vm2422_vm9, %vm2710_vm10  ;;  %vm2955_vm9 = vcmp.lt.s32.totalorder %v7127_v45, %v6307_v25 }
 0x2b3   :  { %4792 = vmatpush.msk.msrb.mxu3 %vm2966_vm7, %v5087_v34  ;;  %vm2967_vm14 = vmand %vm2423_vm2, %vm2711_vm3  ;;  %vm2428_vm2 = vcmp.ge.s32.totalorder %v6770_v14, %v6721_v8  ;;  %vm2716_vm3 = vcmp.lt.s32.totalorder %v6770_v14, %v6723_v9 }
 0x2b4   :  { %4808 = vmatpush.msk.msra.mxu0 %vm2967_vm14, %v5087_v34  ;;  %vm3210_vm4 = vmand %vm2666_vm8, %vm2954_vm12  ;;  %vm2649_vm8 = vcmp.ge.s32.totalorder %v7100_v37, %v6310_v26  ;;  %vm2937_vm12 = vcmp.lt.s32.totalorder %v7100_v37, %v6312_v28  ;;  %vm2650_vm14 = vcmp.ge.s32.totalorder %v7113_v55, %v6310_v26 }
 0x2b5   :  { %vm3211_vm7 = vmand %vm2667_vm15, %vm2955_vm9  ;;  %vm2938_vm15 = vcmp.lt.s32.totalorder %v7113_v55, %v6312_v28 }
 0x2d0   :  { %v2343_v15 = vpop.f32.mrf.mxu1 }
 0x2d1   :  { %v4455_v17 = vmul.f32 -1.442695, %v2343_v15 }
 0x2d3   :  { %4991 = vpow2.f32 %v4455_v17 }
 0x2d8   :  { %v2346_v18 = vpop.f32.mrf.mxu1 }
 0x2d9   :  { %v4992_v19 = vpop.eup %4991  ;;  %v4456_v21 = vmul.f32 -1.442695, %v2346_v18 }
 0x2da   :  { %v7022_v22 = vadd.f32 1.0, %v4992_v19 }
 0x2db   :  { %4993 = vpow2.f32 %v4456_v21 }
 0x2dc   :  { %4995 = vrcp.f32 %v7022_v22  ;;  %vm2362_vm5 = vweird.f32 %v7022_v22  ;;  %v2366_v43 = vand.u32 2147483647, %v7022_v22  ;;  %v2368_v44 = vand.u32 2147483648, %v7022_v22 }
 0x2de   :  { %vm2367_vm13 = vcmp.eq.f32.partialorder %v2366_v43, 8.507059e+37  ;;  %v2369_v58 = vor.u32 1.1754944e-38, %v2368_v44  ;;  %v8106_v43 = vmov 0  ;;  %v8108_v44 = vmov 0 }
 0x2e1   :  { %v4994_v32 = vpop.eup %4993 }
 0x2e2   :  { %v4996_v3 = vpop.eup %4995  ;;  %v7069_v7 = vadd.f32 1.0, %v4994_v32 }
 0x2e3   :  { %v2358_v16 = vmul.f32 %v4996_v3, %v7022_v22  ;;  %vm2363_vm6 = vweird.f32 %v4996_v3 }
 0x2e4   :  { %vm7089_vm11 = vmor %vm2362_vm5, %vm2363_vm6  ;;  %4997 = vrcp.f32 %v7069_v7  ;;  %vm2665_vm5 = vcmp.ge.s32.totalorder %v7100_v37, %v6305_v23  ;;  %vm2953_vm6 = vcmp.lt.s32.totalorder %v7100_v37, %v6307_v25  ;;  %vm2377_vm0 = vweird.f32 %v7069_v7 }
 0x2e5   :  { %v2359_v40 = vsub.f32 1.0, %v2358_v16  ;;  %vm7184_vm1 = vmand %vm2665_vm5, %vm2953_vm6  ;;  %vm2672_vm5 = vcmp.ge.s32.totalorder %v7160_v52, %v6305_v23  ;;  %vm2960_vm6 = vcmp.lt.s32.totalorder %v7160_v52, %v6307_v25  ;;  %v2383_v13 = vand.u32 2147483648, %v7069_v7 }
 0x2e6   :  { %v2381_v17 = vand.u32 2147483647, %v7069_v7  ;;  %vm7246_vm9 = vmand %vm2672_vm5, %vm2960_vm6  ;;  %vm2633_vm5 = vcmp.ge.s32.totalorder %v7100_v37, %v6315_v29  ;;  %vm2921_vm6 = vcmp.lt.s32.totalorder %v7100_v37, %v6317_v31  ;;  %v8100_v16 = vmov 0 }
 0x2e7   :  { %v2360_v24 = vmul.f32 %v4996_v3, %v2359_v40  ;;  %v2384_v19 = vor.u32 1.1754944e-38, %v2383_v13  ;;  %v8104_v40 = vmov 0 }
 0x2e9   :  { %v2361_v51 = vadd.f32 %v4996_v3, %v2360_v24  ;;  %v8110_v24 = vmov 0 }
 0x2ea   :  { %v4998_v56 = vpop.eup %4997 }
 0x2eb   :  { %v2365_v61 = vsel %vm7089_vm11, %v4996_v3, %v2361_v51  ;;  %v2373_v63 = vmul.f32 %v4998_v56, %v7069_v7  ;;  %vm2378_vm10 = vweird.f32 %v4998_v56  ;;  %v8096_v3 = vmov 0 }
 0x2ec   :  { %v7188_v53 = vsel %vm2367_vm13, %v2369_v58, %v2365_v61  ;;  %vm7190_vm11 = vmor %vm2377_vm0, %vm2378_vm10  ;;  %vm2651_vm0 = vcmp.ge.s32.totalorder %v7127_v45, %v6310_v26  ;;  %vm2939_vm10 = vcmp.lt.s32.totalorder %v7127_v45, %v6312_v28  ;;  %v8098_v7 = vmov 0 }
 0x2ed   :  { %v2374_v11 = vsub.f32 1.0, %v2373_v63  ;;  %3746 = vmatmul.f32.vlgmr.msra.gmra.mxu2 %v7188_v53  ;;  %3769 = vmatmul.f32.vlgmr.msra.gmra.mxu3 %v7188_v53  ;;  %vm2972_vm13 = vmand %vm2428_vm2, %vm2716_vm3  ;;  %vm2656_vm2 = vcmp.ge.s32.totalorder %v7160_v52, %v6310_v26  ;;  %vm2944_vm3 = vcmp.lt.s32.totalorder %v7160_v52, %v6312_v28  ;;  %v8112_v51 = vmov 0 }
 0x2ee   :  { %3792 = vmatmul.f32.vlgmr.msrb.gmra.mxu0 %v7188_v53  ;;  %3884 = vmatmul.f32.vlgmr.msrb.gmra.mxu1 %v7188_v53  ;;  %v8116_v58 = vmov 0  ;;  %v8118_v61 = vmov 0  ;;  %v7628_v63 = vadd.s32 1408, %v5117_v2 }
 0x2ef   :  { %v2375_v15 = vmul.f32 %v4998_v56, %v2374_v11  ;;  %4825 = vmatpush.msk.msra.mxu2 %vm7184_vm1, %v5087_v34  ;;  %4841 = vmatpush.msk.msra.mxu3 %vm3210_vm4, %v5087_v34  ;;  %vm3193_vm1 = vmand %vm2649_vm8, %vm2937_vm12  ;;  %vm2634_vm12 = vcmp.ge.s32.totalorder %v7113_v55, %v6315_v29  ;;  %v8120_v11 = vmov 0 }
 0x2f0   :  { %4857 = vmatpush.msk.msrb.mxu0 %vm3211_vm7, %v5087_v34  ;;  %4888 = vmatpush.msk.msra.mxu1 %vm2972_vm13, %v5087_v34  ;;  %vm3194_vm4 = vmand %vm2650_vm14, %vm2938_vm15  ;;  %vm2382_vm7 = vcmp.eq.f32.partialorder %v2381_v17, 8.507059e+37  ;;  %vm2922_vm13 = vcmp.lt.s32.totalorder %v7113_v55, %v6317_v31  ;;  %vm2635_vm14 = vcmp.ge.s32.totalorder %v7127_v45, %v6315_v29  ;;  %vm2923_vm15 = vcmp.lt.s32.totalorder %v7127_v45, %v6317_v31 }
 0x2f1   :  { %v2376_v14 = vadd.f32 %v4998_v56, %v2375_v15  ;;  %4826 = vmatpush.msk.msra.mxu2 %vm3193_vm1, %v5087_v34  ;;  %4842 = vmatpush.msk.msra.mxu3 %vm3194_vm4, %v5087_v34  ;;  %vm3195_vm8 = vmand %vm2651_vm0, %vm2939_vm10  ;;  %vm2640_vm10 = vcmp.ge.s32.totalorder %v7160_v52, %v6315_v29  ;;  %vm2928_vm1 = vcmp.lt.s32.totalorder %v7160_v52, %v6317_v31  ;;  %v5011_v15 = vld [vmem:[#allocation2 + $0xa8] sm:$0xff] }
 0x2f2   :  { %4937 = vmatpush.msk.msrb.mxu1 %vm7246_vm9, %v5087_v34  ;;  %4858 = vmatpush.msk.msrb.mxu0 %vm3195_vm8, %v5087_v34  ;;  %vm3177_vm0 = vmand %vm2633_vm5, %vm2921_vm6  ;;  %vm2905_vm4 = vcmp.lt.s32.totalorder %v7100_v37, %v6368_v4  ;;  %vm2618_vm6 = vcmp.ge.s32.totalorder %v7113_v55, %v6361_v35 }
 0x2f3   :  { %v2380_v21 = vsel %vm7190_vm11, %v4998_v56, %v2376_v14  ;;  %vm7288_vm11 = vmand %vm2656_vm2, %vm2944_vm3  ;;  %4827 = vmatpush.msk.msra.mxu2 %vm3177_vm0, %v5087_v34  ;;  %vm2617_vm3 = vcmp.ge.s32.totalorder %v7100_v37, %v6361_v35  ;;  %vm2912_vm0 = vcmp.lt.s32.totalorder %v7160_v52, %v6368_v4  ;;  %v8114_v56 = vmov 0  ;;  %v5012_v14 = vld [vmem:[#allocation2 + $0xd0] sm:$0xff] }
 0x2f4   :  { %v7282_v22 = vsel %vm2382_vm7, %v2384_v19, %v2380_v21  ;;  %4938 = vmatpush.msk.msrb.mxu1 %vm7288_vm11, %v5087_v34  ;;  %vm3178_vm2 = vmand %vm2634_vm12, %vm2922_vm13  ;;  %vm2906_vm7 = vcmp.lt.s32.totalorder %v7113_v55, %v6368_v4  ;;  %vm2619_vm12 = vcmp.ge.s32.totalorder %v7127_v45, %v6361_v35  ;;  %vm2907_vm13 = vcmp.lt.s32.totalorder %v7127_v45, %v6368_v4  ;;  %v5013_v21 = vld [vmem:[#allocation2 + $0x98] sm:$0xff] }
 0x2f5   :  { %3749 = vmatmul.f32.gmra.mxu2 %v7282_v22  ;;  %3772 = vmatmul.f32.gmra.mxu3 %v7282_v22  ;;  %vm3179_vm5 = vmand %vm2635_vm14, %vm2923_vm15  ;;  %vm2624_vm15 = vcmp.ge.s32.totalorder %v7160_v52, %v6361_v35 }
 0x2f6   :  { %4843 = vmatpush.msk.msra.mxu3 %vm3178_vm2, %v5087_v34  ;;  %3795 = vmatmul.f32.gmra.mxu0 %v7282_v22  ;;  %vm7317_vm8 = vmand %vm2640_vm10, %vm2928_vm1  ;;  %vm2601_vm1 = vcmp.ge.s32.totalorder %v7100_v37, %v6393_v33  ;;  %vm2889_vm2 = vcmp.lt.s32.totalorder %v7100_v37, %v6400_v36 }
 0x2f7   :  { %4859 = vmatpush.msk.msrb.mxu0 %vm3179_vm5, %v5087_v34  ;;  %v8097_v3 = vsel %vm7317_vm8, 4294967295, %v8096_v3  ;;  %3887 = vmatmul.f32.gmra.mxu1 %v7282_v22  ;;  %vm3161_vm14 = vmand %vm2617_vm3, %vm2905_vm4  ;;  %vm2602_vm3 = vcmp.ge.s32.totalorder %v7113_v55, %v6393_v33  ;;  %vm2890_vm4 = vcmp.lt.s32.totalorder %v7113_v55, %v6400_v36 }
 0x2f8   :  { %4939 = vmatpush.msk.msrb.mxu1 %vm7317_vm8, %v5087_v34  ;;  %4828 = vmatpush.msk.msra.mxu2 %vm3161_vm14, %v5087_v34  ;;  %vm3162_vm10 = vmand %vm2618_vm6, %vm2906_vm7  ;;  %vm2603_vm6 = vcmp.ge.s32.totalorder %v7127_v45, %v6393_v33  ;;  %vm2891_vm7 = vcmp.lt.s32.totalorder %v7127_v45, %v6400_v36  ;;  %vm2896_vm14 = vcmp.lt.s32.totalorder %v7160_v52, %v6400_v36 }
 0x2f9   :  { %4844 = vmatpush.msk.msra.mxu3 %vm3162_vm10, %v5087_v34  ;;  %vm3163_vm5 = vmand %vm2619_vm12, %vm2907_vm13  ;;  %vm2608_vm13 = vcmp.ge.s32.totalorder %v7160_v52, %v6393_v33  ;;  %vm2873_vm10 = vcmp.lt.s32.totalorder %v7100_v37, %v6426_v39 }
 0x2fa   :  { %4860 = vmatpush.msk.msrb.mxu0 %vm3163_vm5, %v5087_v34  ;;  %vm7344_vm8 = vmand %vm2624_vm15, %vm2912_vm0  ;;  %vm2585_vm0 = vcmp.ge.s32.totalorder %v7100_v37, %v6419_v38  ;;  %vm2874_vm5 = vcmp.lt.s32.totalorder %v7113_v55, %v6426_v39 }
 0x2fb   :  { %v8099_v7 = vsel %vm7344_vm8, 4294967295, %v8098_v7  ;;  %4940 = vmatpush.msk.msrb.mxu1 %vm7344_vm8, %v5087_v34  ;;  %vm3145_vm12 = vmand %vm2601_vm1, %vm2889_vm2  ;;  %vm2586_vm2 = vcmp.ge.s32.totalorder %v7113_v55, %v6419_v38 }
 0x2fc   :  { %4829 = vmatpush.msk.msra.mxu2 %vm3145_vm12, %v5087_v34  ;;  %vm3146_vm15 = vmand %vm2602_vm3, %vm2890_vm4  ;;  %vm2587_vm4 = vcmp.ge.s32.totalorder %v7127_v45, %v6419_v38  ;;  %vm2592_vm12 = vcmp.ge.s32.totalorder %v7160_v52, %v6419_v38 }
 0x2fd   :  { %3815 = vmatmul.f32.vlgmr.msrb.gmra.mxu2 %v7188_v53  ;;  %3838 = vmatmul.f32.vlgmr.msrb.gmra.mxu3 %v7188_v53  ;;  %vm3147_vm1 = vmand %vm2603_vm6, %vm2891_vm7  ;;  %vm2875_vm6 = vcmp.lt.s32.totalorder %v7127_v45, %v6426_v39 }
 0x2fe   :  { %4845 = vmatpush.msk.msra.mxu3 %vm3146_vm15, %v5087_v34  ;;  %3861 = vmatmul.f32.vlgmr.msra.gmra.mxu0 %v7188_v53  ;;  %vm7373_vm3 = vmand %vm2608_vm13, %vm2896_vm14  ;;  %vm2880_vm13 = vcmp.lt.s32.totalorder %v7160_v52, %v6426_v39  ;;  %vm2569_vm15 = vcmp.ge.s32.totalorder %v7100_v37, %v6451_v41 }
 0x2ff   :  { %4861 = vmatpush.msk.msrb.mxu0 %vm3147_vm1, %v5087_v34  ;;  %v8101_v16 = vsel %vm7373_vm3, 4294967295, %v8100_v16  ;;  %3976 = vmatmul.f32.vlgmr.msra.gmra.mxu1 %v7188_v53  ;;  %vm3129_vm7 = vmand %vm2585_vm0, %vm2873_vm10  ;;  %vm2857_vm1 = vcmp.lt.s32.totalorder %v7100_v37, %v6453_v12  ;;  %vm2570_vm0 = vcmp.ge.s32.totalorder %v7113_v55, %v6451_v41  ;;  %vm2858_vm10 = vcmp.lt.s32.totalorder %v7113_v55, %v6453_v12 }
 0x300   :  { %4941 = vmatpush.msk.msrb.mxu1 %vm7373_vm3, %v5087_v34  ;;  %4830 = vmatpush.msk.msra.mxu2 %vm3129_vm7, %v5087_v34  ;;  %vm3130_vm14 = vmand %vm2586_vm2, %vm2874_vm5  ;;  %vm2571_vm2 = vcmp.ge.s32.totalorder %v7127_v45, %v6451_v41  ;;  %vm2859_vm5 = vcmp.lt.s32.totalorder %v7127_v45, %v6453_v12 }
 0x301   :  { %4846 = vmatpush.msk.msra.mxu3 %vm3130_vm14, %v5087_v34  ;;  %vm3131_vm8 = vmand %vm2587_vm4, %vm2875_vm6  ;;  %vm2576_vm6 = vcmp.ge.s32.totalorder %v7160_v52, %v6451_v41 }
 0x302   :  { %4862 = vmatpush.msk.msrb.mxu0 %vm3131_vm8, %v5087_v34  ;;  %vm7400_vm3 = vmand %vm2592_vm12, %vm2880_vm13  ;;  %vm2864_vm8 = vcmp.lt.s32.totalorder %v7160_v52, %v6453_v12  ;;  %vm2553_vm12 = vcmp.ge.s32.totalorder %v7100_v37, %v6471_v60  ;;  %vm2841_vm13 = vcmp.lt.s32.totalorder %v7100_v37, %v6473_v42 }
 0x303   :  { %v8103_v10 = vsel %vm7400_vm3, 4294967295, %v8102_v10  ;;  %4942 = vmatpush.msk.msrb.mxu1 %vm7400_vm3, %v5087_v34  ;;  %vm3113_vm4 = vmand %vm2569_vm15, %vm2857_vm1  ;;  %vm2554_vm15 = vcmp.ge.s32.totalorder %v7113_v55, %v6471_v60  ;;  %vm2842_vm1 = vcmp.lt.s32.totalorder %v7113_v55, %v6473_v42 }
 0x304   :  { %4831 = vmatpush.msk.msra.mxu2 %vm3113_vm4, %v5087_v34  ;;  %vm3114_vm7 = vmand %vm2570_vm0, %vm2858_vm10  ;;  %vm2555_vm10 = vcmp.ge.s32.totalorder %v7127_v45, %v6471_v60  ;;  %vm2560_vm4 = vcmp.ge.s32.totalorder %v7160_v52, %v6471_v60 }
 0x305   :  { %3818 = vmatmul.f32.gmra.mxu2 %v7282_v22  ;;  %3841 = vmatmul.f32.gmra.mxu3 %v7282_v22  ;;  %vm3115_vm14 = vmand %vm2571_vm2, %vm2859_vm5  ;;  %vm2843_vm2 = vcmp.lt.s32.totalorder %v7127_v45, %v6473_v42 }
 0x306   :  { %4847 = vmatpush.msk.msra.mxu3 %vm3114_vm7, %v5087_v34  ;;  %3864 = vmatmul.f32.gmra.mxu0 %v7282_v22  ;;  %vm7429_vm0 = vmand %vm2576_vm6, %vm2864_vm8  ;;  %vm2848_vm6 = vcmp.lt.s32.totalorder %v7160_v52, %v6473_v42  ;;  %vm2537_vm7 = vcmp.ge.s32.totalorder %v7100_v37, %v6516_v46 }
 0x307   :  { %4863 = vmatpush.msk.msrb.mxu0 %vm3115_vm14, %v5087_v34  ;;  %v8105_v40 = vsel %vm7429_vm0, 4294967295, %v8104_v40  ;;  %3979 = vmatmul.f32.gmra.mxu1 %v7282_v22  ;;  %vm3097_vm5 = vmand %vm2553_vm12, %vm2841_vm13  ;;  %vm2825_vm14 = vcmp.lt.s32.totalorder %v7100_v37, %v6518_v48  ;;  %vm2538_vm12 = vcmp.ge.s32.totalorder %v7113_v55, %v6516_v46  ;;  %vm2826_vm13 = vcmp.lt.s32.totalorder %v7113_v55, %v6518_v48 }
 0x308   :  { %4943 = vmatpush.msk.msrb.mxu1 %vm7429_vm0, %v5087_v34  ;;  %4832 = vmatpush.msk.msra.mxu2 %vm3097_vm5, %v5087_v34  ;;  %vm3098_vm8 = vmand %vm2554_vm15, %vm2842_vm1  ;;  %vm2539_vm15 = vcmp.ge.s32.totalorder %v7127_v45, %v6516_v46  ;;  %vm2827_vm1 = vcmp.lt.s32.totalorder %v7127_v45, %v6518_v48 }
 0x309   :  { %4848 = vmatpush.msk.msra.mxu3 %vm3098_vm8, %v5087_v34  ;;  %vm3099_vm3 = vmand %vm2555_vm10, %vm2843_vm2  ;;  %vm2544_vm2 = vcmp.ge.s32.totalorder %v7160_v52, %v6516_v46 }
 0x30a   :  { %4864 = vmatpush.msk.msrb.mxu0 %vm3099_vm3, %v5087_v34  ;;  %vm7456_vm0 = vmand %vm2560_vm4, %vm2848_vm6  ;;  %vm2832_vm3 = vcmp.lt.s32.totalorder %v7160_v52, %v6518_v48  ;;  %vm2521_vm4 = vcmp.ge.s32.totalorder %v7100_v37, %v6539_v30  ;;  %vm2809_vm6 = vcmp.lt.s32.totalorder %v7100_v37, %v6541_v50 }
 0x30b   :  { %v8107_v43 = vsel %vm7456_vm0, 4294967295, %v8106_v43  ;;  %4944 = vmatpush.msk.msrb.mxu1 %vm7456_vm0, %v5087_v34  ;;  %vm3081_vm10 = vmand %vm2537_vm7, %vm2825_vm14  ;;  %vm2522_vm7 = vcmp.ge.s32.totalorder %v7113_v55, %v6539_v30  ;;  %vm2810_vm14 = vcmp.lt.s32.totalorder %v7113_v55, %v6541_v50 }
 0x30c   :  { %4833 = vmatpush.msk.msra.mxu2 %vm3081_vm10, %v5087_v34  ;;  %vm3082_vm5 = vmand %vm2538_vm12, %vm2826_vm13  ;;  %vm2523_vm12 = vcmp.ge.s32.totalorder %v7127_v45, %v6539_v30  ;;  %vm2811_vm13 = vcmp.lt.s32.totalorder %v7127_v45, %v6541_v50  ;;  %vm2816_vm10 = vcmp.lt.s32.totalorder %v7160_v52, %v6541_v50 }
 0x30d   :  { %4849 = vmatpush.msk.msra.mxu3 %vm3082_vm5, %v5087_v34  ;;  %vm3083_vm8 = vmand %vm2539_vm15, %vm2827_vm1  ;;  %vm2528_vm1 = vcmp.ge.s32.totalorder %v7160_v52, %v6539_v30  ;;  %vm2793_vm5 = vcmp.lt.s32.totalorder %v7100_v37, %v6585_v57 }
 0x30e   :  { %4865 = vmatpush.msk.msrb.mxu0 %vm3083_vm8, %v5087_v34  ;;  %vm7482_vm0 = vmand %vm2544_vm2, %vm2832_vm3  ;;  %vm2505_vm3 = vcmp.ge.s32.totalorder %v7100_v37, %v6578_v49 }
 0x30f   :  { %v8109_v44 = vsel %vm7482_vm0, 4294967295, %v8108_v44  ;;  %4945 = vmatpush.msk.msrb.mxu1 %vm7482_vm0, %v5087_v34  ;;  %vm3065_vm15 = vmand %vm2521_vm4, %vm2809_vm6  ;;  %vm2506_vm4 = vcmp.ge.s32.totalorder %v7113_v55, %v6578_v49  ;;  %vm2794_vm6 = vcmp.lt.s32.totalorder %v7113_v55, %v6585_v57 }
 0x310   :  { %4834 = vmatpush.msk.msra.mxu2 %vm3065_vm15, %v5087_v34  ;;  %vm3066_vm2 = vmand %vm2522_vm7, %vm2810_vm14  ;;  %vm2507_vm7 = vcmp.ge.s32.totalorder %v7127_v45, %v6578_v49  ;;  %vm2795_vm14 = vcmp.lt.s32.totalorder %v7127_v45, %v6585_v57  ;;  %vm2800_vm15 = vcmp.lt.s32.totalorder %v7160_v52, %v6585_v57 }
 0x311   :  { %4850 = vmatpush.msk.msra.mxu3 %vm3066_vm2, %v5087_v34  ;;  %vm3067_vm8 = vmand %vm2523_vm12, %vm2811_vm13  ;;  %vm2512_vm13 = vcmp.ge.s32.totalorder %v7160_v52, %v6578_v49  ;;  %vm2777_vm2 = vcmp.lt.s32.totalorder %v7100_v37, %v6614_v59 }
 0x312   :  { %4866 = vmatpush.msk.msrb.mxu0 %vm3067_vm8, %v5087_v34  ;;  %vm7508_vm0 = vmand %vm2528_vm1, %vm2816_vm10  ;;  %vm2489_vm10 = vcmp.ge.s32.totalorder %v7100_v37, %v6607_v54 }
 0x313   :  { %v8111_v24 = vsel %vm7508_vm0, 4294967295, %v8110_v24  ;;  %4946 = vmatpush.msk.msrb.mxu1 %vm7508_vm0, %v5087_v34  ;;  %vm3049_vm12 = vmand %vm2505_vm3, %vm2793_vm5  ;;  %vm2490_vm3 = vcmp.ge.s32.totalorder %v7113_v55, %v6607_v54  ;;  %vm2778_vm5 = vcmp.lt.s32.totalorder %v7113_v55, %v6614_v59 }
 0x314   :  { %4835 = vmatpush.msk.msra.mxu2 %vm3049_vm12, %v5087_v34  ;;  %vm3050_vm1 = vmand %vm2506_vm4, %vm2794_vm6  ;;  %vm2491_vm4 = vcmp.ge.s32.totalorder %v7127_v45, %v6607_v54  ;;  %vm2779_vm6 = vcmp.lt.s32.totalorder %v7127_v45, %v6614_v59  ;;  %vm2784_vm12 = vcmp.lt.s32.totalorder %v7160_v52, %v6614_v59 }
 0x315   :  { %4851 = vmatpush.msk.msra.mxu3 %vm3050_vm1, %v5087_v34  ;;  %vm3051_vm8 = vmand %vm2507_vm7, %vm2795_vm14  ;;  %vm2496_vm14 = vcmp.ge.s32.totalorder %v7160_v52, %v6607_v54  ;;  %vm2761_vm1 = vcmp.lt.s32.totalorder %v7100_v37, %v6640_v62 }
 0x316   :  { %4867 = vmatpush.msk.msrb.mxu0 %vm3051_vm8, %v5087_v34  ;;  %vm7534_vm0 = vmand %vm2512_vm13, %vm2800_vm15  ;;  %vm2473_vm15 = vcmp.ge.s32.totalorder %v7100_v37, %v6633_v20 }
 0x317   :  { %v8113_v51 = vsel %vm7534_vm0, 4294967295, %v8112_v51  ;;  %4947 = vmatpush.msk.msrb.mxu1 %vm7534_vm0, %v5087_v34  ;;  %vm3033_vm7 = vmand %vm2489_vm10, %vm2777_vm2  ;;  %vm2474_vm10 = vcmp.ge.s32.totalorder %v7113_v55, %v6633_v20  ;;  %vm2762_vm2 = vcmp.lt.s32.totalorder %v7113_v55, %v6640_v62 }
 0x318   :  { %4836 = vmatpush.msk.msra.mxu2 %vm3033_vm7, %v5087_v34  ;;  %vm3034_vm13 = vmand %vm2490_vm3, %vm2778_vm5  ;;  %vm2475_vm3 = vcmp.ge.s32.totalorder %v7127_v45, %v6633_v20  ;;  %vm2763_vm5 = vcmp.lt.s32.totalorder %v7127_v45, %v6640_v62  ;;  %vm2768_vm7 = vcmp.lt.s32.totalorder %v7160_v52, %v6640_v62 }
 0x319   :  { %4852 = vmatpush.msk.msra.mxu3 %vm3034_vm13, %v5087_v34  ;;  %vm3035_vm8 = vmand %vm2491_vm4, %vm2779_vm6  ;;  %vm2480_vm6 = vcmp.ge.s32.totalorder %v7160_v52, %v6633_v20  ;;  %vm2745_vm13 = vcmp.lt.s32.totalorder %v7100_v37, %v6666_v0 }
 0x31a   :  { %4868 = vmatpush.msk.msrb.mxu0 %vm3035_vm8, %v5087_v34  ;;  %vm7560_vm0 = vmand %vm2496_vm14, %vm2784_vm12  ;;  %vm2457_vm12 = vcmp.ge.s32.totalorder %v7100_v37, %v6659_v27 }
 0x31b   :  { %v8115_v56 = vsel %vm7560_vm0, 4294967295, %v8114_v56  ;;  %4948 = vmatpush.msk.msrb.mxu1 %vm7560_vm0, %v5087_v34  ;;  %vm3017_vm4 = vmand %vm2473_vm15, %vm2761_vm1  ;;  %vm2458_vm15 = vcmp.ge.s32.totalorder %v7113_v55, %v6659_v27  ;;  %vm2746_vm1 = vcmp.lt.s32.totalorder %v7113_v55, %v6666_v0 }
 0x31c   :  { %4837 = vmatpush.msk.msra.mxu2 %vm3017_vm4, %v5087_v34  ;;  %vm3018_vm14 = vmand %vm2474_vm10, %vm2762_vm2  ;;  %vm2459_vm10 = vcmp.ge.s32.totalorder %v7127_v45, %v6659_v27  ;;  %vm2747_vm2 = vcmp.lt.s32.totalorder %v7127_v45, %v6666_v0  ;;  %vm2752_vm4 = vcmp.lt.s32.totalorder %v7160_v52, %v6666_v0 }
 0x31d   :  { %4853 = vmatpush.msk.msra.mxu3 %vm3018_vm14, %v5087_v34  ;;  %vm3019_vm8 = vmand %vm2475_vm3, %vm2763_vm5  ;;  %vm2464_vm5 = vcmp.ge.s32.totalorder %v7160_v52, %v6659_v27  ;;  %vm2729_vm14 = vcmp.lt.s32.totalorder %v7100_v37, %v6692_v6 }
 0x31e   :  { %4869 = vmatpush.msk.msrb.mxu0 %vm3019_vm8, %v5087_v34  ;;  %vm7586_vm0 = vmand %vm2480_vm6, %vm2768_vm7  ;;  %vm2441_vm7 = vcmp.ge.s32.totalorder %v7100_v37, %v6685_v47 }
 0x31f   :  { %v8117_v58 = vsel %vm7586_vm0, 4294967295, %v8116_v58  ;;  %4949 = vmatpush.msk.msrb.mxu1 %vm7586_vm0, %v5087_v34  ;;  %vm3001_vm3 = vmand %vm2457_vm12, %vm2745_vm13  ;;  %vm2442_vm12 = vcmp.ge.s32.totalorder %v7113_v55, %v6685_v47  ;;  %vm2730_vm13 = vcmp.lt.s32.totalorder %v7113_v55, %v6692_v6 }
 0x320   :  { %4838 = vmatpush.msk.msra.mxu2 %vm3001_vm3, %v5087_v34  ;;  %vm3002_vm6 = vmand %vm2458_vm15, %vm2746_vm1  ;;  %vm2443_vm15 = vcmp.ge.s32.totalorder %v7127_v45, %v6685_v47  ;;  %vm2731_vm1 = vcmp.lt.s32.totalorder %v7127_v45, %v6692_v6  ;;  %vm2736_vm3 = vcmp.lt.s32.totalorder %v7160_v52, %v6692_v6 }
 0x321   :  { %4854 = vmatpush.msk.msra.mxu3 %vm3002_vm6, %v5087_v34  ;;  %vm3003_vm8 = vmand %vm2459_vm10, %vm2747_vm2  ;;  %vm2448_vm2 = vcmp.ge.s32.totalorder %v7160_v52, %v6685_v47  ;;  %vm2713_vm6 = vcmp.lt.s32.totalorder %v7100_v37, %v6723_v9 }
 0x322   :  { %4870 = vmatpush.msk.msrb.mxu0 %vm3003_vm8, %v5087_v34  ;;  %vm7612_vm0 = vmand %vm2464_vm5, %vm2752_vm4  ;;  %vm2425_vm4 = vcmp.ge.s32.totalorder %v7100_v37, %v6721_v8  ;;  %vm2714_vm8 = vcmp.lt.s32.totalorder %v7113_v55, %v6723_v9  ;;  %v8122_v37 = vmov 0 }
 0x323   :  { %v8119_v61 = vsel %vm7612_vm0, 4294967295, %v8118_v61  ;;  %4950 = vmatpush.msk.msrb.mxu1 %vm7612_vm0, %v5087_v34  ;;  %vm2985_vm10 = vmand %vm2441_vm7, %vm2729_vm14  ;;  %vm2426_vm14 = vcmp.ge.s32.totalorder %v7113_v55, %v6721_v8  ;;  %v7901_v55 = vadd.s32 1920, %v5117_v2 }
 0x324   :  { %4839 = vmatpush.msk.msra.mxu2 %vm2985_vm10, %v5087_v34  ;;  %vm2986_vm5 = vmand %vm2442_vm12, %vm2730_vm13  ;;  %vm2427_vm13 = vcmp.ge.s32.totalorder %v7127_v45, %v6721_v8  ;;  %vm2669_vm10 = vcmp.ge.s32.totalorder %v7628_v63, %v6305_v23 }
 0x325   :  { %4855 = vmatpush.msk.msra.mxu3 %vm2986_vm5, %v5087_v34  ;;  %vm2987_vm7 = vmand %vm2443_vm15, %vm2731_vm1  ;;  %vm2715_vm15 = vcmp.lt.s32.totalorder %v7127_v45, %v6723_v9  ;;  %vm2670_vm5 = vcmp.ge.s32.totalorder %v7636_v5, %v6305_v23 }
 0x326   :  { %4871 = vmatpush.msk.msrb.mxu0 %vm2987_vm7, %v5087_v34  ;;  %vm7647_vm12 = vmand %vm2448_vm2, %vm2736_vm3  ;;  %vm2957_vm2 = vcmp.lt.s32.totalorder %v7628_v63, %v6307_v25  ;;  %vm2958_vm7 = vcmp.lt.s32.totalorder %v7636_v5, %v6307_v25 }
 0x327   :  { %v8121_v11 = vsel %vm7647_vm12, 4294967295, %v8120_v11  ;;  %4951 = vmatpush.msk.msrb.mxu1 %vm7647_vm12, %v5087_v34  ;;  %vm2969_vm1 = vmand %vm2425_vm4, %vm2713_vm6  ;;  %vm2671_vm4 = vcmp.ge.s32.totalorder %v7644_v1, %v6305_v23  ;;  %vm2959_vm6 = vcmp.lt.s32.totalorder %v7644_v1, %v6307_v25 }
 0x328   :  { %4840 = vmatpush.msk.msra.mxu2 %vm2969_vm1, %v5087_v34  ;;  %vm2970_vm3 = vmand %vm2426_vm14, %vm2714_vm8  ;;  %vm2432_vm8 = vcmp.ge.s32.totalorder %v7160_v52, %v6721_v8  ;;  %vm2720_vm1 = vcmp.lt.s32.totalorder %v7160_v52, %v6723_v9  ;;  %v5010_v52 = vld [vmem:[#allocation2 + $0x20] sm:$0xff] }
 0x329   :  { %4856 = vmatpush.msk.msra.mxu3 %vm2970_vm3, %v5087_v34  ;;  %vm2971_vm0 = vmand %vm2427_vm13, %vm2715_vm15  ;;  %3907 = vmatmul.f32.vlgmr.msra.gmra.mxu2 %v7188_v53  ;;  %vm2653_vm15 = vcmp.ge.s32.totalorder %v7628_v63, %v6310_v26  ;;  %vm2942_vm3 = vcmp.lt.s32.totalorder %v7636_v5, %v6312_v28 }
 0x32a   :  { %4872 = vmatpush.msk.msrb.mxu0 %vm2971_vm0, %v5087_v34  ;;  %vm3213_vm14 = vmand %vm2669_vm10, %vm2957_vm2  ;;  %3930 = vmatmul.f32.vlgmr.msra.gmra.mxu3 %v7188_v53  ;;  %vm2941_vm0 = vcmp.lt.s32.totalorder %v7628_v63, %v6312_v28  ;;  %vm2654_vm2 = vcmp.ge.s32.totalorder %v7636_v5, %v6310_v26 }
 0x32b   :  { %4889 = vmatpush.msk.msrb.mxu2 %vm3213_vm14, %v5087_v34  ;;  %vm3214_vm13 = vmand %vm2670_vm5, %vm2958_vm7  ;;  %3953 = vmatmul.f32.vlgmr.msrb.gmra.mxu0 %v7188_v53  ;;  %vm2655_vm7 = vcmp.ge.s32.totalorder %v7644_v1, %v6310_v26  ;;  %vm2943_vm14 = vcmp.lt.s32.totalorder %v7644_v1, %v6312_v28 }
 0x32c   :  { %4905 = vmatpush.msk.msrb.mxu3 %vm3214_vm13, %v5087_v34  ;;  %vm3215_vm10 = vmand %vm2671_vm4, %vm2959_vm6  ;;  %vm2637_vm6 = vcmp.ge.s32.totalorder %v7628_v63, %v6315_v29  ;;  %vm2638_vm13 = vcmp.ge.s32.totalorder %v7636_v5, %v6315_v29 }
 0x32d   :  { %4921 = vmatpush.msk.msra.mxu0 %vm3215_vm10, %v5087_v34  ;;  %vm7691_vm5 = vmand %vm2432_vm8, %vm2720_vm1  ;;  %vm2925_vm8 = vcmp.lt.s32.totalorder %v7628_v63, %v6317_v31  ;;  %vm2926_vm10 = vcmp.lt.s32.totalorder %v7636_v5, %v6317_v31 }
 0x32e   :  { %v8123_v37 = vsel %vm7691_vm5, 4294967295, %v8122_v37  ;;  %4952 = vmatpush.msk.msrb.mxu1 %vm7691_vm5, %v5087_v34  ;;  %vm3197_vm4 = vmand %vm2653_vm15, %vm2941_vm0  ;;  %vm2639_vm0 = vcmp.ge.s32.totalorder %v7644_v1, %v6315_v29  ;;  %vm2927_vm5 = vcmp.lt.s32.totalorder %v7644_v1, %v6317_v31 }
 0x32f   :  { %4068 = vmatmul.f32.vlgmr.msrb.gmra.mxu1 %v7188_v53  ;;  %4890 = vmatpush.msk.msrb.mxu2 %vm3197_vm4, %v5087_v34  ;;  %vm3198_vm1 = vmand %vm2654_vm2, %vm2942_vm3  ;;  %vm2621_vm2 = vcmp.ge.s32.totalorder %v7628_v63, %v6361_v35  ;;  %vm2909_vm3 = vcmp.lt.s32.totalorder %v7628_v63, %v6368_v4  ;;  %vm2910_vm4 = vcmp.lt.s32.totalorder %v7636_v5, %v6368_v4 }
 0x330   :  { %4906 = vmatpush.msk.msrb.mxu3 %vm3198_vm1, %v5087_v34  ;;  %vm3199_vm15 = vmand %vm2655_vm7, %vm2943_vm14  ;;  %vm2622_vm14 = vcmp.ge.s32.totalorder %v7636_v5, %v6361_v35  ;;  %vm2911_vm1 = vcmp.lt.s32.totalorder %v7644_v1, %v6368_v4 }
 0x331   :  { %4922 = vmatpush.msk.msra.mxu0 %vm3199_vm15, %v5087_v34  ;;  %vm3181_vm12 = vmand %vm2637_vm6, %vm2925_vm8  ;;  %3910 = vmatmul.f32.gmra.mxu2 %v7282_v22  ;;  %vm2623_vm8 = vcmp.ge.s32.totalorder %v7644_v1, %v6361_v35  ;;  %vm2606_vm15 = vcmp.ge.s32.totalorder %v7636_v5, %v6393_v33 }
 0x332   :  { %4891 = vmatpush.msk.msrb.mxu2 %vm3181_vm12, %v5087_v34  ;;  %vm3182_vm7 = vmand %vm2638_vm13, %vm2926_vm10  ;;  %3933 = vmatmul.f32.gmra.mxu3 %v7282_v22  ;;  %vm2605_vm13 = vcmp.ge.s32.totalorder %v7628_v63, %v6393_v33  ;;  %vm2893_vm10 = vcmp.lt.s32.totalorder %v7628_v63, %v6400_v36 }
 0x333   :  { %4907 = vmatpush.msk.msrb.mxu3 %vm3182_vm7, %v5087_v34  ;;  %vm3183_vm6 = vmand %vm2639_vm0, %vm2927_vm5  ;;  %3956 = vmatmul.f32.gmra.mxu0 %v7282_v22  ;;  %vm2894_vm0 = vcmp.lt.s32.totalorder %v7636_v5, %v6400_v36 }
 0x334   :  { %4923 = vmatpush.msk.msra.mxu0 %vm3183_vm6, %v5087_v34  ;;  %vm3165_vm12 = vmand %vm2621_vm2, %vm2909_vm3  ;;  %vm2607_vm2 = vcmp.ge.s32.totalorder %v7644_v1, %v6393_v33  ;;  %vm2895_vm3 = vcmp.lt.s32.totalorder %v7644_v1, %v6400_v36 }
 0x335   :  { %4892 = vmatpush.msk.msrb.mxu2 %vm3165_vm12, %v5087_v34  ;;  %vm3166_vm5 = vmand %vm2622_vm14, %vm2910_vm4  ;;  %vm2589_vm14 = vcmp.ge.s32.totalorder %v7628_v63, %v6419_v38  ;;  %vm2877_vm4 = vcmp.lt.s32.totalorder %v7628_v63, %v6426_v39 }
 0x336   :  { %4908 = vmatpush.msk.msrb.mxu3 %vm3166_vm5, %v5087_v34  ;;  %vm3167_vm7 = vmand %vm2623_vm8, %vm2911_vm1  ;;  %vm2590_vm8 = vcmp.ge.s32.totalorder %v7636_v5, %v6419_v38  ;;  %vm2878_vm1 = vcmp.lt.s32.totalorder %v7636_v5, %v6426_v39 }
 0x337   :  { %4924 = vmatpush.msk.msra.mxu0 %vm3167_vm7, %v5087_v34  ;;  %vm3149_vm6 = vmand %vm2605_vm13, %vm2893_vm10  ;;  %vm2591_vm13 = vcmp.ge.s32.totalorder %v7644_v1, %v6419_v38  ;;  %vm2879_vm10 = vcmp.lt.s32.totalorder %v7644_v1, %v6426_v39 }
 0x338   :  { %4893 = vmatpush.msk.msrb.mxu2 %vm3149_vm6, %v5087_v34  ;;  %vm3150_vm12 = vmand %vm2606_vm15, %vm2894_vm0  ;;  %vm2573_vm15 = vcmp.ge.s32.totalorder %v7628_v63, %v6451_v41  ;;  %vm2861_vm0 = vcmp.lt.s32.totalorder %v7628_v63, %v6453_v12 }
 0x339   :  { %4909 = vmatpush.msk.msrb.mxu3 %vm3150_vm12, %v5087_v34  ;;  %vm3151_vm5 = vmand %vm2607_vm2, %vm2895_vm3  ;;  %vm2574_vm2 = vcmp.ge.s32.totalorder %v7636_v5, %v6451_v41  ;;  %vm2862_vm3 = vcmp.lt.s32.totalorder %v7636_v5, %v6453_v12 }
 0x33a   :  { %4925 = vmatpush.msk.msra.mxu0 %vm3151_vm5, %v5087_v34  ;;  %vm3133_vm7 = vmand %vm2589_vm14, %vm2877_vm4  ;;  %vm2575_vm14 = vcmp.ge.s32.totalorder %v7644_v1, %v6451_v41  ;;  %vm2863_vm4 = vcmp.lt.s32.totalorder %v7644_v1, %v6453_v12 }
 0x33b   :  { %4894 = vmatpush.msk.msrb.mxu2 %vm3133_vm7, %v5087_v34  ;;  %vm3134_vm6 = vmand %vm2590_vm8, %vm2878_vm1  ;;  %vm2557_vm8 = vcmp.ge.s32.totalorder %v7628_v63, %v6471_v60  ;;  %vm2845_vm1 = vcmp.lt.s32.totalorder %v7628_v63, %v6473_v42 }
 0x33c   :  { %4910 = vmatpush.msk.msrb.mxu3 %vm3134_vm6, %v5087_v34  ;;  %vm3135_vm12 = vmand %vm2591_vm13, %vm2879_vm10  ;;  %vm2558_vm13 = vcmp.ge.s32.totalorder %v7636_v5, %v6471_v60  ;;  %vm2846_vm10 = vcmp.lt.s32.totalorder %v7636_v5, %v6473_v42 }
 0x33d   :  { %4926 = vmatpush.msk.msra.mxu0 %vm3135_vm12, %v5087_v34  ;;  %vm3117_vm5 = vmand %vm2573_vm15, %vm2861_vm0  ;;  %vm2559_vm15 = vcmp.ge.s32.totalorder %v7644_v1, %v6471_v60  ;;  %vm2847_vm0 = vcmp.lt.s32.totalorder %v7644_v1, %v6473_v42 }
 0x33e   :  { %4895 = vmatpush.msk.msrb.mxu2 %vm3117_vm5, %v5087_v34  ;;  %vm3118_vm7 = vmand %vm2574_vm2, %vm2862_vm3  ;;  %vm2541_vm2 = vcmp.ge.s32.totalorder %v7628_v63, %v6516_v46  ;;  %vm2829_vm3 = vcmp.lt.s32.totalorder %v7628_v63, %v6518_v48 }
 0x33f   :  { %4911 = vmatpush.msk.msrb.mxu3 %vm3118_vm7, %v5087_v34  ;;  %vm3119_vm6 = vmand %vm2575_vm14, %vm2863_vm4  ;;  %vm2542_vm14 = vcmp.ge.s32.totalorder %v7636_v5, %v6516_v46  ;;  %vm2830_vm4 = vcmp.lt.s32.totalorder %v7636_v5, %v6518_v48 }
 0x340   :  { %4927 = vmatpush.msk.msra.mxu0 %vm3119_vm6, %v5087_v34  ;;  %vm3101_vm12 = vmand %vm2557_vm8, %vm2845_vm1  ;;  %vm2543_vm8 = vcmp.ge.s32.totalorder %v7644_v1, %v6516_v46  ;;  %vm2831_vm1 = vcmp.lt.s32.totalorder %v7644_v1, %v6518_v48 }
 0x341   :  { %4896 = vmatpush.msk.msrb.mxu2 %vm3101_vm12, %v5087_v34  ;;  %vm3102_vm5 = vmand %vm2558_vm13, %vm2846_vm10  ;;  %vm2525_vm13 = vcmp.ge.s32.totalorder %v7628_v63, %v6539_v30  ;;  %vm2813_vm10 = vcmp.lt.s32.totalorder %v7628_v63, %v6541_v50 }
 0x342   :  { %4912 = vmatpush.msk.msrb.mxu3 %vm3102_vm5, %v5087_v34  ;;  %vm3103_vm7 = vmand %vm2559_vm15, %vm2847_vm0  ;;  %vm2526_vm15 = vcmp.ge.s32.totalorder %v7636_v5, %v6539_v30  ;;  %vm2814_vm0 = vcmp.lt.s32.totalorder %v7636_v5, %v6541_v50 }
 0x343   :  { %4928 = vmatpush.msk.msra.mxu0 %vm3103_vm7, %v5087_v34  ;;  %vm3085_vm6 = vmand %vm2541_vm2, %vm2829_vm3  ;;  %vm2527_vm2 = vcmp.ge.s32.totalorder %v7644_v1, %v6539_v30  ;;  %vm2815_vm3 = vcmp.lt.s32.totalorder %v7644_v1, %v6541_v50 }
 0x344   :  { %4897 = vmatpush.msk.msrb.mxu2 %vm3085_vm6, %v5087_v34  ;;  %vm3086_vm12 = vmand %vm2542_vm14, %vm2830_vm4  ;;  %vm2509_vm14 = vcmp.ge.s32.totalorder %v7628_v63, %v6578_v49  ;;  %vm2797_vm4 = vcmp.lt.s32.totalorder %v7628_v63, %v6585_v57 }
 0x345   :  { %4913 = vmatpush.msk.msrb.mxu3 %vm3086_vm12, %v5087_v34  ;;  %vm3087_vm5 = vmand %vm2543_vm8, %vm2831_vm1  ;;  %vm2510_vm8 = vcmp.ge.s32.totalorder %v7636_v5, %v6578_v49  ;;  %vm2798_vm1 = vcmp.lt.s32.totalorder %v7636_v5, %v6585_v57 }
 0x346   :  { %4929 = vmatpush.msk.msra.mxu0 %vm3087_vm5, %v5087_v34  ;;  %vm3069_vm7 = vmand %vm2525_vm13, %vm2813_vm10  ;;  %vm2511_vm13 = vcmp.ge.s32.totalorder %v7644_v1, %v6578_v49  ;;  %vm2799_vm10 = vcmp.lt.s32.totalorder %v7644_v1, %v6585_v57 }
 0x347   :  { %4898 = vmatpush.msk.msrb.mxu2 %vm3069_vm7, %v5087_v34  ;;  %vm3070_vm6 = vmand %vm2526_vm15, %vm2814_vm0  ;;  %vm2493_vm15 = vcmp.ge.s32.totalorder %v7628_v63, %v6607_v54  ;;  %vm2781_vm0 = vcmp.lt.s32.totalorder %v7628_v63, %v6614_v59 }
 0x348   :  { %4914 = vmatpush.msk.msrb.mxu3 %vm3070_vm6, %v5087_v34  ;;  %vm3071_vm12 = vmand %vm2527_vm2, %vm2815_vm3  ;;  %vm2494_vm2 = vcmp.ge.s32.totalorder %v7636_v5, %v6607_v54  ;;  %vm2782_vm3 = vcmp.lt.s32.totalorder %v7636_v5, %v6614_v59 }
 0x349   :  { %4930 = vmatpush.msk.msra.mxu0 %vm3071_vm12, %v5087_v34  ;;  %vm3053_vm5 = vmand %vm2509_vm14, %vm2797_vm4  ;;  %vm2495_vm14 = vcmp.ge.s32.totalorder %v7644_v1, %v6607_v54  ;;  %vm2783_vm4 = vcmp.lt.s32.totalorder %v7644_v1, %v6614_v59 }
 0x34a   :  { %4899 = vmatpush.msk.msrb.mxu2 %vm3053_vm5, %v5087_v34  ;;  %vm3054_vm7 = vmand %vm2510_vm8, %vm2798_vm1  ;;  %vm2477_vm8 = vcmp.ge.s32.totalorder %v7628_v63, %v6633_v20  ;;  %vm2765_vm1 = vcmp.lt.s32.totalorder %v7628_v63, %v6640_v62 }
 0x34b   :  { %4915 = vmatpush.msk.msrb.mxu3 %vm3054_vm7, %v5087_v34  ;;  %vm3055_vm6 = vmand %vm2511_vm13, %vm2799_vm10  ;;  %vm2478_vm13 = vcmp.ge.s32.totalorder %v7636_v5, %v6633_v20  ;;  %vm2766_vm10 = vcmp.lt.s32.totalorder %v7636_v5, %v6640_v62 }
 0x34c   :  { %4931 = vmatpush.msk.msra.mxu0 %vm3055_vm6, %v5087_v34  ;;  %vm3037_vm12 = vmand %vm2493_vm15, %vm2781_vm0  ;;  %vm2479_vm15 = vcmp.ge.s32.totalorder %v7644_v1, %v6633_v20  ;;  %vm2767_vm0 = vcmp.lt.s32.totalorder %v7644_v1, %v6640_v62 }
 0x34d   :  { %4900 = vmatpush.msk.msrb.mxu2 %vm3037_vm12, %v5087_v34  ;;  %vm3038_vm5 = vmand %vm2494_vm2, %vm2782_vm3  ;;  %vm2461_vm2 = vcmp.ge.s32.totalorder %v7628_v63, %v6659_v27  ;;  %vm2749_vm3 = vcmp.lt.s32.totalorder %v7628_v63, %v6666_v0 }
 0x34e   :  { %4916 = vmatpush.msk.msrb.mxu3 %vm3038_vm5, %v5087_v34  ;;  %vm3039_vm7 = vmand %vm2495_vm14, %vm2783_vm4  ;;  %vm2462_vm14 = vcmp.ge.s32.totalorder %v7636_v5, %v6659_v27  ;;  %vm2750_vm4 = vcmp.lt.s32.totalorder %v7636_v5, %v6666_v0 }
 0x34f   :  { %4932 = vmatpush.msk.msra.mxu0 %vm3039_vm7, %v5087_v34  ;;  %vm3021_vm6 = vmand %vm2477_vm8, %vm2765_vm1  ;;  %vm2463_vm8 = vcmp.ge.s32.totalorder %v7644_v1, %v6659_v27  ;;  %vm2751_vm1 = vcmp.lt.s32.totalorder %v7644_v1, %v6666_v0 }
 0x350   :  { %4901 = vmatpush.msk.msrb.mxu2 %vm3021_vm6, %v5087_v34  ;;  %vm3022_vm12 = vmand %vm2478_vm13, %vm2766_vm10  ;;  %vm2445_vm13 = vcmp.ge.s32.totalorder %v7628_v63, %v6685_v47  ;;  %vm2733_vm10 = vcmp.lt.s32.totalorder %v7628_v63, %v6692_v6 }
 0x351   :  { %4917 = vmatpush.msk.msrb.mxu3 %vm3022_vm12, %v5087_v34  ;;  %vm3023_vm5 = vmand %vm2479_vm15, %vm2767_vm0  ;;  %vm2446_vm15 = vcmp.ge.s32.totalorder %v7636_v5, %v6685_v47  ;;  %vm2734_vm0 = vcmp.lt.s32.totalorder %v7636_v5, %v6692_v6 }
 0x352   :  { %4933 = vmatpush.msk.msra.mxu0 %vm3023_vm5, %v5087_v34  ;;  %vm3005_vm7 = vmand %vm2461_vm2, %vm2749_vm3  ;;  %vm2447_vm2 = vcmp.ge.s32.totalorder %v7644_v1, %v6685_v47  ;;  %vm2735_vm3 = vcmp.lt.s32.totalorder %v7644_v1, %v6692_v6  ;;  %vm2717_vm5 = vcmp.lt.s32.totalorder %v7628_v63, %v6723_v9 }
 0x353   :  { %4902 = vmatpush.msk.msrb.mxu2 %vm3005_vm7, %v5087_v34  ;;  %vm3006_vm6 = vmand %vm2462_vm14, %vm2750_vm4  ;;  %vm2429_vm4 = vcmp.ge.s32.totalorder %v7628_v63, %v6721_v8  ;;  %vm2718_vm7 = vcmp.lt.s32.totalorder %v7636_v5, %v6723_v9  ;;  %v5018_v63 = vld [vmem:[#allocation2 + $0x40] sm:$0xff] }
 0x354   :  { %4918 = vmatpush.msk.msrb.mxu3 %vm3006_vm6, %v5087_v34  ;;  %vm3007_vm12 = vmand %vm2463_vm8, %vm2751_vm1  ;;  %vm2430_vm1 = vcmp.ge.s32.totalorder %v7636_v5, %v6721_v8 }
 0x355   :  { %4934 = vmatpush.msk.msra.mxu0 %vm3007_vm12, %v5087_v34  ;;  %vm2989_vm14 = vmand %vm2445_vm13, %vm2733_vm10  ;;  %vm2431_vm13 = vcmp.ge.s32.totalorder %v7644_v1, %v6721_v8  ;;  %vm2719_vm10 = vcmp.lt.s32.totalorder %v7644_v1, %v6723_v9 }
 0x356   :  { %4903 = vmatpush.msk.msrb.mxu2 %vm2989_vm14, %v5087_v34  ;;  %vm2990_vm8 = vmand %vm2446_vm15, %vm2734_vm0  ;;  %vm2673_vm15 = vcmp.ge.s32.totalorder %v7901_v55, %v6305_v23  ;;  %vm2961_vm0 = vcmp.lt.s32.totalorder %v7901_v55, %v6307_v25  ;;  %v4999_v25 = vld [vmem:[#allocation2 + $0x10] sm:$0xff] }
 0x357   :  { %4919 = vmatpush.msk.msrb.mxu3 %vm2990_vm8, %v5087_v34  ;;  %vm2991_vm6 = vmand %vm2447_vm2, %vm2735_vm3  ;;  %vm2657_vm2 = vcmp.ge.s32.totalorder %v7901_v55, %v6310_v26  ;;  %vm2945_vm3 = vcmp.lt.s32.totalorder %v7901_v55, %v6312_v28  ;;  %v5000_v28 = vld [vmem:[#allocation2 + $0x30] sm:$0xff] }
 0x358   :  { %4935 = vmatpush.msk.msra.mxu0 %vm2991_vm6, %v5087_v34  ;;  %vm2973_vm12 = vmand %vm2429_vm4, %vm2717_vm5  ;;  %vm2641_vm5 = vcmp.ge.s32.totalorder %v7901_v55, %v6315_v29  ;;  %vm2625_vm6 = vcmp.ge.s32.totalorder %v7901_v55, %v6361_v35 }
 0x359   :  { %4904 = vmatpush.msk.msrb.mxu2 %vm2973_vm12, %v5087_v34  ;;  %vm2974_vm14 = vmand %vm2430_vm1, %vm2718_vm7  ;;  %vm2929_vm1 = vcmp.lt.s32.totalorder %v7901_v55, %v6317_v31  ;;  %vm2609_vm12 = vcmp.ge.s32.totalorder %v7901_v55, %v6393_v33 }
 0x35a   :  { %4920 = vmatpush.msk.msrb.mxu3 %vm2974_vm14, %v5087_v34  ;;  %vm2975_vm8 = vmand %vm2431_vm13, %vm2719_vm10  ;;  %3999 = vmatmul.f32.vlgmr.msrb.gmra.mxu2 %v7188_v53  ;;  %vm2913_vm13 = vcmp.lt.s32.totalorder %v7901_v55, %v6368_v4  ;;  %vm2593_vm14 = vcmp.ge.s32.totalorder %v7901_v55, %v6419_v38  ;;  %v5001_v4 = vld [vmem:[#allocation2] sm:$0xff] }
 0x35b   :  { %4936 = vmatpush.msk.msra.mxu0 %vm2975_vm8, %v5087_v34  ;;  %4022 = vmatmul.f32.vlgmr.msrb.gmra.mxu3 %v7188_v53  ;;  %vm3217_vm4 = vmand %vm2673_vm15, %vm2961_vm0  ;;  %vm8124_vm15 = vnez %v8097_v3  ;;  %vm2577_vm8 = vcmp.ge.s32.totalorder %v7901_v55, %v6451_v41  ;;  %v5003_v41 = vld [vmem:[#allocation2 + $0x90] sm:$0xff] }
 0x35c   :  { %4045 = vmatmul.f32.vlgmr.msra.gmra.mxu0 %v7188_v53  ;;  %4969 = vmatpush.msk.msra.mxu3 %vm7246_vm9, %v5087_v34  ;;  %vm3201_vm7 = vmand %vm2657_vm2, %vm2945_vm3  ;;  %vm2897_vm9 = vcmp.lt.s32.totalorder %v7901_v55, %v6400_v36  ;;  %vm8125_vm2 = vnez %v8099_v7  ;;  %v5002_v36 = vld [vmem:[#allocation2 + $0x8] sm:$0xff]  ;;  %v5014_v7 = vld [vmem:[#allocation2 + $0xa0] sm:$0xff] }
 0x35d   :  { %4953 = vmatpush.msk.msra.mxu2 %vm3217_vm4, %v5087_v34  ;;  %vm3185_vm10 = vmand %vm2641_vm5, %vm2929_vm1  ;;  %vm2865_vm4 = vcmp.lt.s32.totalorder %v7901_v55, %v6453_v12  ;;  %vm8126_vm5 = vnez %v8101_v16 }
 0x35e   :  { %4970 = vmatpush.msk.msra.mxu3 %vm7288_vm11, %v5087_v34  ;;  %vm3169_vm0 = vmand %vm2625_vm6, %vm2913_vm13  ;;  %vm2881_vm11 = vcmp.lt.s32.totalorder %v7901_v55, %v6426_v39  ;;  %vm2849_vm6 = vcmp.lt.s32.totalorder %v7901_v55, %v6473_v42  ;;  %vm8127_vm13 = vnez %v8103_v10  ;;  %v5004_v42 = vld [vmem:[#allocation2 + $0xb0] sm:$0xff] }
 0x35f   :  { %4954 = vmatpush.msk.msra.mxu2 %vm3201_vm7, %v5087_v34  ;;  %vm3153_vm3 = vmand %vm2609_vm12, %vm2897_vm9  ;;  %vm2561_vm7 = vcmp.ge.s32.totalorder %v7901_v55, %v6471_v60  ;;  %vm2545_vm12 = vcmp.ge.s32.totalorder %v7901_v55, %v6516_v46  ;;  %vm2833_vm9 = vcmp.lt.s32.totalorder %v7901_v55, %v6518_v48 }
 0x360   :  { %4971 = vmatpush.msk.msra.mxu3 %vm8124_vm15, %v5087_v34  ;;  %vm3137_vm1 = vmand %vm2593_vm14, %vm2881_vm11  ;;  %vm8128_vm15 = vnez %v8105_v40  ;;  %vm2529_vm14 = vcmp.ge.s32.totalorder %v7901_v55, %v6539_v30  ;;  %vm2817_vm11 = vcmp.lt.s32.totalorder %v7901_v55, %v6541_v50  ;;  %v5005_v30 = vld [vmem:[#allocation2 + $0x80] sm:$0xff]  ;;  %v5015_v40 = vld [vmem:[#allocation2 + $0x48] sm:$0xff] }
 0x361   :  { %4955 = vmatpush.msk.msra.mxu2 %vm3185_vm10, %v5087_v34  ;;  %vm3121_vm10 = vmand %vm2577_vm8, %vm2865_vm4  ;;  %vm2513_vm8 = vcmp.ge.s32.totalorder %v7901_v55, %v6578_v49  ;;  %vm2801_vm4 = vcmp.lt.s32.totalorder %v7901_v55, %v6585_v57  ;;  %v5006_v57 = vld [vmem:[#allocation2 + $0x88] sm:$0xff] }
 0x362   :  { %4972 = vmatpush.msk.msra.mxu3 %vm8125_vm2, %v5087_v34  ;;  %4002 = vmatmul.f32.gmra.mxu2 %v7282_v22  ;;  %vm8129_vm2 = vnez %v8107_v43 }
 0x363   :  { %4956 = vmatpush.msk.msra.mxu2 %vm3169_vm0, %v5087_v34  ;;  %4025 = vmatmul.f32.gmra.mxu3 %v7282_v22  ;;  %vm3105_vm0 = vmand %vm2561_vm7, %vm2849_vm6  ;;  %vm2497_vm7 = vcmp.ge.s32.totalorder %v7901_v55, %v6607_v54  ;;  %vm2785_vm6 = vcmp.lt.s32.totalorder %v7901_v55, %v6614_v59 }
 0x364   :  { %4048 = vmatmul.f32.gmra.mxu0 %v7282_v22  ;;  %4973 = vmatpush.msk.msra.mxu3 %vm8126_vm5, %v5087_v34  ;;  %vm8130_vm5 = vnez %v8109_v44 }
 0x365   :  { %4957 = vmatpush.msk.msra.mxu2 %vm3153_vm3, %v5087_v34  ;;  %vm3089_vm3 = vmand %vm2545_vm12, %vm2833_vm9  ;;  %vm2481_vm12 = vcmp.ge.s32.totalorder %v7901_v55, %v6633_v20  ;;  %vm2769_vm9 = vcmp.lt.s32.totalorder %v7901_v55, %v6640_v62  ;;  %v5007_v20 = vld [vmem:[#allocation2 + $0x28] sm:$0xff] }
 0x366   :  { %4974 = vmatpush.msk.msra.mxu3 %vm8127_vm13, %v5087_v34  ;;  %vm8131_vm13 = vnez %v8111_v24 }
 0x367   :  { %4958 = vmatpush.msk.msra.mxu2 %vm3137_vm1, %v5087_v34  ;;  %vm3073_vm1 = vmand %vm2529_vm14, %vm2817_vm11  ;;  %vm2465_vm14 = vcmp.ge.s32.totalorder %v7901_v55, %v6659_v27  ;;  %vm2753_vm11 = vcmp.lt.s32.totalorder %v7901_v55, %v6666_v0  ;;  %v5008_v0 = vld [vmem:[#allocation2 + $0x50] sm:$0xff] }
 0x368   :  { %4975 = vmatpush.msk.msra.mxu3 %vm8128_vm15, %v5087_v34  ;;  %vm8132_vm15 = vnez %v8113_v51  ;;  %v5016_v51 = vld [vmem:[#allocation2 + $0x70] sm:$0xff] }
 0x369   :  { %4959 = vmatpush.msk.msra.mxu2 %vm3121_vm10, %v5087_v34  ;;  %vm3057_vm10 = vmand %vm2513_vm8, %vm2801_vm4  ;;  %vm2449_vm8 = vcmp.ge.s32.totalorder %v7901_v55, %v6685_v47  ;;  %vm2737_vm4 = vcmp.lt.s32.totalorder %v7901_v55, %v6692_v6 }
 0x36a   :  { %4976 = vmatpush.msk.msra.mxu3 %vm8129_vm2, %v5087_v34  ;;  %vm8133_vm2 = vnez %v8115_v56  ;;  %v5017_v56 = vld [vmem:[#allocation2 + $0x38] sm:$0xff] }
 0x36b   :  { %v3793_v2 = vpop.f32.mrf.mxu0  ;;  %v3885_v23 = vpop.f32.mrf.mxu1  ;;  %4960 = vmatpush.msk.msra.mxu2 %vm3105_vm0, %v5087_v34  ;;  %vm3041_vm0 = vmand %vm2497_vm7, %vm2785_vm6  ;;  %vm2433_vm7 = vcmp.ge.s32.totalorder %v7901_v55, %v6721_v8  ;;  %vm2721_vm6 = vcmp.lt.s32.totalorder %v7901_v55, %v6723_v9  ;;  %v5009_v8 = vld [vmem:[#allocation2 + $0x18] sm:$0xff] }
 0x36c   :  { %v4100_v26 = vmul.f32 %v4999_v25, %v3793_v2  ;;  %v4104_v29 = vmul.f32 %v5000_v28, %v3885_v23  ;;  %4977 = vmatpush.msk.msra.mxu3 %vm8130_vm5, %v5087_v34  ;;  %vm8134_vm5 = vnez %v8117_v58  ;;  %v5020_v2 = vld [vmem:[#allocation2 + $0xb8] sm:$0xff] }
 0x36d   :  { %4961 = vmatpush.msk.msra.mxu2 %vm3089_vm3, %v5087_v34  ;;  %vm3025_vm3 = vmand %vm2481_vm12, %vm2769_vm9  ;;  %vm8136_vm12 = vnez %v8121_v11  ;;  %v5019_v11 = vld [vmem:[#allocation2 + $0xc8] sm:$0xff] }
 0x36e   :  { %4132 = vst [vmem:[#allocation5 + $0x10] sm:$0xff] %v4100_v26  ;;  %4978 = vmatpush.msk.msra.mxu3 %vm8131_vm13, %v5087_v34  ;;  %vm8135_vm13 = vnez %v8119_v61  ;;  %vm2977_vm9 = vmand %vm2433_vm7, %vm2721_vm6  ;;  %v5021_v26 = vld [vmem:[#allocation2 + $0xc0] sm:$0xff] }
 0x36f   :  { %4136 = vst [vmem:[#allocation5 + $0x30] sm:$0xff] %v4104_v29  ;;  %4962 = vmatpush.msk.msra.mxu2 %vm3073_vm1, %v5087_v34  ;;  %vm3009_vm1 = vmand %vm2465_vm14, %vm2753_vm11 }
 0x370   :  { %v3747_v31 = vpop.f32.mrf.mxu2  ;;  %v3770_v35 = vpop.f32.mrf.mxu3  ;;  %4979 = vmatpush.msk.msra.mxu3 %vm8132_vm15, %v5087_v34  ;;  %vm8137_vm15 = vnez %v8123_v37 }
 0x371   :  { %v4098_v33 = vmul.f32 %v5001_v4, %v3747_v31  ;;  %v4099_v38 = vmul.f32 %v5002_v36, %v3770_v35  ;;  %4963 = vmatpush.msk.msra.mxu2 %vm3057_vm10, %v5087_v34  ;;  %vm2993_vm10 = vmand %vm2449_vm8, %vm2737_vm4  ;;  %v5022_v31 = vld [vmem:[#allocation2 + $0x68] sm:$0xff] }
 0x372   :  { %4980 = vmatpush.msk.msra.mxu3 %vm8133_vm2, %v5087_v34 }
 0x373   :  { %4130 = vst [vmem:[#allocation5] sm:$0xff] %v4098_v33  ;;  %v3796_v39 = vpop.f32.mrf.mxu0  ;;  %4964 = vmatpush.msk.msra.mxu2 %vm3041_vm0, %v5087_v34  ;;  %v5023_v33 = vld [vmem:[#allocation2 + $0x58] sm:$0xff] }
 0x374   :  { %4131 = vst [vmem:[#allocation5 + $0x8] sm:$0xff] %v4099_v38  ;;  %v4116_v12 = vmul.f32 %v5003_v41, %v3796_v39  ;;  %v3888_v60 = vpop.f32.mrf.mxu1  ;;  %4981 = vmatpush.msk.msra.mxu3 %vm8134_vm5, %v5087_v34  ;;  %v5024_v39 = vld [vmem:[#allocation2 + $0x60] sm:$0xff] }
 0x375   :  { %v4120_v46 = vmul.f32 %v5004_v42, %v3888_v60  ;;  %4965 = vmatpush.msk.msra.mxu2 %vm3025_vm3, %v5087_v34  ;;  %v5025_v60 = vld [vmem:[#allocation2 + $0xe8] sm:$0xff] }
 0x376   :  { %4148 = vst [vmem:[#allocation5 + $0x90] sm:$0xff] %v4116_v12  ;;  %4982 = vmatpush.msk.msra.mxu3 %vm8135_vm13, %v5087_v34 }
 0x377   :  { %4152 = vst [vmem:[#allocation5 + $0xb0] sm:$0xff] %v4120_v46  ;;  %4966 = vmatpush.msk.msra.mxu2 %vm3009_vm1, %v5087_v34 }
 0x378   :  { %v3750_v48 = vpop.f32.mrf.mxu2  ;;  %v3773_v49 = vpop.f32.mrf.mxu3  ;;  %4983 = vmatpush.msk.msra.mxu3 %vm8136_vm12, %v5087_v34 }
 0x379   :  { %v4114_v50 = vmul.f32 %v5005_v30, %v3750_v48  ;;  %v4115_v54 = vmul.f32 %v5006_v57, %v3773_v49  ;;  %4967 = vmatpush.msk.msra.mxu2 %vm2993_vm10, %v5087_v34  ;;  %v5026_v48 = vld [vmem:[#allocation2 + $0xd8] sm:$0xff]  ;;  %v5027_v49 = vld [vmem:[#allocation2 + $0xe0] sm:$0xff] }
 0x37a   :  { %4984 = vmatpush.msk.msra.mxu3 %vm8137_vm15, %v5087_v34 }
 0x37b   :  { %4146 = vst [vmem:[#allocation5 + $0x80] sm:$0xff] %v4114_v50  ;;  %v3862_v59 = vpop.f32.mrf.mxu0  ;;  %4968 = vmatpush.msk.msra.mxu2 %vm2977_vm9, %v5087_v34  ;;  %4071 = vmatmul.f32.vlgmr.msra.gmra.mxu3 %v7282_v22 }
 0x37c   :  { %4147 = vst [vmem:[#allocation5 + $0x88] sm:$0xff] %v4115_v54  ;;  %v4103_v62 = vmul.f32 %v5007_v20, %v3862_v59  ;;  %v3977_v27 = vpop.f32.mrf.mxu1  ;;  %4091 = vmatmul.f32.vlgmr.msra.gmra.mxu2 %v7188_v53  ;;  %v5028_v59 = vld [vmem:[#allocation2 + $0xf0] sm:$0xff] }
 0x37d   :  { %v4108_v47 = vmul.f32 %v5008_v0, %v3977_v27  ;;  %v5029_v27 = vld [vmem:[#allocation2 + $0x78] sm:$0xff] }
 0x37e   :  { %4135 = vst [vmem:[#allocation5 + $0x28] sm:$0xff] %v4103_v62 }
 0x37f   :  { %4140 = vst [vmem:[#allocation5 + $0x50] sm:$0xff] %v4108_v47 }
 0x380   :  { %v3816_v6 = vpop.f32.mrf.mxu2  ;;  %v3839_v45 = vpop.f32.mrf.mxu3 }
 0x381   :  { %v4101_v9 = vmul.f32 %v5009_v8, %v3816_v6  ;;  %v4102_v13 = vmul.f32 %v5010_v52, %v3839_v45  ;;  %v5030_v6 = vld [vmem:[#allocation2 + $0xf8] sm:$0xff] }
 0x383   :  { %4133 = vst [vmem:[#allocation5 + $0x18] sm:$0xff] %v4101_v9  ;;  %v3865_v34 = vpop.f32.mrf.mxu0 }
 0x384   :  { %4134 = vst [vmem:[#allocation5 + $0x20] sm:$0xff] %v4102_v13  ;;  %v4119_v17 = vmul.f32 %v5011_v15, %v3865_v34  ;;  %v3980_v18 = vpop.f32.mrf.mxu1  ;;  %4094 = vmatmul.f32.gmra.mxu2 %v7282_v22 }
 0x385   :  { %v4124_v53 = vmul.f32 %v5012_v14, %v3980_v18 }
 0x386   :  { %4151 = vst [vmem:[#allocation5 + $0xa8] sm:$0xff] %v4119_v17 }
 0x387   :  { %4156 = vst [vmem:[#allocation5 + $0xd0] sm:$0xff] %v4124_v53 }
 0x388   :  { %v3819_v19 = vpop.f32.mrf.mxu2  ;;  %v3842_v3 = vpop.f32.mrf.mxu3 }
 0x389   :  { %v4117_v32 = vmul.f32 %v5013_v21, %v3819_v19  ;;  %v4118_v16 = vmul.f32 %v5014_v7, %v3842_v3 }
 0x38b   :  { %4149 = vst [vmem:[#allocation5 + $0x98] sm:$0xff] %v4117_v32 }
 0x38c   :  { %4150 = vst [vmem:[#allocation5 + $0xa0] sm:$0xff] %v4118_v16 }
 0x3a8   :  { %v3954_v10 = vpop.f32.mrf.mxu0 }
 0x3a9   :  { %v4107_v43 = vmul.f32 %v5015_v40, %v3954_v10 }
 0x3ab   :  { %4139 = vst [vmem:[#allocation5 + $0x48] sm:$0xff] %v4107_v43 }
 0x3ac   :  { %v4069_v44 = vpop.f32.mrf.mxu1  ;;  %v3908_v24 = vpop.f32.mrf.mxu2 }
 0x3ad   :  { %v4112_v22 = vmul.f32 %v5016_v51, %v4069_v44  ;;  %v4105_v58 = vmul.f32 %v5017_v56, %v3908_v24  ;;  %v3931_v61 = vpop.f32.mrf.mxu3 }
 0x3ae   :  { %v4106_v5 = vmul.f32 %v5018_v63, %v3931_v61 }
 0x3af   :  { %4144 = vst [vmem:[#allocation5 + $0x70] sm:$0xff] %v4112_v22 }
 0x3b0   :  { %4137 = vst [vmem:[#allocation5 + $0x38] sm:$0xff] %v4105_v58  ;;  %v3957_v1 = vpop.f32.mrf.mxu0 }
 0x3b1   :  { %4138 = vst [vmem:[#allocation5 + $0x40] sm:$0xff] %v4106_v5  ;;  %v4123_v37 = vmul.f32 %v5019_v11, %v3957_v1 }
 0x3b3   :  { %4155 = vst [vmem:[#allocation5 + $0xc8] sm:$0xff] %v4123_v37 }
 0x3b4   :  { %v3911_v55 = vpop.f32.mrf.mxu2 }
 0x3b5   :  { %v4121_v23 = vmul.f32 %v5020_v2, %v3911_v55  ;;  %v3934_v25 = vpop.f32.mrf.mxu3 }
 0x3b6   :  { %v4122_v28 = vmul.f32 %v5021_v26, %v3934_v25 }
 0x3b7   :  { %4153 = vst [vmem:[#allocation5 + $0xb8] sm:$0xff] %v4121_v23 }
 0x3b8   :  { %4154 = vst [vmem:[#allocation5 + $0xc0] sm:$0xff] %v4122_v28 }
 0x3d9   :  { %v4046_v29 = vpop.f32.mrf.mxu0 }
 0x3da   :  { %v4111_v35 = vmul.f32 %v5022_v31, %v4046_v29 }
 0x3dc   :  { %4143 = vst [vmem:[#allocation5 + $0x68] sm:$0xff] %v4111_v35 }
 0x3dd   :  { %v4000_v4 = vpop.f32.mrf.mxu2 }
 0x3de   :  { %v4109_v36 = vmul.f32 %v5023_v33, %v4000_v4  ;;  %v4023_v38 = vpop.f32.mrf.mxu3 }
 0x3df   :  { %v4110_v41 = vmul.f32 %v5024_v39, %v4023_v38 }
 0x3e0   :  { %4141 = vst [vmem:[#allocation5 + $0x58] sm:$0xff] %v4109_v36 }
 0x3e1   :  { %4142 = vst [vmem:[#allocation5 + $0x60] sm:$0xff] %v4110_v41  ;;  %v4049_v12 = vpop.f32.mrf.mxu0 }
 0x3e2   :  { %v4127_v42 = vmul.f32 %v5025_v60, %v4049_v12 }
 0x3e4   :  { %4159 = vst [vmem:[#allocation5 + $0xe8] sm:$0xff] %v4127_v42 }
 0x3e5   :  { %v4003_v46 = vpop.f32.mrf.mxu2 }
 0x3e6   :  { %v4125_v30 = vmul.f32 %v5026_v48, %v4003_v46  ;;  %v4026_v50 = vpop.f32.mrf.mxu3 }
 0x3e7   :  { %v4126_v57 = vmul.f32 %v5027_v49, %v4026_v50 }
 0x3e8   :  { %4157 = vst [vmem:[#allocation5 + $0xd8] sm:$0xff] %v4125_v30 }
 0x3e9   :  { %4158 = vst [vmem:[#allocation5 + $0xe0] sm:$0xff] %v4126_v57 }
 0x3fe   :  { %v4072_v54 = vpop.f32.mrf.mxu3 }
 0x3ff   :  { %v4128_v20 = vmul.f32 %v5028_v59, %v4072_v54  ;;  %v4092_v62 = vpop.f32.mrf.mxu2 }
 0x400   :  { %v4113_v0 = vmul.f32 %v5029_v27, %v4092_v62 }
 0x401   :  { %4160 = vst [vmem:[#allocation5 + $0xf0] sm:$0xff] %v4128_v20 }
 0x402   :  { %4145 = vst [vmem:[#allocation5 + $0x78] sm:$0xff] %v4113_v0 }
 0x407   :  { %v4095_v47 = vpop.f32.mrf.mxu2 }
 0x408   :  { %v4129_v8 = vmul.f32 %v5030_v6, %v4095_v47 }
 0x40a   :  { %4161 = vst [vmem:[#allocation5 + $0xf8] sm:$0xff] %v4129_v8 }
 0x40b   :  { %4174 = dma.vmem_to_hbm [thread:$0]  %s4167_s24, 4096, %s4169_s27, [#allocation4], %s5084_s17, %s5084_s17, %s5085_s18  }
 0x40c   :  { %5081 = dma.done.wait [#allocation4], 4096  }
 0x40d   :  { %5082 = vsyncadd [#allocation4], 4294963200 }
 0x40e   :  { %4179 = vsyncpa [#allocation3], 1 }
 0x40f   :  { %4180 = vsyncpa [#allocation4], 1 }

</bundles_post_ra>
